<compile_context>
chip_gen: v6e
topology: v6e:2x2x1
jax: 0.10.0
libtpu: 0.0.40
codegen_flags: <defaults>
</compile_context>

<pallas_src>
import jax
import jax.numpy as jnp
from jax.experimental import pallas as pl
from jax.experimental.pallas import tpu as pltpu

L1_OUT = 512
L2_OUT = 32

# Sized to the most restrictive default scoped-VMEM budget (v5e: 16 MiB);
# raise via CompilerParams(vmem_limit_bytes=...) if larger H must stay resident.
_RESIDENT_VMEM_BUDGET = 14 << 20
_KTILE_VMEM_BUDGET = 10 << 20


def _round_up(a, m):
    return ((a + m - 1) // m) * m


# --------------------------- shared tail math ------------------------------ #
def _tail(h1, w2, b2, w3_col, b3_val, y, logits_ref, loss_ref):
    """h1 (tb, 512) post-ReLU -> sigmoid MLP tail with lane-dense (1, tb) outs."""
    h2 = jax.nn.sigmoid(
        jnp.dot(h1, w2, preferred_element_type=jnp.float32) + b2)       # (tb, 32)
    # N=1 output matmul as VPU multiply + sublane (XLU) reduction, computed in
    # the transposed orientation so stores are lane-dense (last dim = tb).
    h2t = h2.T                                                           # (32, tb)
    z = jnp.sum(h2t * w3_col, axis=0, keepdims=True) + b3_val            # (1, tb)
    p = jax.nn.sigmoid(z)
    logits_ref[...] = p
    # Per-row BCE with log clamped at -100 (torch.nn.BCELoss stability).
    log_p = jnp.maximum(jnp.log(p), -100.0)
    log_1mp = jnp.maximum(jnp.log(1.0 - p), -100.0)
    loss_ref[...] = -(y * log_p + (1.0 - y) * log_1mp)


# ------------------------------ kernels ------------------------------------ #
def _head_resident_kernel(x_ref, w1_ref, b1_ref, w2_ref, b2_ref,
                          w3_ref, b3_ref, labels_ref, logits_ref, loss_ref):
    # x arrives f32; cast to bf16 on the VPU (hidden under the MXU) so only
    # 4 B/elem of x crosses HBM and there is no wrapper cast pass.
    x = x_ref[...].astype(jnp.bfloat16)
    h1 = jnp.dot(x, w1_ref[...], preferred_element_type=jnp.float32) + b1_ref[...]
    h1 = jnp.maximum(h1, 0.0)
    _tail(h1, w2_ref[...], b2_ref[...], w3_ref[...], b3_ref[0, 0],
          labels_ref[...], logits_ref, loss_ref)


def _head_ktiled_kernel(x_ref, w1_ref, b1_ref, w2_ref, b2_ref,
                        w3_ref, b3_ref, labels_ref, logits_ref, loss_ref,
                        acc_ref):
    # grid = (batch_tiles, k_tiles); K (hidden_size reduction) is last.
    k = pl.program_id(1)

    @pl.when(k == 0)
    def _():  # fold b1 into the accumulator init
        acc_ref[...] = jnp.broadcast_to(b1_ref[...], acc_ref.shape)

    x = x_ref[...].astype(jnp.bfloat16)
    acc_ref[...] += jnp.dot(x, w1_ref[...], preferred_element_type=jnp.float32)

    @pl.when(k == pl.num_programs(1) - 1)
    def _():
        h1 = jnp.maximum(acc_ref[...], 0.0)
        _tail(h1, w2_ref[...], b2_ref[...], w3_ref[...], b3_ref[0, 0],
              labels_ref[...], logits_ref, loss_ref)


# ------------------------------ wrapper ------------------------------------ #
def classifier_head(hidden_states, params, labels, *, tb=None, tk=None,
                    force_ktiled=False):
    """hidden_states (B, H) f32, labels (B,) -> (probs (B, 1), per-row BCE (B,))."""
    B, H = hidden_states.shape
    w1, b1, w2, b2, w3_col, b3 = params

    # Batch tile: fill the MXU M dim when B is large, keep >= 2 tiles so both
    # v7x TensorCores get work, and never over-pad tiny batches.
    if tb is None:
        if B <= 128:
            tb = _round_up(B, 8)
        elif _round_up(B, 256) // 256 >= 2:
            tb = 256
        else:
            tb = 128
    Bp = _round_up(B, tb)

    x = hidden_states                                       # stays f32 in HBM
    lbl = labels.astype(jnp.float32).reshape(1, B)          # lane-dense labels
    if Bp != B:
        x = jnp.pad(x, ((0, Bp - B), (0, 0)))
        lbl = jnp.pad(lbl, ((0, 0), (0, Bp - B)))

    out_shape = (jax.ShapeDtypeStruct((1, Bp), jnp.float32),   # probabilities
                 jax.ShapeDtypeStruct((1, Bp), jnp.float32))   # per-row BCE

    # w1 fully VMEM-resident unless that would blow the conservative budget
    # (binding on v7x's smaller VMEM / v5e's small default scoped VMEM).
    w1_bytes = 2 * H * L1_OUT * 2          # conservatively count double-buffering
    x_bytes = 2 * tb * H * 4               # streamed f32 batch tile, double-buffered
    use_resident = (not force_ktiled) and (w1_bytes + x_bytes) < _RESIDENT_VMEM_BUDGET

    if use_resident:
        grid = (Bp // tb,)
        const = lambda shape: pl.BlockSpec(shape, lambda i: (0,) * len(shape))
        call = pl.pallas_call(
            _head_resident_kernel,
            out_shape=out_shape,
            grid_spec=pltpu.PrefetchScalarGridSpec(
                num_scalar_prefetch=0,
                grid=grid,
                in_specs=[
                    pl.BlockSpec((tb, H), lambda i: (i, 0)),            # x (f32)
                    const((H, L1_OUT)),                                 # w1 (bf16, resident)
                    const((1, L1_OUT)),                                 # b1
                    const((L1_OUT, L2_OUT)),                            # w2
                    const((1, L2_OUT)),                                 # b2
                    const((L2_OUT, 1)),                                 # w3 column
                    pl.BlockSpec(memory_space=pltpu.MemorySpace.SMEM),  # b3 scalar
                    pl.BlockSpec((1, tb), lambda i: (0, i)),            # labels
                ],
                out_specs=(pl.BlockSpec((1, tb), lambda i: (0, i)),
                           pl.BlockSpec((1, tb), lambda i: (0, i))),
            ),
            compiler_params=pltpu.CompilerParams(
                dimension_semantics=("parallel",)),
        )
    else:
        # K-tiled fallback for very large H (w1 can't be VMEM-resident).
        if tk is None or H % tk != 0:
            tk, d = 0, 128
            while d <= H:
                if H % d == 0 and (2 * d * L1_OUT * 2 + 2 * tb * d * 4) <= _KTILE_VMEM_BUDGET:
                    tk = d
                d += 128
            if tk == 0:
                tk = H
        grid = (Bp // tb, H // tk)
        const = lambda shape: pl.BlockSpec(shape, lambda i, k: (0,) * len(shape))
        call = pl.pallas_call(
            _head_ktiled_kernel,
            out_shape=out_shape,
            grid_spec=pltpu.PrefetchScalarGridSpec(
                num_scalar_prefetch=0,
                grid=grid,
                in_specs=[
                    pl.BlockSpec((tb, tk), lambda i, k: (i, k)),        # x (f32)
                    pl.BlockSpec((tk, L1_OUT), lambda i, k: (k, 0)),    # w1 (bf16)
                    const((1, L1_OUT)),                                 # b1
                    const((L1_OUT, L2_OUT)),                            # w2
                    const((1, L2_OUT)),                                 # b2
                    const((L2_OUT, 1)),                                 # w3 column
                    pl.BlockSpec(memory_space=pltpu.MemorySpace.SMEM),  # b3 scalar
                    pl.BlockSpec((1, tb), lambda i, k: (0, i)),         # labels
                ],
                out_specs=(pl.BlockSpec((1, tb), lambda i, k: (0, i)),
                           pl.BlockSpec((1, tb), lambda i, k: (0, i))),
                scratch_shapes=[pltpu.VMEM((tb, L1_OUT), jnp.float32)],
            ),
            compiler_params=pltpu.CompilerParams(
                dimension_semantics=("parallel", "arbitrary")),
        )

    logits_row, loss_row = call(x, w1, b1, w2, b2, w3_col, b3, lbl)
    return logits_row[0, :B][:, None], loss_row[0, :B]


# ------------------------------ model wrapper ------------------------------ #
class LLMForClassificationPallas:
    def __init__(self, hidden_size=3072, vocab_in=128, key=jax.random.PRNGKey(0)):
        self.hidden_size = hidden_size
        k = jax.random.split(key, 8)
        # TODO(synk): real frozen base LLM not reproducible here; stubbed as a
        # frozen embedding table producing per-token logits of width hidden_size.
        self.base_logit_table = (
            jax.random.normal(k[0], (vocab_in, hidden_size), jnp.float32) * 0.02)

        def linear_init(kw, kb, fan_in, fan_out):
            bound = 1.0 / jnp.sqrt(fan_in)
            w = jax.random.uniform(kw, (fan_in, fan_out), jnp.float32, -bound, bound)
            b = jax.random.uniform(kb, (1, fan_out), jnp.float32, -bound, bound)
            return w, b

        w1, b1 = linear_init(k[1], k[2], hidden_size, L1_OUT)
        w2, b2 = linear_init(k[3], k[4], L1_OUT, L2_OUT)
        w3, b3 = linear_init(k[5], k[6], L2_OUT, 1)

        w1 = w1.astype(jnp.bfloat16)      # bf16 storage halves w1 HBM bytes
        self.params = (w1, b1, w2, b2, w3, b3)   # w3 kept as (32, 1) column

    def forward(self, input_ids, attention_mask=None, labels=None):
        # base_model stub: (B, S) int -> (B, S, H) "logits"; take last token.
        base_logits = self.base_logit_table[input_ids]          # (B, S, H)
        hidden_states = base_logits[:, -1, :]                    # (B, H)
        B = hidden_states.shape[0]

        lbl = (labels.astype(jnp.float32) if labels is not None
               else jnp.zeros((B,), jnp.float32))

        logits, loss_rows = classifier_head(hidden_states, self.params, lbl)
        loss = jnp.mean(loss_rows) if labels is not None else None
        return {"loss": loss, "logits": logits}


# ---------------------------------- main ----------------------------------- #
if __name__ == "__main__":
    key = jax.random.PRNGKey(0)
    k_ids, k_lbl, k_model = jax.random.split(key, 3)

    B, S = 2, 8
    vocab_in = 128
    hidden_size = 3072  # len_tokensizer default

    input_ids = jax.random.randint(k_ids, (B, S), 0, vocab_in, dtype=jnp.int32)
    labels = jax.random.randint(k_lbl, (B,), 0, 2, dtype=jnp.int32)

    model = LLMForClassificationPallas(hidden_size=hidden_size,
                                       vocab_in=vocab_in, key=k_model)

    out = model.forward(input_ids, labels=labels)
    logits = jax.block_until_ready(out["logits"])
    loss = jax.block_until_ready(out["loss"])

    # pure-JAX reference (same bf16 layer-1 precision as the kernel)
    w1, b1, w2, b2, w3_col, b3 = model.params
    hs = model.base_logit_table[input_ids][:, -1, :]
    h1 = jnp.maximum(
        jnp.dot(hs.astype(jnp.bfloat16), w1,
                preferred_element_type=jnp.float32) + b1, 0.0)
    h2 = jax.nn.sigmoid(h1 @ w2 + b2)
    z = h2 @ w3_col + b3[0, 0]
    p_ref = jax.nn.sigmoid(z)
    y = labels.astype(jnp.float32)[:, None]
    loss_ref = jnp.mean(-(y * jnp.log(p_ref) + (1.0 - y) * jnp.log(1.0 - p_ref)))

    assert logits.shape == (B, 1)
    assert jnp.allclose(logits, p_ref, atol=1e-4, rtol=1e-4), "logits mismatch"
    assert jnp.allclose(loss, loss_ref, atol=1e-4, rtol=1e-4), "loss mismatch"

    # Also exercise the K-tiled fallback path (used only when w1 can't be
    # VMEM-resident, e.g. very large H on v7x) with multiple K steps.
    lg2, lr2 = classifier_head(hs, model.params, labels.astype(jnp.float32),
                               force_ktiled=True, tk=512)
    lg2 = jax.block_until_ready(lg2)
    assert jnp.allclose(lg2, p_ref, atol=1e-4, rtol=1e-4), "fallback logits mismatch"
    assert jnp.allclose(jnp.mean(lr2), loss_ref, atol=1e-4, rtol=1e-4), "fallback loss mismatch"

    print("KERNEL_OK")
</pallas_src>

<mosaic_0001>
module attributes {stable_mosaic.version = 11 : i64} {
  func.func @_head_resident_kernel(%arg0: i32, %arg1: memref<8x3072xf32, #tpu.memory_space<vmem>>, %arg2: memref<3072x512xbf16, #tpu.memory_space<vmem>>, %arg3: memref<1x512xf32, #tpu.memory_space<vmem>>, %arg4: memref<512x32xf32, #tpu.memory_space<vmem>>, %arg5: memref<1x32xf32, #tpu.memory_space<vmem>>, %arg6: memref<32x1xf32, #tpu.memory_space<vmem>>, %arg7: memref<1x1xf32, #tpu.memory_space<smem>>, %arg8: memref<1x8xf32, #tpu.memory_space<vmem>>, %arg9: memref<1x8xf32, #tpu.memory_space<vmem>>, %arg10: memref<1x8xf32, #tpu.memory_space<vmem>>) attributes {dimension_semantics = [#tpu.dimension_semantics<parallel>], iteration_bounds = array<i64: 1>, scalar_prefetch = 0 : i64, scratch_operands = 0 : i64, tpu.core_type = #tpu.core_type<tc>, window_params = [{transform_indices = @transform_0, window_bounds = array<i64: 8, 3072>}, {pipeline_mode = #tpu.pipeline_mode<synchronous>, transform_indices = @transform_1, window_bounds = array<i64: 3072, 512>}, {pipeline_mode = #tpu.pipeline_mode<synchronous>, transform_indices = @transform_2, window_bounds = array<i64: 1, 512>}, {pipeline_mode = #tpu.pipeline_mode<synchronous>, transform_indices = @transform_3, window_bounds = array<i64: 512, 32>}, {pipeline_mode = #tpu.pipeline_mode<synchronous>, transform_indices = @transform_4, window_bounds = array<i64: 1, 32>}, {pipeline_mode = #tpu.pipeline_mode<synchronous>, transform_indices = @transform_5, window_bounds = array<i64: 32, 1>}, {transform_indices = @transform_6, window_bounds = array<i64: 1, 1>}, {transform_indices = @transform_7, window_bounds = array<i64: 1, 8>}, {transform_indices = @transform_8, window_bounds = array<i64: 1, 8>}, {transform_indices = @transform_9, window_bounds = array<i64: 1, 8>}]} {
    %c0 = arith.constant 0 : index
    %c0_0 = arith.constant 0 : index
    %0 = vector.load %arg1[%c0, %c0_0] : memref<8x3072xf32, #tpu.memory_space<vmem>>, vector<8x3072xf32>
    %1 = arith.truncf %0 : vector<8x3072xf32> to vector<8x3072xbf16>
    %c0_1 = arith.constant 0 : index
    %c0_2 = arith.constant 0 : index
    %2 = vector.load %arg2[%c0_1, %c0_2] : memref<3072x512xbf16, #tpu.memory_space<vmem>>, vector<3072x512xbf16>
    %cst = arith.constant dense<0.000000e+00> : vector<8x512xf32>
    %3 = tpu.matmul %1, %2, %cst {dimension_numbers = #tpu.dot_dimension_numbers<[1], [0], [0], [1], [0, 0, 1, 1], [], []>} : vector<8x3072xbf16>, vector<3072x512xbf16>, vector<8x512xf32> -> vector<8x512xf32>
    %c0_3 = arith.constant 0 : index
    %c0_4 = arith.constant 0 : index
    %4 = vector.load %arg3[%c0_3, %c0_4] : memref<1x512xf32, #tpu.memory_space<vmem>>, vector<1x512xf32>
    %5 = vector.broadcast %4 : vector<1x512xf32> to vector<8x512xf32>
    %6 = arith.addf %3, %5 : vector<8x512xf32>
    %cst_5 = arith.constant 0.000000e+00 : f32
    %7 = vector.broadcast %cst_5 : f32 to vector<8x512xf32>
    %8 = arith.maximumf %6, %7 : vector<8x512xf32>
    %c0_6 = arith.constant 0 : index
    %c0_7 = arith.constant 0 : index
    %9 = vector.load %arg4[%c0_6, %c0_7] : memref<512x32xf32, #tpu.memory_space<vmem>>, vector<512x32xf32>
    %c0_8 = arith.constant 0 : index
    %c0_9 = arith.constant 0 : index
    %10 = vector.load %arg5[%c0_8, %c0_9] : memref<1x32xf32, #tpu.memory_space<vmem>>, vector<1x32xf32>
    %c0_10 = arith.constant 0 : index
    %c0_11 = arith.constant 0 : index
    %11 = vector.load %arg6[%c0_10, %c0_11] : memref<32x1xf32, #tpu.memory_space<vmem>>, vector<32x1xf32>
    %c0_12 = arith.constant 0 : index
    %c0_13 = arith.constant 0 : index
    %12 = memref.load %arg7[%c0_12, %c0_13] : memref<1x1xf32, #tpu.memory_space<smem>>
    %c0_14 = arith.constant 0 : index
    %c0_15 = arith.constant 0 : index
    %13 = vector.load %arg8[%c0_14, %c0_15] : memref<1x8xf32, #tpu.memory_space<vmem>>, vector<1x8xf32>
    %cst_16 = arith.constant dense<0.000000e+00> : vector<8x32xf32>
    %14 = tpu.matmul %8, %9, %cst_16 {dimension_numbers = #tpu.dot_dimension_numbers<[1], [0], [0], [1], [0, 0, 1, 1], [], []>} : vector<8x512xf32>, vector<512x32xf32>, vector<8x32xf32> -> vector<8x32xf32>
    %15 = vector.broadcast %10 : vector<1x32xf32> to vector<8x32xf32>
    %16 = arith.addf %14, %15 : vector<8x32xf32>
    %17 = arith.negf %16 : vector<8x32xf32>
    %18 = math.exp %17 : vector<8x32xf32>
    %cst_17 = arith.constant 1.000000e+00 : f32
    %19 = vector.broadcast %cst_17 : f32 to vector<8x32xf32>
    %20 = arith.addf %19, %18 : vector<8x32xf32>
    %21 = arith.divf %19, %20 : vector<8x32xf32>
    %22 = tpu.transpose %21, [1, 0] : vector<8x32xf32> -> vector<32x8xf32>
    %23 = vector.broadcast %11 : vector<32x1xf32> to vector<32x8xf32>
    %24 = arith.mulf %22, %23 : vector<32x8xf32>
    %cst_18 = arith.constant dense<0.000000e+00> : vector<8xf32>
    %25 = vector.multi_reduction <add>, %24, %cst_18 [0] : vector<32x8xf32> to vector<8xf32>
    %26 = vector.shape_cast %25 : vector<8xf32> to vector<1x8xf32>
    %27 = vector.broadcast %12 : f32 to vector<1x8xf32>
    %28 = arith.addf %26, %27 : vector<1x8xf32>
    %29 = arith.negf %28 : vector<1x8xf32>
    %30 = math.exp %29 : vector<1x8xf32>
    %cst_19 = arith.constant 1.000000e+00 : f32
    %31 = vector.broadcast %cst_19 : f32 to vector<1x8xf32>
    %32 = arith.addf %31, %30 : vector<1x8xf32>
    %33 = arith.divf %31, %32 : vector<1x8xf32>
    %c0_20 = arith.constant 0 : index
    %c0_21 = arith.constant 0 : index
    %34 = vector.load %arg9[%c0_20, %c0_21] : memref<1x8xf32, #tpu.memory_space<vmem>>, vector<1x8xf32>
    tpu.vector_store %arg9[%c0_20, %c0_21], %33 {strides = array<i32>} : memref<1x8xf32, #tpu.memory_space<vmem>>, vector<1x8xf32>,
    %35 = math.log %33 : vector<1x8xf32>
    %cst_22 = arith.constant -1.000000e+02 : f32
    %36 = vector.broadcast %cst_22 : f32 to vector<1x8xf32>
    %37 = arith.maximumf %35, %36 : vector<1x8xf32>
    %cst_23 = arith.constant 1.000000e+00 : f32
    %38 = vector.broadcast %cst_23 : f32 to vector<1x8xf32>
    %39 = arith.subf %38, %33 : vector<1x8xf32>
    %40 = math.log %39 : vector<1x8xf32>
    %cst_24 = arith.constant -1.000000e+02 : f32
    %41 = vector.broadcast %cst_24 : f32 to vector<1x8xf32>
    %42 = arith.maximumf %40, %41 : vector<1x8xf32>
    %43 = arith.mulf %13, %37 : vector<1x8xf32>
    %cst_25 = arith.constant 1.000000e+00 : f32
    %44 = vector.broadcast %cst_25 : f32 to vector<1x8xf32>
    %45 = arith.subf %44, %13 : vector<1x8xf32>
    %46 = arith.mulf %45, %42 : vector<1x8xf32>
    %47 = arith.addf %43, %46 : vector<1x8xf32>
    %cst_26 = arith.constant 0.000000e+00 : f32
    %48 = vector.broadcast %cst_26 : f32 to vector<1x8xf32>
    %49 = arith.subf %48, %47 : vector<1x8xf32>
    %c0_27 = arith.constant 0 : index
    %c0_28 = arith.constant 0 : index
    %50 = vector.load %arg10[%c0_27, %c0_28] : memref<1x8xf32, #tpu.memory_space<vmem>>, vector<1x8xf32>
    tpu.vector_store %arg10[%c0_27, %c0_28], %49 {strides = array<i32>} : memref<1x8xf32, #tpu.memory_space<vmem>>, vector<1x8xf32>,
    return
  }
  func.func @transform_0(%arg0: i32) -> (i32, i32) {
    %c0_i32 = arith.constant 0 : i32
    %c0_i32_0 = arith.constant 0 : i32
    return %arg0, %c0_i32 : i32, i32
  }
  func.func @transform_1(%arg0: i32) -> (i32, i32) {
    %c0_i32 = arith.constant 0 : i32
    %c0_i32_0 = arith.constant 0 : i32
    %c0_i32_1 = arith.constant 0 : i32
    return %c0_i32, %c0_i32_0 : i32, i32
  }
  func.func @transform_2(%arg0: i32) -> (i32, i32) {
    %c0_i32 = arith.constant 0 : i32
    %c0_i32_0 = arith.constant 0 : i32
    %c0_i32_1 = arith.constant 0 : i32
    return %c0_i32, %c0_i32_0 : i32, i32
  }
  func.func @transform_3(%arg0: i32) -> (i32, i32) {
    %c0_i32 = arith.constant 0 : i32
    %c0_i32_0 = arith.constant 0 : i32
    %c0_i32_1 = arith.constant 0 : i32
    return %c0_i32, %c0_i32_0 : i32, i32
  }
  func.func @transform_4(%arg0: i32) -> (i32, i32) {
    %c0_i32 = arith.constant 0 : i32
    %c0_i32_0 = arith.constant 0 : i32
    %c0_i32_1 = arith.constant 0 : i32
    return %c0_i32, %c0_i32_0 : i32, i32
  }
  func.func @transform_5(%arg0: i32) -> (i32, i32) {
    %c0_i32 = arith.constant 0 : i32
    %c0_i32_0 = arith.constant 0 : i32
    %c0_i32_1 = arith.constant 0 : i32
    return %c0_i32, %c0_i32_0 : i32, i32
  }
  func.func @transform_6(%arg0: i32) -> (i32, i32) {
    %c0_i32 = arith.constant 0 : i32
    %c0_i32_0 = arith.constant 0 : i32
    %c0_i32_1 = arith.constant 0 : i32
    return %c0_i32, %c0_i32_0 : i32, i32
  }
  func.func @transform_7(%arg0: i32) -> (i32, i32) {
    %c0_i32 = arith.constant 0 : i32
    %c0_i32_0 = arith.constant 0 : i32
    return %c0_i32, %arg0 : i32, i32
  }
  func.func @transform_8(%arg0: i32) -> (i32, i32) {
    %c0_i32 = arith.constant 0 : i32
    %c0_i32_0 = arith.constant 0 : i32
    return %c0_i32, %arg0 : i32, i32
  }
  func.func @transform_9(%arg0: i32) -> (i32, i32) {
    %c0_i32 = arith.constant 0 : i32
    %c0_i32_0 = arith.constant 0 : i32
    return %c0_i32, %arg0 : i32, i32
  }
}

</mosaic_0001>

<bundles_post_ra>
// kernel: tpu_custom_call.1
= control target key start
LH: loop header
LB: loop body
LE: loop exit
PB: predicated region body
PF: predicated region fallthrough
CT: control target
= control target key end

     0   :  { %16 = vsyncpa [#allocation4], 0  ;;  %s8722_s0 = inlined_call_operand.hbm [shape: f32[8,3072], index: 0, kind: input, shape index: {}]   ;;  %s8723_s1 = inlined_call_operand.hbm [shape: bf16[3072,512], index: 1, kind: input, shape index: {}]   ;;  %s8724_s2 = inlined_call_operand.hbm [shape: f32[1,512], index: 2, kind: input, shape index: {}]   ;;  %s8725_s3 = inlined_call_operand.vmem [shape: f32[512,32], index: 3, kind: input, shape index: {}]   ;;  %s8726_s4 = inlined_call_operand.hbm [shape: f32[1,32], index: 4, kind: input, shape index: {}]   ;;  %s8727_s5 = inlined_call_operand.vmem [shape: f32[32,1], index: 5, kind: input, shape index: {}]   ;;  %s8728_s6 = inlined_call_operand.<no memory space> [shape: f32[1,1], index: 6, kind: input, shape index: {}]   ;;  %s8729_s7 = inlined_call_operand.hbm [shape: f32[1,8], index: 7, kind: input, shape index: {}]   ;;  %s8730_s8 = inlined_call_operand.hbm [shape: f32[1,8], index: 8, kind: output, shape index: {0}]   ;;  %s8731_s9 = inlined_call_operand.hbm [shape: f32[1,8], index: 9, kind: output, shape index: {1}]  }
   0x1   :  { %17 = vsyncpa [#allocation7], 0 }
   0x2   :  { %18 = vsyncpa [#allocation10], 0 }
   0x3   :  { %19 = vsyncpa [#allocation5], 0 }
   0x4   :  { %20 = vsyncpa [#allocation14], 0  ;;  %s8276_s30 = smov [#allocation6]  }
   0x5   :  { %s36_s10 = sshll.u32 %s8276_s30, 4  ;;  %s37_s10 = int_to_ptr.vmem [resolvable:$true] %s36_s10 }
   0x6   :  { %s8134_s11 = scalar_lea.vmem %s37_s10, 98304  ;;  %p8139_p1 = scmp.lt.s32.totalorder %s37_s10, %s37_s10 }
   0x7   :  { %p8135_p0 = scmp.ne.s32.totalorder %s37_s10, %s8134_s11  ;;  %p8140_p2 = scmp.lt.s32.totalorder %s8134_s11, %s8134_s11 }
   0x9   :  { %p8141_p3 = por %p8140_p2, %p8139_p1 }
   0xb   :  { %p8142_p4 = pnand %p8141_p3, %p8135_p0 }
   0xd   :  { %8145 = shalt.err (!%p8142_p4)
}
   0xe   :  { %s8277_s12 = smov 256   ;;  %s8278_s13 = smov 16  }
   0xf   :  { %42 = dma.hbm_to_vmem [thread:$0]  %s8723_s1, 98304, %s37_s10, [#allocation7], %s8277_s12, %s8277_s12, %s8278_s13  }
  0x10   :  { %s8279_s16 = smov [#allocation9]   ;;  %s8280_s18 = smov [#allocation3]  }
  0x11   :  { %s61_s17 = sshll.u32 %s8279_s16, 4  ;;  %s27_s19 = sshll.u32 %s8280_s18, 4  ;;  %s62_s17 = int_to_ptr.vmem [resolvable:$true] %s61_s17  ;;  %s28_s19 = int_to_ptr.vmem [resolvable:$true] %s27_s19 }
  0x12   :  { %s8154_s20 = scalar_lea.vmem %s62_s17, 16  ;;  %s8158_s21 = scalar_lea.vmem %s62_s17, 32 }
  0x13   :  { %p8155_p5 = scmp.ne.s32.totalorder %s62_s17, %s8154_s20  ;;  %p8159_p6 = scmp.lt.s32.totalorder %s62_s17, %s62_s17 }
  0x14   :  { %p8160_p7 = scmp.lt.s32.totalorder %s8158_s21, %s8154_s20 }
  0x16   :  { %p8161_p8 = por %p8160_p7, %p8159_p6 }
  0x18   :  { %p8162_p9 = pnand %p8161_p8, %p8155_p5 }
  0x1a   :  { %8165 = shalt.err (!%p8162_p9)
}
  0x1b   :  { %64 = dma.hbm_to_vmem [thread:$0]  %s8726_s4, 16, %s62_s17, [#allocation10]  }
  0x1c   :  { %s8174_s24 = scalar_lea.vmem %s28_s19, 3072  ;;  %p8179_p11 = scmp.lt.s32.totalorder %s28_s19, %s28_s19 }
  0x1d   :  { %p8175_p10 = scmp.ne.s32.totalorder %s28_s19, %s8174_s24  ;;  %p8180_p12 = scmp.lt.s32.totalorder %s8174_s24, %s8174_s24 }
  0x1f   :  { %p8181_p13 = por %p8180_p12, %p8179_p11 }
  0x21   :  { %p8182_p0 = pnand %p8181_p13, %p8175_p10 }
  0x23   :  { %8185 = shalt.err (!%p8182_p0)
}
  0x24   :  { %30 = dma.hbm_to_vmem [thread:$0]  %s8722_s0, 3072, %s28_s19, [#allocation4]  }
  0x25   :  { %s8281_s26 = smov [#allocation8]   ;;  %s8282_s28 = smov [#allocation11]  }
  0x26   :  { %s49_s27 = sshll.u32 %s8281_s26, 4  ;;  %s75_s29 = sshll.u32 %s8282_s28, 4  ;;  %s50_s27 = int_to_ptr.vmem [resolvable:$true] %s49_s27  ;;  %s76_s29 = int_to_ptr.vmem [resolvable:$true] %s75_s29 }
  0x27   :  { %s8194_s30 = scalar_lea.vmem %s50_s27, 64  ;;  %p8199_p2 = scmp.lt.s32.totalorder %s50_s27, %s50_s27 }
  0x28   :  { %p8195_p1 = scmp.ne.s32.totalorder %s50_s27, %s8194_s30  ;;  %p8200_p3 = scmp.lt.s32.totalorder %s8194_s30, %s8194_s30 }
  0x2a   :  { %p8201_p4 = por %p8200_p3, %p8199_p2 }
  0x2c   :  { %p8202_p5 = pnand %p8201_p4, %p8195_p1 }
  0x2e   :  { %8205 = shalt.err (!%p8202_p5)
}
  0x2f   :  { %52 = dma.hbm_to_vmem [thread:$0]  %s8724_s2, 64, %s50_s27, [#allocation7]  }
  0x30   :  { %s8214_s11 = scalar_lea.vmem %s76_s29, 16  ;;  %s8218_s0 = scalar_lea.vmem %s76_s29, 32 }
  0x31   :  { %p8215_p6 = scmp.ne.s32.totalorder %s76_s29, %s8214_s11  ;;  %p8219_p7 = scmp.lt.s32.totalorder %s76_s29, %s76_s29 }
  0x32   :  { %p8220_p8 = scmp.lt.s32.totalorder %s8218_s0, %s8214_s11 }
  0x34   :  { %p8221_p9 = por %p8220_p8, %p8219_p7 }
  0x36   :  { %p8222_p10 = pnand %p8221_p9, %p8215_p6 }
  0x38   :  { %8225 = shalt.err (!%p8222_p10)
}
  0x39   :  { %78 = dma.hbm_to_vmem [thread:$0]  %s8729_s7, 16, %s76_s29, [#allocation10]  }
  0x3a   :  { %8266 = dma.done.wait [#allocation4], 3072  }
  0x3b   :  { %8267 = vsyncadd [#allocation4], 4294964224 }
  0x3c   :  { %8268 = dma.done.wait [#allocation7], 98368  }
  0x3d   :  { %8269 = vsyncadd [#allocation7], 4294868928 }
  0x3e   :  { %8270 = dma.done.wait [#allocation10], 32  }
  0x3f   :  { %8271 = vsyncadd [#allocation10], 4294967264  ;;  %v6961_v0 = vld [vmem:[#allocation6 + $0xe4] ss:$16 sps:$4 sm:$0xff]   ;;  %v6965_v2 = vld [vmem:[#allocation6 + $0xe0] ss:$16 sps:$4 sm:$0xff]  }
  0x40   :  { %v6963_v1 = vld [vmem:[#allocation6 + $0x2e4] ss:$16 sps:$4 sm:$0xff]   ;;  %4772 = vmatprep.subr.bf16.mxu0 %v6961_v0  ;;  %v6966_v3 = vld [vmem:[#allocation6 + $0x2e0] ss:$16 sps:$4 sm:$0xff]   ;;  %v95_v46 = vld [vmem:[#allocation3 + $0x8] sm:$0xff]  ;;  %vm6039_vm0 = vcmask 64512  }
  0x41   :  { %4813 = vmatprep.subr.bf16.mxu1 %v6963_v1  ;;  %v6967_v4 = vld [vmem:[#allocation6 + $0xc4] ss:$16 sps:$4 sm:$0xff]   ;;  %4773 = vmatpush1.bf16.msra.mxu0 %v6965_v2  ;;  %v6971_v6 = vld [vmem:[#allocation6 + $0xc0] ss:$16 sps:$4 sm:$0xff]   ;;  %v8351_v49 = vpack.c.bf16 %v95_v46, %v95_v46  ;;  %v97_v50 = vld [vmem:[#allocation3 + $0x18] sm:$0xff]  ;;  %s8284_s18 = smov [#allocation12]  }
  0x42   :  { %4814 = vmatpush1.bf16.msra.mxu1 %v6966_v3  ;;  %v6969_v5 = vld [vmem:[#allocation6 + $0x2c4] ss:$16 sps:$4 sm:$0xff]   ;;  %4774 = vmatprep.subr.bf16.mxu0 %v6967_v4  ;;  %v6972_v7 = vld [vmem:[#allocation6 + $0x2c0] ss:$16 sps:$4 sm:$0xff]   ;;  %v8353_v52 = vpack.c.bf16 %v97_v50, %v97_v50  ;;  %s6082_s19 = sshll.u32 %s8284_s18, 4  ;;  %vm6061_vm1 = vcmask 57344   ;;  %s6083_s19 = int_to_ptr.vmem [resolvable:$true] %s6082_s19 }
  0x43   :  { %4815 = vmatprep.subr.bf16.mxu1 %v6969_v5  ;;  %v6973_v8 = vld [vmem:[#allocation6 + $0xa4] ss:$16 sps:$4 sm:$0xff]   ;;  %v6977_v10 = vld [vmem:[#allocation6 + $0xa0] ss:$16 sps:$4 sm:$0xff]   ;;  %4804 = vmatprep.mubr.bf16.mxu0 %v8351_v49  ;;  %s8226_s20 = scalar_lea.vmem %s6083_s19, 16  ;;  %s8230_s21 = scalar_lea.vmem %s6083_s19, 32 }
  0x44   :  { %v6975_v9 = vld [vmem:[#allocation6 + $0x2a4] ss:$16 sps:$4 sm:$0xff]   ;;  %v6978_v11 = vld [vmem:[#allocation6 + $0x2a0] ss:$16 sps:$4 sm:$0xff]   ;;  %4845 = vmatprep.mubr.bf16.mxu1 %v8353_v52  ;;  %p8227_p11 = scmp.ne.s32.totalorder %s6083_s19, %s8226_s20  ;;  %p8231_p12 = scmp.lt.s32.totalorder %s6083_s19, %s6083_s19 }
  0x45   :  { %4775 = vmatpush1.bf16.msra.mxu0 %v6971_v6  ;;  %v6979_v12 = vld [vmem:[#allocation6 + $0x84] ss:$16 sps:$4 sm:$0xff]   ;;  %v6983_v14 = vld [vmem:[#allocation6 + $0x80] ss:$16 sps:$4 sm:$0xff]   ;;  %p8232_p13 = scmp.lt.s32.totalorder %s8230_s21, %s8226_s20 }
  0x46   :  { %4816 = vmatpush1.bf16.msra.mxu1 %v6972_v7  ;;  %4776 = vmatprep.subr.bf16.mxu0 %v6973_v8  ;;  %v6981_v13 = vld [vmem:[#allocation6 + $0x284] ss:$16 sps:$4 sm:$0xff]   ;;  %v6984_v15 = vld [vmem:[#allocation6 + $0x280] ss:$16 sps:$4 sm:$0xff]  }
  0x47   :  { %4817 = vmatprep.subr.bf16.mxu1 %v6975_v9  ;;  %v6985_v16 = vld [vmem:[#allocation6 + $0x64] ss:$16 sps:$4 sm:$0xff]   ;;  %v6989_v18 = vld [vmem:[#allocation6 + $0x60] ss:$16 sps:$4 sm:$0xff]   ;;  %p8233_p0 = por %p8232_p13, %p8231_p12 }
  0x48   :  { %v6987_v17 = vld [vmem:[#allocation6 + $0x264] ss:$16 sps:$4 sm:$0xff]   ;;  %v6990_v19 = vld [vmem:[#allocation6 + $0x260] ss:$16 sps:$4 sm:$0xff]  }
  0x49   :  { %4777 = vmatpush1.bf16.msra.mxu0 %v6977_v10  ;;  %v6991_v20 = vld [vmem:[#allocation6 + $0x44] ss:$16 sps:$4 sm:$0xff]   ;;  %v6995_v22 = vld [vmem:[#allocation6 + $0x40] ss:$16 sps:$4 sm:$0xff]   ;;  %p8234_p1 = pnand %p8233_p0, %p8227_p11 }
  0x4a   :  { %4818 = vmatpush1.bf16.msra.mxu1 %v6978_v11  ;;  %4778 = vmatprep.subr.bf16.mxu0 %v6979_v12  ;;  %v6993_v21 = vld [vmem:[#allocation6 + $0x244] ss:$16 sps:$4 sm:$0xff]   ;;  %v6996_v23 = vld [vmem:[#allocation6 + $0x240] ss:$16 sps:$4 sm:$0xff]  }
  0x4b   :  { %4819 = vmatprep.subr.bf16.mxu1 %v6981_v13  ;;  %v6997_v24 = vld [vmem:[#allocation6 + $0x24] ss:$16 sps:$4 sm:$0xff]   ;;  %v7001_v26 = vld [vmem:[#allocation6 + $0x20] ss:$16 sps:$4 sm:$0xff]  }
  0x4c   :  { %v6999_v25 = vld [vmem:[#allocation6 + $0x224] ss:$16 sps:$4 sm:$0xff]   ;;  %v7002_v27 = vld [vmem:[#allocation6 + $0x220] ss:$16 sps:$4 sm:$0xff]  }
  0x4d   :  { %4779 = vmatpush1.bf16.msra.mxu0 %v6983_v14  ;;  %v7003_v28 = vld [vmem:[#allocation6 + $0x4] ss:$16 sps:$4 sm:$0xff]   ;;  %v7007_v30 = vld [vmem:[#allocation6] ss:$16 sps:$4 sm:$0xff]  }
  0x4e   :  { %4820 = vmatpush1.bf16.msra.mxu1 %v6984_v15  ;;  %4780 = vmatprep.subr.bf16.mxu0 %v6985_v16  ;;  %v7005_v29 = vld [vmem:[#allocation6 + $0x204] ss:$16 sps:$4 sm:$0xff]   ;;  %v7008_v31 = vld [vmem:[#allocation6 + $0x200] ss:$16 sps:$4 sm:$0xff]  }
  0x4f   :  { %4821 = vmatprep.subr.bf16.mxu1 %v6987_v17  ;;  %v7009_v32 = vld [vmem:[#allocation6 + $0x1e4] ss:$16 sps:$4 sm:$0xff]   ;;  %v7013_v34 = vld [vmem:[#allocation6 + $0x1e0] ss:$16 sps:$4 sm:$0xff]  }
  0x50   :  { %v7011_v33 = vld [vmem:[#allocation6 + $0x3e4] ss:$16 sps:$4 sm:$0xff]   ;;  %v7014_v35 = vld [vmem:[#allocation6 + $0x3e0] ss:$16 sps:$4 sm:$0xff]  }
  0x51   :  { %4781 = vmatpush1.bf16.msra.mxu0 %v6989_v18  ;;  %v7015_v36 = vld [vmem:[#allocation6 + $0x1c4] ss:$16 sps:$4 sm:$0xff]   ;;  %v7019_v38 = vld [vmem:[#allocation6 + $0x1c0] ss:$16 sps:$4 sm:$0xff]  }
  0x52   :  { %4822 = vmatpush1.bf16.msra.mxu1 %v6990_v19  ;;  %4782 = vmatprep.subr.bf16.mxu0 %v6991_v20  ;;  %v7017_v37 = vld [vmem:[#allocation6 + $0x3c4] ss:$16 sps:$4 sm:$0xff]   ;;  %v7020_v39 = vld [vmem:[#allocation6 + $0x3c0] ss:$16 sps:$4 sm:$0xff]  }
  0x53   :  { %4823 = vmatprep.subr.bf16.mxu1 %v6993_v21  ;;  %v7021_v40 = vld [vmem:[#allocation6 + $0x1a4] ss:$16 sps:$4 sm:$0xff]   ;;  %v7025_v42 = vld [vmem:[#allocation6 + $0x1a0] ss:$16 sps:$4 sm:$0xff]  }
  0x54   :  { %v7023_v41 = vld [vmem:[#allocation6 + $0x3a4] ss:$16 sps:$4 sm:$0xff]   ;;  %v7026_v43 = vld [vmem:[#allocation6 + $0x3a0] ss:$16 sps:$4 sm:$0xff]  }
  0x55   :  { %4783 = vmatpush1.bf16.msra.mxu0 %v6995_v22  ;;  %v7027_v44 = vld [vmem:[#allocation6 + $0x184] ss:$16 sps:$4 sm:$0xff]   ;;  %v7031_v47 = vld [vmem:[#allocation6 + $0x180] ss:$16 sps:$4 sm:$0xff]  }
  0x56   :  { %4824 = vmatpush1.bf16.msra.mxu1 %v6996_v23  ;;  %4784 = vmatprep.subr.bf16.mxu0 %v6997_v24  ;;  %v7029_v45 = vld [vmem:[#allocation6 + $0x384] ss:$16 sps:$4 sm:$0xff]   ;;  %v7032_v48 = vld [vmem:[#allocation6 + $0x380] ss:$16 sps:$4 sm:$0xff]  }
  0x57   :  { %4825 = vmatprep.subr.bf16.mxu1 %v6999_v25  ;;  %v7033_v51 = vld [vmem:[#allocation6 + $0x164] ss:$16 sps:$4 sm:$0xff]   ;;  %v7037_v54 = vld [vmem:[#allocation6 + $0x160] ss:$16 sps:$4 sm:$0xff]  }
  0x58   :  { %v7035_v53 = vld [vmem:[#allocation6 + $0x364] ss:$16 sps:$4 sm:$0xff]   ;;  %v7038_v55 = vld [vmem:[#allocation6 + $0x360] ss:$16 sps:$4 sm:$0xff]  }
  0x59   :  { %4785 = vmatpush1.bf16.msra.mxu0 %v7001_v26  ;;  %v7039_v56 = vld [vmem:[#allocation6 + $0x144] ss:$16 sps:$4 sm:$0xff]   ;;  %v7043_v58 = vld [vmem:[#allocation6 + $0x140] ss:$16 sps:$4 sm:$0xff]  }
  0x5a   :  { %4826 = vmatpush1.bf16.msra.mxu1 %v7002_v27  ;;  %4786 = vmatprep.subr.bf16.mxu0 %v7003_v28  ;;  %v7041_v57 = vld [vmem:[#allocation6 + $0x344] ss:$16 sps:$4 sm:$0xff]   ;;  %v7044_v59 = vld [vmem:[#allocation6 + $0x340] ss:$16 sps:$4 sm:$0xff]  }
  0x5b   :  { %4827 = vmatprep.subr.bf16.mxu1 %v7005_v29  ;;  %v7045_v60 = vld [vmem:[#allocation6 + $0x124] ss:$16 sps:$4 sm:$0xff]   ;;  %v7049_v62 = vld [vmem:[#allocation6 + $0x120] ss:$16 sps:$4 sm:$0xff]  }
  0x5c   :  { %v7047_v61 = vld [vmem:[#allocation6 + $0x324] ss:$16 sps:$4 sm:$0xff]   ;;  %v7050_v63 = vld [vmem:[#allocation6 + $0x320] ss:$16 sps:$4 sm:$0xff]  }
  0x5d   :  { %4787 = vmatpush1.bf16.msra.mxu0 %v7007_v30  ;;  %v7051_v0 = vld [vmem:[#allocation6 + $0x104] ss:$16 sps:$4 sm:$0xff]   ;;  %v7055_v2 = vld [vmem:[#allocation6 + $0x100] ss:$16 sps:$4 sm:$0xff]  }
  0x5e   :  { %4828 = vmatpush1.bf16.msra.mxu1 %v7008_v31  ;;  %4788 = vmatprep.subr.bf16.mxu0 %v7009_v32  ;;  %v7053_v1 = vld [vmem:[#allocation6 + $0x304] ss:$16 sps:$4 sm:$0xff]   ;;  %v7056_v3 = vld [vmem:[#allocation6 + $0x300] ss:$16 sps:$4 sm:$0xff]  }
  0x5f   :  { %4829 = vmatprep.subr.bf16.mxu1 %v7011_v33  ;;  %v94_v4 = vld [vmem:[#allocation3] sm:$0xff]  ;;  %v96_v5 = vld [vmem:[#allocation3 + $0x10] sm:$0xff] }
  0x60   :  { %v7059_v6 = vld [vmem:[#allocation6 + $0x4e4] ss:$16 sps:$4 sm:$0xff]   ;;  %v8357_v8 = vpack.c.bf16 %v94_v4, %v94_v4  ;;  %v8359_v9 = vpack.c.bf16 %v96_v5, %v96_v5  ;;  %v7057_v10 = vld [vmem:[#allocation6 + $0x4e0] ss:$16 sps:$4 sm:$0xff]  }
  0x61   :  { %4789 = vmatpush2.bf16.msra.mxu0 %v7013_v34  ;;  %v7062_v7 = vld [vmem:[#allocation6 + $0x6e4] ss:$16 sps:$4 sm:$0xff]   ;;  %v7060_v11 = vld [vmem:[#allocation6 + $0x6e0] ss:$16 sps:$4 sm:$0xff]   ;;  %v99_v34 = vld [vmem:[#allocation3 + $0x28] sm:$0xff] }
  0x62   :  { %4830 = vmatpush2.bf16.msra.mxu1 %v7014_v35  ;;  %4790 = vmatprep.subr.bf16.mxu0 %v7015_v36  ;;  %v7065_v12 = vld [vmem:[#allocation6 + $0x4c4] ss:$16 sps:$4 sm:$0xff]   ;;  %v7063_v14 = vld [vmem:[#allocation6 + $0x4c0] ss:$16 sps:$4 sm:$0xff]  }
  0x63   :  { %4831 = vmatprep.subr.bf16.mxu1 %v7017_v37  ;;  %v7068_v13 = vld [vmem:[#allocation6 + $0x6c4] ss:$16 sps:$4 sm:$0xff]   ;;  %v7066_v15 = vld [vmem:[#allocation6 + $0x6c0] ss:$16 sps:$4 sm:$0xff]   ;;  %v8363_v37 = vpack.c.bf16 %v99_v34, %v99_v34 }
  0x64   :  { %v7071_v16 = vld [vmem:[#allocation6 + $0x4a4] ss:$16 sps:$4 sm:$0xff]   ;;  %v7069_v18 = vld [vmem:[#allocation6 + $0x4a0] ss:$16 sps:$4 sm:$0xff]  }
  0x65   :  { %4791 = vmatpush2.bf16.msra.mxu0 %v7019_v38  ;;  %v7074_v17 = vld [vmem:[#allocation6 + $0x6a4] ss:$16 sps:$4 sm:$0xff]   ;;  %v7072_v19 = vld [vmem:[#allocation6 + $0x6a0] ss:$16 sps:$4 sm:$0xff]   ;;  %v101_v38 = vld [vmem:[#allocation3 + $0x38] sm:$0xff] }
  0x66   :  { %4832 = vmatpush2.bf16.msra.mxu1 %v7020_v39  ;;  %4792 = vmatprep.subr.bf16.mxu0 %v7021_v40  ;;  %v7077_v20 = vld [vmem:[#allocation6 + $0x484] ss:$16 sps:$4 sm:$0xff]   ;;  %v7075_v22 = vld [vmem:[#allocation6 + $0x480] ss:$16 sps:$4 sm:$0xff]   ;;  %v8365_v40 = vpack.c.bf16 %v101_v38, %v101_v38 }
  0x67   :  { %4833 = vmatprep.subr.bf16.mxu1 %v7023_v41  ;;  %v7080_v21 = vld [vmem:[#allocation6 + $0x684] ss:$16 sps:$4 sm:$0xff]   ;;  %v7078_v23 = vld [vmem:[#allocation6 + $0x680] ss:$16 sps:$4 sm:$0xff]  }
  0x68   :  { %v7083_v24 = vld [vmem:[#allocation6 + $0x464] ss:$16 sps:$4 sm:$0xff]   ;;  %v7081_v26 = vld [vmem:[#allocation6 + $0x460] ss:$16 sps:$4 sm:$0xff]  }
  0x69   :  { %4793 = vmatpush2.bf16.msra.mxu0 %v7025_v42  ;;  %v7086_v25 = vld [vmem:[#allocation6 + $0x664] ss:$16 sps:$4 sm:$0xff]   ;;  %v7084_v27 = vld [vmem:[#allocation6 + $0x660] ss:$16 sps:$4 sm:$0xff]  }
  0x6a   :  { %4834 = vmatpush2.bf16.msra.mxu1 %v7026_v43  ;;  %4794 = vmatprep.subr.bf16.mxu0 %v7027_v44  ;;  %v7089_v28 = vld [vmem:[#allocation6 + $0x444] ss:$16 sps:$4 sm:$0xff]   ;;  %v7087_v30 = vld [vmem:[#allocation6 + $0x440] ss:$16 sps:$4 sm:$0xff]  }
  0x6b   :  { %4835 = vmatprep.subr.bf16.mxu1 %v7029_v45  ;;  %v7092_v29 = vld [vmem:[#allocation6 + $0x644] ss:$16 sps:$4 sm:$0xff]   ;;  %v7090_v31 = vld [vmem:[#allocation6 + $0x640] ss:$16 sps:$4 sm:$0xff]  }
  0x6c   :  { %v7095_v32 = vld [vmem:[#allocation6 + $0x424] ss:$16 sps:$4 sm:$0xff]   ;;  %v7093_v35 = vld [vmem:[#allocation6 + $0x420] ss:$16 sps:$4 sm:$0xff]  }
  0x6d   :  { %4795 = vmatpush2.bf16.msra.mxu0 %v7031_v47  ;;  %v7098_v33 = vld [vmem:[#allocation6 + $0x624] ss:$16 sps:$4 sm:$0xff]   ;;  %v7096_v36 = vld [vmem:[#allocation6 + $0x620] ss:$16 sps:$4 sm:$0xff]  }
  0x6e   :  { %4836 = vmatpush2.bf16.msra.mxu1 %v7032_v48  ;;  %4796 = vmatprep.subr.bf16.mxu0 %v7033_v51  ;;  %v7101_v39 = vld [vmem:[#allocation6 + $0x404] ss:$16 sps:$4 sm:$0xff]   ;;  %v7099_v42 = vld [vmem:[#allocation6 + $0x400] ss:$16 sps:$4 sm:$0xff]  }
  0x6f   :  { %4837 = vmatprep.subr.bf16.mxu1 %v7035_v53  ;;  %v7104_v41 = vld [vmem:[#allocation6 + $0x604] ss:$16 sps:$4 sm:$0xff]   ;;  %v7102_v43 = vld [vmem:[#allocation6 + $0x600] ss:$16 sps:$4 sm:$0xff]  }
  0x70   :  { %v7107_v44 = vld [vmem:[#allocation6 + $0x5e4] ss:$16 sps:$4 sm:$0xff]   ;;  %v7105_v46 = vld [vmem:[#allocation6 + $0x5e0] ss:$16 sps:$4 sm:$0xff]  }
  0x71   :  { %4797 = vmatpush2.bf16.msra.mxu0 %v7037_v54  ;;  %v7110_v45 = vld [vmem:[#allocation6 + $0x7e4] ss:$16 sps:$4 sm:$0xff]   ;;  %v7108_v47 = vld [vmem:[#allocation6 + $0x7e0] ss:$16 sps:$4 sm:$0xff]  }
  0x72   :  { %4838 = vmatpush2.bf16.msra.mxu1 %v7038_v55  ;;  %4798 = vmatprep.subr.bf16.mxu0 %v7039_v56  ;;  %v7113_v48 = vld [vmem:[#allocation6 + $0x5c4] ss:$16 sps:$4 sm:$0xff]   ;;  %v7111_v51 = vld [vmem:[#allocation6 + $0x5c0] ss:$16 sps:$4 sm:$0xff]  }
  0x73   :  { %4839 = vmatprep.subr.bf16.mxu1 %v7041_v57  ;;  %v7116_v50 = vld [vmem:[#allocation6 + $0x7c4] ss:$16 sps:$4 sm:$0xff]   ;;  %v7114_v53 = vld [vmem:[#allocation6 + $0x7c0] ss:$16 sps:$4 sm:$0xff]  }
  0x74   :  { %v7119_v54 = vld [vmem:[#allocation6 + $0x5a4] ss:$16 sps:$4 sm:$0xff]   ;;  %v7117_v56 = vld [vmem:[#allocation6 + $0x5a0] ss:$16 sps:$4 sm:$0xff]  }
  0x75   :  { %4799 = vmatpush2.bf16.msra.mxu0 %v7043_v58  ;;  %v7122_v55 = vld [vmem:[#allocation6 + $0x7a4] ss:$16 sps:$4 sm:$0xff]   ;;  %v7120_v57 = vld [vmem:[#allocation6 + $0x7a0] ss:$16 sps:$4 sm:$0xff]  }
  0x76   :  { %4840 = vmatpush2.bf16.msra.mxu1 %v7044_v59  ;;  %4800 = vmatprep.subr.bf16.mxu0 %v7045_v60  ;;  %v7125_v58 = vld [vmem:[#allocation6 + $0x584] ss:$16 sps:$4 sm:$0xff]   ;;  %v7123_v60 = vld [vmem:[#allocation6 + $0x580] ss:$16 sps:$4 sm:$0xff]  }
  0x77   :  { %4841 = vmatprep.subr.bf16.mxu1 %v7047_v61  ;;  %v7128_v59 = vld [vmem:[#allocation6 + $0x784] ss:$16 sps:$4 sm:$0xff]   ;;  %v7126_v61 = vld [vmem:[#allocation6 + $0x780] ss:$16 sps:$4 sm:$0xff]  }
  0x78   :  { %v7135_v4 = vld [vmem:[#allocation6 + $0x540] ss:$16 sps:$4 sm:$0xff]   ;;  %v7176_v38 = vld [vmem:[#allocation6 + $0xa84] ss:$16 sps:$4 sm:$0xff]  }
  0x79   :  { %4801 = vmatpush2.bf16.msra.mxu0 %v7049_v62  ;;  %v7131_v62 = vld [vmem:[#allocation6 + $0x564] ss:$16 sps:$4 sm:$0xff]   ;;  %v7138_v5 = vld [vmem:[#allocation6 + $0x740] ss:$16 sps:$4 sm:$0xff]  }
  0x7a   :  { %4842 = vmatpush2.bf16.msra.mxu1 %v7050_v63  ;;  %4802 = vmatprep.subr.bf16.mxu0 %v7051_v0  ;;  %v7134_v63 = vld [vmem:[#allocation6 + $0x764] ss:$16 sps:$4 sm:$0xff]   ;;  %v7129_v0 = vld [vmem:[#allocation6 + $0x560] ss:$16 sps:$4 sm:$0xff]  }
  0x7b   :  { %4843 = vmatprep.subr.bf16.mxu1 %v7053_v1  ;;  %v7132_v1 = vld [vmem:[#allocation6 + $0x760] ss:$16 sps:$4 sm:$0xff]  }
  0x7c   :  { %v7165_v34 = vld [vmem:[#allocation6 + $0x8a0] ss:$16 sps:$4 sm:$0xff]  }
  0x7d   :  { %4803 = vmatpush2.bf16.msra.mxu0 %v7055_v2  ;;  %v7137_v2 = vld [vmem:[#allocation6 + $0x544] ss:$16 sps:$4 sm:$0xff]  }
  0x7e   :  { %4844 = vmatpush2.bf16.msra.mxu1 %v7056_v3  ;;  %4854 = vmatprep.subr.bf16.mxu0 %v7059_v6  ;;  %v7140_v3 = vld [vmem:[#allocation6 + $0x744] ss:$16 sps:$4 sm:$0xff]  }
  0x7f   :  { %4895 = vmatprep.subr.bf16.mxu1 %v7062_v7  ;;  %v7143_v6 = vld [vmem:[#allocation6 + $0x524] ss:$16 sps:$4 sm:$0xff]  }
  0x80   :  { %4805 = vmatmul.mubr.bf16.vlgmr.msra.gmra.mxu0 %v8357_v8  ;;  %v7146_v7 = vld [vmem:[#allocation6 + $0x724] ss:$16 sps:$4 sm:$0xff]  }
  0x81   :  { %4846 = vmatmul.mubr.bf16.vlgmr.msra.gmra.mxu1 %v8359_v9  ;;  %4855 = vmatpush1.bf16.msra.mxu0 %v7057_v10  ;;  %v7141_v10 = vld [vmem:[#allocation6 + $0x520] ss:$16 sps:$4 sm:$0xff]  }
  0x82   :  { %4896 = vmatpush1.bf16.msra.mxu1 %v7060_v11  ;;  %4856 = vmatprep.subr.bf16.mxu0 %v7065_v12  ;;  %v7144_v11 = vld [vmem:[#allocation6 + $0x720] ss:$16 sps:$4 sm:$0xff]   ;;  %v7149_v12 = vld [vmem:[#allocation6 + $0x504] ss:$16 sps:$4 sm:$0xff]  }
  0x83   :  { %4897 = vmatprep.subr.bf16.mxu1 %v7068_v13  ;;  %4886 = vmatprep.mubr.bf16.mxu0 %v8363_v37  ;;  %v7152_v13 = vld [vmem:[#allocation6 + $0x704] ss:$16 sps:$4 sm:$0xff]  }
  0x84   :  { %4927 = vmatprep.mubr.bf16.mxu1 %v8365_v40 }
  0x85   :  { %4857 = vmatpush1.bf16.msra.mxu0 %v7063_v14  ;;  %v7147_v14 = vld [vmem:[#allocation6 + $0x500] ss:$16 sps:$4 sm:$0xff]  }
  0x86   :  { %4898 = vmatpush1.bf16.msra.mxu1 %v7066_v15  ;;  %4858 = vmatprep.subr.bf16.mxu0 %v7071_v16  ;;  %v7150_v15 = vld [vmem:[#allocation6 + $0x700] ss:$16 sps:$4 sm:$0xff]  }
  0x87   :  { %4899 = vmatprep.subr.bf16.mxu1 %v7074_v17  ;;  %v98_v16 = vld [vmem:[#allocation3 + $0x20] sm:$0xff]  ;;  %v100_v17 = vld [vmem:[#allocation3 + $0x30] sm:$0xff] }
  0x89   :  { %4859 = vmatpush1.bf16.msra.mxu0 %v7069_v18  ;;  %v7155_v18 = vld [vmem:[#allocation6 + $0x8e4] ss:$16 sps:$4 sm:$0xff]  }
  0x8a   :  { %4900 = vmatpush1.bf16.msra.mxu1 %v7072_v19  ;;  %4860 = vmatprep.subr.bf16.mxu0 %v7077_v20  ;;  %v7158_v19 = vld [vmem:[#allocation6 + $0xae4] ss:$16 sps:$4 sm:$0xff]   ;;  %v8369_v20 = vpack.c.bf16 %v98_v16, %v98_v16  ;;  %v7225_v16 = vld [vmem:[#allocation6 + $0x960] ss:$16 sps:$4 sm:$0xff]  }
  0x8b   :  { %4901 = vmatprep.subr.bf16.mxu1 %v7080_v21  ;;  %v8371_v21 = vpack.c.bf16 %v100_v17, %v100_v17  ;;  %v7228_v17 = vld [vmem:[#allocation6 + $0xb60] ss:$16 sps:$4 sm:$0xff]  }
  0x8d   :  { %4861 = vmatpush1.bf16.msra.mxu0 %v7075_v22  ;;  %v7153_v22 = vld [vmem:[#allocation6 + $0x8e0] ss:$16 sps:$4 sm:$0xff]  }
  0x8e   :  { %4902 = vmatpush1.bf16.msra.mxu1 %v7078_v23  ;;  %4862 = vmatprep.subr.bf16.mxu0 %v7083_v24  ;;  %v7156_v23 = vld [vmem:[#allocation6 + $0xae0] ss:$16 sps:$4 sm:$0xff]   ;;  %v7161_v24 = vld [vmem:[#allocation6 + $0x8c4] ss:$16 sps:$4 sm:$0xff]  }
  0x8f   :  { %4903 = vmatprep.subr.bf16.mxu1 %v7086_v25  ;;  %v7164_v25 = vld [vmem:[#allocation6 + $0xac4] ss:$16 sps:$4 sm:$0xff]  }
  0x91   :  { %4863 = vmatpush1.bf16.msra.mxu0 %v7081_v26  ;;  %v103_v26 = vld [vmem:[#allocation3 + $0x48] sm:$0xff] }
  0x92   :  { %4904 = vmatpush1.bf16.msra.mxu1 %v7084_v27  ;;  %4864 = vmatprep.subr.bf16.mxu0 %v7089_v28  ;;  %v7159_v27 = vld [vmem:[#allocation6 + $0x8c0] ss:$16 sps:$4 sm:$0xff]  }
  0x93   :  { %4905 = vmatprep.subr.bf16.mxu1 %v7092_v29  ;;  %v7162_v28 = vld [vmem:[#allocation6 + $0xac0] ss:$16 sps:$4 sm:$0xff]   ;;  %v8375_v29 = vpack.c.bf16 %v103_v26, %v103_v26 }
  0x94   :  { %v7237_v26 = vld [vmem:[#allocation6 + $0x920] ss:$16 sps:$4 sm:$0xff]  }
  0x95   :  { %4865 = vmatpush1.bf16.msra.mxu0 %v7087_v30  ;;  %v105_v30 = vld [vmem:[#allocation3 + $0x58] sm:$0xff] }
  0x96   :  { %4906 = vmatpush1.bf16.msra.mxu1 %v7090_v31  ;;  %4866 = vmatprep.subr.bf16.mxu0 %v7095_v32  ;;  %v7167_v31 = vld [vmem:[#allocation6 + $0x8a4] ss:$16 sps:$4 sm:$0xff]   ;;  %v8377_v32 = vpack.c.bf16 %v105_v30, %v105_v30 }
  0x97   :  { %4907 = vmatprep.subr.bf16.mxu1 %v7098_v33  ;;  %v7170_v33 = vld [vmem:[#allocation6 + $0xaa4] ss:$16 sps:$4 sm:$0xff]  }
  0x98   :  { %v7248_v30 = vld [vmem:[#allocation6 + $0xb04] ss:$16 sps:$4 sm:$0xff]  }
  0x99   :  { %4867 = vmatpush1.bf16.msra.mxu0 %v7093_v35  ;;  %v7168_v35 = vld [vmem:[#allocation6 + $0xaa0] ss:$16 sps:$4 sm:$0xff]  }
  0x9a   :  { %4908 = vmatpush1.bf16.msra.mxu1 %v7096_v36  ;;  %4868 = vmatprep.subr.bf16.mxu0 %v7101_v39  ;;  %v7173_v36 = vld [vmem:[#allocation6 + $0x884] ss:$16 sps:$4 sm:$0xff]   ;;  %v7171_v39 = vld [vmem:[#allocation6 + $0x880] ss:$16 sps:$4 sm:$0xff]  }
  0x9b   :  { %4909 = vmatprep.subr.bf16.mxu1 %v7104_v41  ;;  %v7174_v41 = vld [vmem:[#allocation6 + $0xa80] ss:$16 sps:$4 sm:$0xff]  }
  0x9d   :  { %4869 = vmatpush1.bf16.msra.mxu0 %v7099_v42  ;;  %v7179_v42 = vld [vmem:[#allocation6 + $0x864] ss:$16 sps:$4 sm:$0xff]  }
  0x9e   :  { %4910 = vmatpush1.bf16.msra.mxu1 %v7102_v43  ;;  %4870 = vmatprep.subr.bf16.mxu0 %v7107_v44  ;;  %v7182_v43 = vld [vmem:[#allocation6 + $0xa64] ss:$16 sps:$4 sm:$0xff]   ;;  %v7177_v44 = vld [vmem:[#allocation6 + $0x860] ss:$16 sps:$4 sm:$0xff]  }
  0x9f   :  { %4911 = vmatprep.subr.bf16.mxu1 %v7110_v45  ;;  %v7180_v45 = vld [vmem:[#allocation6 + $0xa60] ss:$16 sps:$4 sm:$0xff]  }
  0xa1   :  { %4871 = vmatpush2.bf16.msra.mxu0 %v7105_v46  ;;  %v7185_v46 = vld [vmem:[#allocation6 + $0x844] ss:$16 sps:$4 sm:$0xff]  }
  0xa2   :  { %4912 = vmatpush2.bf16.msra.mxu1 %v7108_v47  ;;  %4872 = vmatprep.subr.bf16.mxu0 %v7113_v48  ;;  %v7188_v47 = vld [vmem:[#allocation6 + $0xa44] ss:$16 sps:$4 sm:$0xff]   ;;  %v7183_v48 = vld [vmem:[#allocation6 + $0x840] ss:$16 sps:$4 sm:$0xff]  }
  0xa3   :  { %4913 = vmatprep.subr.bf16.mxu1 %v7116_v50  ;;  %v7186_v50 = vld [vmem:[#allocation6 + $0xa40] ss:$16 sps:$4 sm:$0xff]  }
  0xa5   :  { %4873 = vmatpush2.bf16.msra.mxu0 %v7111_v51  ;;  %v7191_v51 = vld [vmem:[#allocation6 + $0x824] ss:$16 sps:$4 sm:$0xff]  }
  0xa6   :  { %4914 = vmatpush2.bf16.msra.mxu1 %v7114_v53  ;;  %4874 = vmatprep.subr.bf16.mxu0 %v7119_v54  ;;  %v7194_v53 = vld [vmem:[#allocation6 + $0xa24] ss:$16 sps:$4 sm:$0xff]   ;;  %v7189_v54 = vld [vmem:[#allocation6 + $0x820] ss:$16 sps:$4 sm:$0xff]  }
  0xa7   :  { %4915 = vmatprep.subr.bf16.mxu1 %v7122_v55  ;;  %v7192_v55 = vld [vmem:[#allocation6 + $0xa20] ss:$16 sps:$4 sm:$0xff]  }
  0xa9   :  { %4875 = vmatpush2.bf16.msra.mxu0 %v7117_v56  ;;  %v7197_v56 = vld [vmem:[#allocation6 + $0x804] ss:$16 sps:$4 sm:$0xff]  }
  0xaa   :  { %4916 = vmatpush2.bf16.msra.mxu1 %v7120_v57  ;;  %4876 = vmatprep.subr.bf16.mxu0 %v7125_v58  ;;  %v7200_v57 = vld [vmem:[#allocation6 + $0xa04] ss:$16 sps:$4 sm:$0xff]   ;;  %v7195_v58 = vld [vmem:[#allocation6 + $0x800] ss:$16 sps:$4 sm:$0xff]  }
  0xab   :  { %4917 = vmatprep.subr.bf16.mxu1 %v7128_v59  ;;  %v7198_v59 = vld [vmem:[#allocation6 + $0xa00] ss:$16 sps:$4 sm:$0xff]  }
  0xad   :  { %4877 = vmatpush2.bf16.msra.mxu0 %v7123_v60  ;;  %v7203_v60 = vld [vmem:[#allocation6 + $0x9e4] ss:$16 sps:$4 sm:$0xff]  }
  0xae   :  { %4918 = vmatpush2.bf16.msra.mxu1 %v7126_v61  ;;  %4878 = vmatprep.subr.bf16.mxu0 %v7131_v62  ;;  %v7206_v61 = vld [vmem:[#allocation6 + $0xbe4] ss:$16 sps:$4 sm:$0xff]   ;;  %v7201_v62 = vld [vmem:[#allocation6 + $0x9e0] ss:$16 sps:$4 sm:$0xff]  }
  0xaf   :  { %4919 = vmatprep.subr.bf16.mxu1 %v7134_v63  ;;  %v7204_v63 = vld [vmem:[#allocation6 + $0xbe0] ss:$16 sps:$4 sm:$0xff]  }
  0xb1   :  { %4879 = vmatpush2.bf16.msra.mxu0 %v7129_v0  ;;  %v7209_v0 = vld [vmem:[#allocation6 + $0x9c4] ss:$16 sps:$4 sm:$0xff]  }
  0xb2   :  { %4920 = vmatpush2.bf16.msra.mxu1 %v7132_v1  ;;  %4880 = vmatprep.subr.bf16.mxu0 %v7137_v2  ;;  %v7212_v1 = vld [vmem:[#allocation6 + $0xbc4] ss:$16 sps:$4 sm:$0xff]   ;;  %v7207_v2 = vld [vmem:[#allocation6 + $0x9c0] ss:$16 sps:$4 sm:$0xff]  }
  0xb3   :  { %4921 = vmatprep.subr.bf16.mxu1 %v7140_v3  ;;  %v7210_v3 = vld [vmem:[#allocation6 + $0xbc0] ss:$16 sps:$4 sm:$0xff]  }
  0xb5   :  { %4881 = vmatpush2.bf16.msra.mxu0 %v7135_v4  ;;  %v7215_v4 = vld [vmem:[#allocation6 + $0x9a4] ss:$16 sps:$4 sm:$0xff]  }
  0xb6   :  { %4922 = vmatpush2.bf16.msra.mxu1 %v7138_v5  ;;  %4882 = vmatprep.subr.bf16.mxu0 %v7143_v6  ;;  %v7218_v5 = vld [vmem:[#allocation6 + $0xba4] ss:$16 sps:$4 sm:$0xff]   ;;  %v7213_v6 = vld [vmem:[#allocation6 + $0x9a0] ss:$16 sps:$4 sm:$0xff]  }
  0xb7   :  { %4923 = vmatprep.subr.bf16.mxu1 %v7146_v7  ;;  %v7216_v7 = vld [vmem:[#allocation6 + $0xba0] ss:$16 sps:$4 sm:$0xff]  }
  0xb9   :  { %4883 = vmatpush2.bf16.msra.mxu0 %v7141_v10  ;;  %v7221_v10 = vld [vmem:[#allocation6 + $0x984] ss:$16 sps:$4 sm:$0xff]  }
  0xba   :  { %4924 = vmatpush2.bf16.msra.mxu1 %v7144_v11  ;;  %4884 = vmatprep.subr.bf16.mxu0 %v7149_v12  ;;  %v7224_v11 = vld [vmem:[#allocation6 + $0xb84] ss:$16 sps:$4 sm:$0xff]   ;;  %v7219_v12 = vld [vmem:[#allocation6 + $0x980] ss:$16 sps:$4 sm:$0xff]  }
  0xbb   :  { %4925 = vmatprep.subr.bf16.mxu1 %v7152_v13  ;;  %v7222_v13 = vld [vmem:[#allocation6 + $0xb80] ss:$16 sps:$4 sm:$0xff]  }
  0xbd   :  { %4885 = vmatpush2.bf16.msra.mxu0 %v7147_v14  ;;  %v7227_v14 = vld [vmem:[#allocation6 + $0x964] ss:$16 sps:$4 sm:$0xff]  }
  0xbe   :  { %4926 = vmatpush2.bf16.msra.mxu1 %v7150_v15  ;;  %4936 = vmatprep.subr.bf16.mxu0 %v7155_v18  ;;  %v7230_v15 = vld [vmem:[#allocation6 + $0xb64] ss:$16 sps:$4 sm:$0xff]  }
  0xbf   :  { %4977 = vmatprep.subr.bf16.mxu1 %v7158_v19  ;;  %v7233_v18 = vld [vmem:[#allocation6 + $0x944] ss:$16 sps:$4 sm:$0xff]  }
  0xc0   :  { %4887 = vmatmul.mubr.bf16.vlgmr.msra.gmra.mxu0 %v8369_v20  ;;  %v7236_v19 = vld [vmem:[#allocation6 + $0xb44] ss:$16 sps:$4 sm:$0xff]  }
  0xc1   :  { %4928 = vmatmul.mubr.bf16.vlgmr.msra.gmra.mxu1 %v8371_v21  ;;  %4937 = vmatpush1.bf16.msra.mxu0 %v7153_v22  ;;  %v7231_v22 = vld [vmem:[#allocation6 + $0x940] ss:$16 sps:$4 sm:$0xff]  }
  0xc2   :  { %4978 = vmatpush1.bf16.msra.mxu1 %v7156_v23  ;;  %4938 = vmatprep.subr.bf16.mxu0 %v7161_v24  ;;  %v7234_v23 = vld [vmem:[#allocation6 + $0xb40] ss:$16 sps:$4 sm:$0xff]   ;;  %v7239_v24 = vld [vmem:[#allocation6 + $0x924] ss:$16 sps:$4 sm:$0xff]  }
  0xc3   :  { %4979 = vmatprep.subr.bf16.mxu1 %v7164_v25  ;;  %4968 = vmatprep.mubr.bf16.mxu0 %v8375_v29  ;;  %v7242_v25 = vld [vmem:[#allocation6 + $0xb24] ss:$16 sps:$4 sm:$0xff]  }
  0xc4   :  { %5009 = vmatprep.mubr.bf16.mxu1 %v8377_v32 }
  0xc5   :  { %4939 = vmatpush1.bf16.msra.mxu0 %v7159_v27  ;;  %v7240_v27 = vld [vmem:[#allocation6 + $0xb20] ss:$16 sps:$4 sm:$0xff]  }
  0xc6   :  { %4980 = vmatpush1.bf16.msra.mxu1 %v7162_v28  ;;  %4940 = vmatprep.subr.bf16.mxu0 %v7167_v31  ;;  %v7245_v28 = vld [vmem:[#allocation6 + $0x904] ss:$16 sps:$4 sm:$0xff]   ;;  %v7243_v31 = vld [vmem:[#allocation6 + $0x900] ss:$16 sps:$4 sm:$0xff]  }
  0xc7   :  { %4981 = vmatprep.subr.bf16.mxu1 %v7170_v33  ;;  %v7246_v33 = vld [vmem:[#allocation6 + $0xb00] ss:$16 sps:$4 sm:$0xff]  }
  0xc9   :  { %4941 = vmatpush1.bf16.msra.mxu0 %v7165_v34  ;;  %v102_v34 = vld [vmem:[#allocation3 + $0x40] sm:$0xff] }
  0xca   :  { %4982 = vmatpush1.bf16.msra.mxu1 %v7168_v35  ;;  %4942 = vmatprep.subr.bf16.mxu0 %v7173_v36  ;;  %v104_v35 = vld [vmem:[#allocation3 + $0x50] sm:$0xff] }
  0xcb   :  { %4983 = vmatprep.subr.bf16.mxu1 %v7176_v38  ;;  %v7251_v36 = vld [vmem:[#allocation6 + $0xce4] ss:$16 sps:$4 sm:$0xff]  }
  0xcc   :  { %v7254_v38 = vld [vmem:[#allocation6 + $0xee4] ss:$16 sps:$4 sm:$0xff]  }
  0xcd   :  { %4943 = vmatpush1.bf16.msra.mxu0 %v7171_v39  ;;  %v7249_v39 = vld [vmem:[#allocation6 + $0xce0] ss:$16 sps:$4 sm:$0xff]  }
  0xce   :  { %4984 = vmatpush1.bf16.msra.mxu1 %v7174_v41  ;;  %4944 = vmatprep.subr.bf16.mxu0 %v7179_v42  ;;  %v107_v41 = vld [vmem:[#allocation3 + $0x68] sm:$0xff]  ;;  %v8381_v42 = vpack.c.bf16 %v102_v34, %v102_v34  ;;  %v7315_v34 = vld [vmem:[#allocation6 + $0xd80] ss:$16 sps:$4 sm:$0xff]  }
  0xcf   :  { %4985 = vmatprep.subr.bf16.mxu1 %v7182_v43  ;;  %v8383_v43 = vpack.c.bf16 %v104_v35, %v104_v35  ;;  %v7318_v35 = vld [vmem:[#allocation6 + $0xf80] ss:$16 sps:$4 sm:$0xff]  }
  0xd1   :  { %4945 = vmatpush1.bf16.msra.mxu0 %v7177_v44  ;;  %v109_v44 = vld [vmem:[#allocation3 + $0x78] sm:$0xff] }
  0xd2   :  { %4986 = vmatpush1.bf16.msra.mxu1 %v7180_v45  ;;  %4946 = vmatprep.subr.bf16.mxu0 %v7185_v46  ;;  %v7252_v45 = vld [vmem:[#allocation6 + $0xee0] ss:$16 sps:$4 sm:$0xff]   ;;  %v7257_v46 = vld [vmem:[#allocation6 + $0xcc4] ss:$16 sps:$4 sm:$0xff]  }
  0xd3   :  { %4987 = vmatprep.subr.bf16.mxu1 %v7188_v47  ;;  %v7260_v47 = vld [vmem:[#allocation6 + $0xec4] ss:$16 sps:$4 sm:$0xff]  }
  0xd5   :  { %4947 = vmatpush1.bf16.msra.mxu0 %v7183_v48  ;;  %v8385_v48 = vpack.c.bf16 %v107_v41, %v107_v41  ;;  %v7324_v41 = vld [vmem:[#allocation6 + $0xf60] ss:$16 sps:$4 sm:$0xff]  }
  0xd6   :  { %4988 = vmatpush1.bf16.msra.mxu1 %v7186_v50  ;;  %4948 = vmatprep.subr.bf16.mxu0 %v7191_v51  ;;  %v8387_v50 = vpack.c.bf16 %v109_v44, %v109_v44  ;;  %v7255_v51 = vld [vmem:[#allocation6 + $0xcc0] ss:$16 sps:$4 sm:$0xff]   ;;  %v7329_v44 = vld [vmem:[#allocation6 + $0xd44] ss:$16 sps:$4 sm:$0xff]  }
  0xd7   :  { %4989 = vmatprep.subr.bf16.mxu1 %v7194_v53  ;;  %v7258_v53 = vld [vmem:[#allocation6 + $0xec0] ss:$16 sps:$4 sm:$0xff]  }
  0xd9   :  { %4949 = vmatpush1.bf16.msra.mxu0 %v7189_v54  ;;  %v7263_v54 = vld [vmem:[#allocation6 + $0xca4] ss:$16 sps:$4 sm:$0xff]  }
  0xda   :  { %4990 = vmatpush1.bf16.msra.mxu1 %v7192_v55  ;;  %4950 = vmatprep.subr.bf16.mxu0 %v7197_v56  ;;  %v7266_v55 = vld [vmem:[#allocation6 + $0xea4] ss:$16 sps:$4 sm:$0xff]   ;;  %v7261_v56 = vld [vmem:[#allocation6 + $0xca0] ss:$16 sps:$4 sm:$0xff]  }
  0xdb   :  { %4991 = vmatprep.subr.bf16.mxu1 %v7200_v57  ;;  %v7264_v57 = vld [vmem:[#allocation6 + $0xea0] ss:$16 sps:$4 sm:$0xff]  }
  0xdd   :  { %4951 = vmatpush1.bf16.msra.mxu0 %v7195_v58  ;;  %v7269_v58 = vld [vmem:[#allocation6 + $0xc84] ss:$16 sps:$4 sm:$0xff]  }
  0xde   :  { %4992 = vmatpush1.bf16.msra.mxu1 %v7198_v59  ;;  %4952 = vmatprep.subr.bf16.mxu0 %v7203_v60  ;;  %v7272_v59 = vld [vmem:[#allocation6 + $0xe84] ss:$16 sps:$4 sm:$0xff]   ;;  %v7267_v60 = vld [vmem:[#allocation6 + $0xc80] ss:$16 sps:$4 sm:$0xff]  }
  0xdf   :  { %4993 = vmatprep.subr.bf16.mxu1 %v7206_v61  ;;  %v7270_v61 = vld [vmem:[#allocation6 + $0xe80] ss:$16 sps:$4 sm:$0xff]  }
  0xe1   :  { %4953 = vmatpush2.bf16.msra.mxu0 %v7201_v62  ;;  %v7275_v62 = vld [vmem:[#allocation6 + $0xc64] ss:$16 sps:$4 sm:$0xff]  }
  0xe2   :  { %4994 = vmatpush2.bf16.msra.mxu1 %v7204_v63  ;;  %4954 = vmatprep.subr.bf16.mxu0 %v7209_v0  ;;  %v7278_v63 = vld [vmem:[#allocation6 + $0xe64] ss:$16 sps:$4 sm:$0xff]   ;;  %v7273_v0 = vld [vmem:[#allocation6 + $0xc60] ss:$16 sps:$4 sm:$0xff]  }
  0xe3   :  { %4995 = vmatprep.subr.bf16.mxu1 %v7212_v1  ;;  %v7276_v1 = vld [vmem:[#allocation6 + $0xe60] ss:$16 sps:$4 sm:$0xff]  }
  0xe5   :  { %4955 = vmatpush2.bf16.msra.mxu0 %v7207_v2  ;;  %v7281_v2 = vld [vmem:[#allocation6 + $0xc44] ss:$16 sps:$4 sm:$0xff]  }
  0xe6   :  { %4996 = vmatpush2.bf16.msra.mxu1 %v7210_v3  ;;  %4956 = vmatprep.subr.bf16.mxu0 %v7215_v4  ;;  %v7284_v3 = vld [vmem:[#allocation6 + $0xe44] ss:$16 sps:$4 sm:$0xff]   ;;  %v7279_v4 = vld [vmem:[#allocation6 + $0xc40] ss:$16 sps:$4 sm:$0xff]  }
  0xe7   :  { %4997 = vmatprep.subr.bf16.mxu1 %v7218_v5  ;;  %v7282_v5 = vld [vmem:[#allocation6 + $0xe40] ss:$16 sps:$4 sm:$0xff]  }
  0xe9   :  { %4957 = vmatpush2.bf16.msra.mxu0 %v7213_v6  ;;  %v7287_v6 = vld [vmem:[#allocation6 + $0xc24] ss:$16 sps:$4 sm:$0xff]  }
  0xea   :  { %4998 = vmatpush2.bf16.msra.mxu1 %v7216_v7  ;;  %4958 = vmatprep.subr.bf16.mxu0 %v7221_v10  ;;  %v7290_v7 = vld [vmem:[#allocation6 + $0xe24] ss:$16 sps:$4 sm:$0xff]   ;;  %v7285_v10 = vld [vmem:[#allocation6 + $0xc20] ss:$16 sps:$4 sm:$0xff]  }
  0xeb   :  { %4999 = vmatprep.subr.bf16.mxu1 %v7224_v11  ;;  %v7288_v11 = vld [vmem:[#allocation6 + $0xe20] ss:$16 sps:$4 sm:$0xff]  }
  0xed   :  { %4959 = vmatpush2.bf16.msra.mxu0 %v7219_v12  ;;  %v7293_v12 = vld [vmem:[#allocation6 + $0xc04] ss:$16 sps:$4 sm:$0xff]  }
  0xee   :  { %5000 = vmatpush2.bf16.msra.mxu1 %v7222_v13  ;;  %4960 = vmatprep.subr.bf16.mxu0 %v7227_v14  ;;  %v7296_v13 = vld [vmem:[#allocation6 + $0xe04] ss:$16 sps:$4 sm:$0xff]   ;;  %v7291_v14 = vld [vmem:[#allocation6 + $0xc00] ss:$16 sps:$4 sm:$0xff]  }
  0xef   :  { %5001 = vmatprep.subr.bf16.mxu1 %v7230_v15  ;;  %v7294_v15 = vld [vmem:[#allocation6 + $0xe00] ss:$16 sps:$4 sm:$0xff]  }
  0xf1   :  { %4961 = vmatpush2.bf16.msra.mxu0 %v7225_v16  ;;  %v7299_v16 = vld [vmem:[#allocation6 + $0xde4] ss:$16 sps:$4 sm:$0xff]  }
  0xf2   :  { %5002 = vmatpush2.bf16.msra.mxu1 %v7228_v17  ;;  %4962 = vmatprep.subr.bf16.mxu0 %v7233_v18  ;;  %v7302_v17 = vld [vmem:[#allocation6 + $0xfe4] ss:$16 sps:$4 sm:$0xff]   ;;  %v7297_v18 = vld [vmem:[#allocation6 + $0xde0] ss:$16 sps:$4 sm:$0xff]  }
  0xf3   :  { %5003 = vmatprep.subr.bf16.mxu1 %v7236_v19  ;;  %v7300_v19 = vld [vmem:[#allocation6 + $0xfe0] ss:$16 sps:$4 sm:$0xff]  }
  0xf5   :  { %4963 = vmatpush2.bf16.msra.mxu0 %v7231_v22  ;;  %v7305_v22 = vld [vmem:[#allocation6 + $0xdc4] ss:$16 sps:$4 sm:$0xff]  }
  0xf6   :  { %5004 = vmatpush2.bf16.msra.mxu1 %v7234_v23  ;;  %4964 = vmatprep.subr.bf16.mxu0 %v7239_v24  ;;  %v7308_v23 = vld [vmem:[#allocation6 + $0xfc4] ss:$16 sps:$4 sm:$0xff]   ;;  %v7303_v24 = vld [vmem:[#allocation6 + $0xdc0] ss:$16 sps:$4 sm:$0xff]  }
  0xf7   :  { %5005 = vmatprep.subr.bf16.mxu1 %v7242_v25  ;;  %v7306_v25 = vld [vmem:[#allocation6 + $0xfc0] ss:$16 sps:$4 sm:$0xff]  }
  0xf9   :  { %4965 = vmatpush2.bf16.msra.mxu0 %v7237_v26  ;;  %v7311_v26 = vld [vmem:[#allocation6 + $0xda4] ss:$16 sps:$4 sm:$0xff]  }
  0xfa   :  { %5006 = vmatpush2.bf16.msra.mxu1 %v7240_v27  ;;  %4966 = vmatprep.subr.bf16.mxu0 %v7245_v28  ;;  %v7314_v27 = vld [vmem:[#allocation6 + $0xfa4] ss:$16 sps:$4 sm:$0xff]   ;;  %v7309_v28 = vld [vmem:[#allocation6 + $0xda0] ss:$16 sps:$4 sm:$0xff]  }
  0xfb   :  { %5007 = vmatprep.subr.bf16.mxu1 %v7248_v30  ;;  %v7312_v30 = vld [vmem:[#allocation6 + $0xfa0] ss:$16 sps:$4 sm:$0xff]  }
  0xfd   :  { %4967 = vmatpush2.bf16.msra.mxu0 %v7243_v31  ;;  %v7317_v31 = vld [vmem:[#allocation6 + $0xd84] ss:$16 sps:$4 sm:$0xff]  }
  0xfe   :  { %5008 = vmatpush2.bf16.msra.mxu1 %v7246_v33  ;;  %5018 = vmatprep.subr.bf16.mxu0 %v7251_v36  ;;  %v7320_v33 = vld [vmem:[#allocation6 + $0xf84] ss:$16 sps:$4 sm:$0xff]  }
  0xff   :  { %5059 = vmatprep.subr.bf16.mxu1 %v7254_v38  ;;  %v7323_v36 = vld [vmem:[#allocation6 + $0xd64] ss:$16 sps:$4 sm:$0xff]  }
 0x100   :  { %4969 = vmatmul.mubr.bf16.vlgmr.msra.gmra.mxu0 %v8381_v42  ;;  %v7326_v38 = vld [vmem:[#allocation6 + $0xf64] ss:$16 sps:$4 sm:$0xff]  }
 0x101   :  { %5010 = vmatmul.mubr.bf16.vlgmr.msra.gmra.mxu1 %v8383_v43  ;;  %5019 = vmatpush1.bf16.msra.mxu0 %v7249_v39  ;;  %v7321_v39 = vld [vmem:[#allocation6 + $0xd60] ss:$16 sps:$4 sm:$0xff]  }
 0x102   :  { %5060 = vmatpush1.bf16.msra.mxu1 %v7252_v45  ;;  %5020 = vmatprep.subr.bf16.mxu0 %v7257_v46  ;;  %v7332_v45 = vld [vmem:[#allocation6 + $0xf44] ss:$16 sps:$4 sm:$0xff]   ;;  %v7327_v46 = vld [vmem:[#allocation6 + $0xd40] ss:$16 sps:$4 sm:$0xff]  }
 0x103   :  { %5061 = vmatprep.subr.bf16.mxu1 %v7260_v47  ;;  %5050 = vmatprep.mubr.bf16.mxu0 %v8385_v48  ;;  %v7330_v47 = vld [vmem:[#allocation6 + $0xf40] ss:$16 sps:$4 sm:$0xff]  }
 0x104   :  { %5091 = vmatprep.mubr.bf16.mxu1 %v8387_v50 }
 0x105   :  { %5021 = vmatpush1.bf16.msra.mxu0 %v7255_v51  ;;  %v912_v51 = vlaneseq }
 0x106   :  { %5062 = vmatpush1.bf16.msra.mxu1 %v7258_v53  ;;  %5022 = vmatprep.subr.bf16.mxu0 %v7263_v54  ;;  %v7335_v53 = vld [vmem:[#allocation6 + $0xd24] ss:$16 sps:$4 sm:$0xff]  }
 0x107   :  { %5063 = vmatprep.subr.bf16.mxu1 %v7266_v55  ;;  %v7338_v54 = vld [vmem:[#allocation6 + $0xf24] ss:$16 sps:$4 sm:$0xff]   ;;  %v7333_v55 = vld [vmem:[#allocation6 + $0xd20] ss:$16 sps:$4 sm:$0xff]  }
 0x109   :  { %5023 = vmatpush1.bf16.msra.mxu0 %v7261_v56  ;;  %v7336_v56 = vld [vmem:[#allocation6 + $0xf20] ss:$16 sps:$4 sm:$0xff]  }
 0x10a   :  { %5064 = vmatpush1.bf16.msra.mxu1 %v7264_v57  ;;  %5024 = vmatprep.subr.bf16.mxu0 %v7269_v58  ;;  %v8393_v57 = vshrl.u32 %v912_v51, 7  ;;  %v7341_v58 = vld [vmem:[#allocation6 + $0xd04] ss:$16 sps:$4 sm:$0xff]   ;;  %v7366_v51 = vld [vmem:[#allocation6 + $0x1280] ss:$16 sps:$4 sm:$0xff]  }
 0x10b   :  { %5065 = vmatprep.subr.bf16.mxu1 %v7272_v59  ;;  %v7344_v59 = vld [vmem:[#allocation6 + $0xf04] ss:$16 sps:$4 sm:$0xff]  }
 0x10d   :  { %5025 = vmatpush1.bf16.msra.mxu0 %v7267_v60  ;;  %v7339_v60 = vld [vmem:[#allocation6 + $0xd00] ss:$16 sps:$4 sm:$0xff]  }
 0x10e   :  { %5066 = vmatpush1.bf16.msra.mxu1 %v7270_v61  ;;  %5026 = vmatprep.subr.bf16.mxu0 %v7275_v62  ;;  %v7342_v61 = vld [vmem:[#allocation6 + $0xf00] ss:$16 sps:$4 sm:$0xff]  }
 0x10f   :  { %5067 = vmatprep.subr.bf16.mxu1 %v7278_v63  ;;  %v910_v62 = vld [vmem:[#allocation8] sm:$0xf] }
 0x110   :  { %v106_v63 = vld [vmem:[#allocation3 + $0x60] sm:$0xff] }
 0x111   :  { %5027 = vmatpush1.bf16.msra.mxu0 %v7273_v0  ;;  %v914_v0 = vsub.s32 0, %v8393_v57 }
 0x112   :  { %5068 = vmatpush1.bf16.msra.mxu1 %v7276_v1  ;;  %5028 = vmatprep.subr.bf16.mxu0 %v7281_v2  ;;  %v108_v1 = vld [vmem:[#allocation3 + $0x70] sm:$0xff] }
 0x113   :  { %5069 = vmatprep.subr.bf16.mxu1 %v7284_v3  ;;  %v7347_v2 = vld [vmem:[#allocation6 + $0x10e4] ss:$16 sps:$4 sm:$0xff]  }
 0x114   :  { %v7350_v3 = vld [vmem:[#allocation6 + $0x12e4] ss:$16 sps:$4 sm:$0xff]  }
 0x115   :  { %5029 = vmatpush1.bf16.msra.mxu0 %v7279_v4  ;;  %v7345_v4 = vld [vmem:[#allocation6 + $0x10e0] ss:$16 sps:$4 sm:$0xff]  }
 0x116   :  { %5070 = vmatpush1.bf16.msra.mxu1 %v7282_v5  ;;  %5030 = vmatprep.subr.bf16.mxu0 %v7287_v6  ;;  %v918_v5 = vsub.s32 1, %v8393_v57  ;;  %v111_v6 = vld [vmem:[#allocation3 + $0x88] sm:$0xff] }
 0x117   :  { %5071 = vmatprep.subr.bf16.mxu1 %v7290_v7  ;;  %v8397_v7 = vpack.c.bf16 %v106_v63, %v106_v63  ;;  %v7386_v63 = vld [vmem:[#allocation6 + $0x1224] ss:$16 sps:$4 sm:$0xff]  }
 0x119   :  { %5031 = vmatpush1.bf16.msra.mxu0 %v7285_v10  ;;  %v8399_v10 = vpack.c.bf16 %v108_v1, %v108_v1  ;;  %v7384_v1 = vld [vmem:[#allocation6 + $0x1220] ss:$16 sps:$4 sm:$0xff]  }
 0x11a   :  { %5072 = vmatpush1.bf16.msra.mxu1 %v7288_v11  ;;  %5032 = vmatprep.subr.bf16.mxu0 %v7293_v12  ;;  %v113_v11 = vld [vmem:[#allocation3 + $0x98] sm:$0xff]  ;;  %v915_v12 = vrot.slane %v910_v62, %v914_v0  ;;  %v7381_v0 = vld [vmem:[#allocation6 + $0x1020] ss:$16 sps:$4 sm:$0xff]  }
 0x11b   :  { %5073 = vmatprep.subr.bf16.mxu1 %v7296_v13  ;;  %v7348_v13 = vld [vmem:[#allocation6 + $0x12e0] ss:$16 sps:$4 sm:$0xff]  }
 0x11d   :  { %5033 = vmatpush1.bf16.msra.mxu0 %v7291_v14  ;;  %v7353_v14 = vld [vmem:[#allocation6 + $0x10c4] ss:$16 sps:$4 sm:$0xff]  }
 0x11e   :  { %5074 = vmatpush1.bf16.msra.mxu1 %v7294_v15  ;;  %5034 = vmatprep.subr.bf16.mxu0 %v7299_v16  ;;  %v7356_v15 = vld [vmem:[#allocation6 + $0x12c4] ss:$16 sps:$4 sm:$0xff]   ;;  %v919_v16 = vrot.slane %v910_v62, %v918_v5  ;;  %v7390_v5 = vld [vmem:[#allocation6 + $0x1200] ss:$16 sps:$4 sm:$0xff]  }
 0x11f   :  { %5075 = vmatprep.subr.bf16.mxu1 %v7302_v17  ;;  %v8401_v17 = vpack.c.bf16 %v111_v6, %v111_v6  ;;  %v7383_v62 = vld [vmem:[#allocation6 + $0x1024] ss:$16 sps:$4 sm:$0xff]  }
 0x120   :  { %v7395_v6 = vld [vmem:[#allocation6 + $0x11e4] ss:$16 sps:$4 sm:$0xff]  }
 0x121   :  { %5035 = vmatpush2.bf16.msra.mxu0 %v7297_v18  ;;  %v8403_v18 = vpack.c.bf16 %v113_v11, %v113_v11  ;;  %v7398_v11 = vld [vmem:[#allocation6 + $0x13e4] ss:$16 sps:$4 sm:$0xff]  }
 0x122   :  { %5076 = vmatpush2.bf16.msra.mxu1 %v7300_v19  ;;  %5036 = vmatprep.subr.bf16.mxu0 %v7305_v22 }
 0x123   :  { %5077 = vmatprep.subr.bf16.mxu1 %v7308_v23  ;;  %v7351_v23 = vld [vmem:[#allocation6 + $0x10c0] ss:$16 sps:$4 sm:$0xff]  }
 0x125   :  { %5037 = vmatpush2.bf16.msra.mxu0 %v7303_v24 }
 0x126   :  { %5078 = vmatpush2.bf16.msra.mxu1 %v7306_v25  ;;  %5038 = vmatprep.subr.bf16.mxu0 %v7311_v26  ;;  %v7354_v25 = vld [vmem:[#allocation6 + $0x12c0] ss:$16 sps:$4 sm:$0xff]  }
 0x127   :  { %5079 = vmatprep.subr.bf16.mxu1 %v7314_v27 }
 0x129   :  { %5039 = vmatpush2.bf16.msra.mxu0 %v7309_v28  ;;  %v7359_v28 = vld [vmem:[#allocation6 + $0x10a4] ss:$16 sps:$4 sm:$0xff]  }
 0x12a   :  { %5080 = vmatpush2.bf16.msra.mxu1 %v7312_v30  ;;  %5040 = vmatprep.subr.bf16.mxu0 %v7317_v31  ;;  %v7362_v30 = vld [vmem:[#allocation6 + $0x12a4] ss:$16 sps:$4 sm:$0xff]  }
 0x12b   :  { %5081 = vmatprep.subr.bf16.mxu1 %v7320_v33 }
 0x12d   :  { %5041 = vmatpush2.bf16.msra.mxu0 %v7315_v34 }
 0x12e   :  { %5082 = vmatpush2.bf16.msra.mxu1 %v7318_v35  ;;  %5042 = vmatprep.subr.bf16.mxu0 %v7323_v36  ;;  %v7357_v36 = vld [vmem:[#allocation6 + $0x10a0] ss:$16 sps:$4 sm:$0xff]  }
 0x12f   :  { %5083 = vmatprep.subr.bf16.mxu1 %v7326_v38 }
 0x131   :  { %5043 = vmatpush2.bf16.msra.mxu0 %v7321_v39  ;;  %v7360_v39 = vld [vmem:[#allocation6 + $0x12a0] ss:$16 sps:$4 sm:$0xff]  }
 0x132   :  { %5084 = vmatpush2.bf16.msra.mxu1 %v7324_v41  ;;  %5044 = vmatprep.subr.bf16.mxu0 %v7329_v44 }
 0x133   :  { %5085 = vmatprep.subr.bf16.mxu1 %v7332_v45  ;;  %v7365_v45 = vld [vmem:[#allocation6 + $0x1084] ss:$16 sps:$4 sm:$0xff]  }
 0x135   :  { %5045 = vmatpush2.bf16.msra.mxu0 %v7327_v46  ;;  %v7368_v46 = vld [vmem:[#allocation6 + $0x1284] ss:$16 sps:$4 sm:$0xff]  }
 0x136   :  { %5086 = vmatpush2.bf16.msra.mxu1 %v7330_v47  ;;  %5046 = vmatprep.subr.bf16.mxu0 %v7335_v53  ;;  %v7363_v47 = vld [vmem:[#allocation6 + $0x1080] ss:$16 sps:$4 sm:$0xff]   ;;  %v7371_v53 = vld [vmem:[#allocation6 + $0x1064] ss:$16 sps:$4 sm:$0xff]  }
 0x137   :  { %5087 = vmatprep.subr.bf16.mxu1 %v7338_v54  ;;  %v7374_v54 = vld [vmem:[#allocation6 + $0x1264] ss:$16 sps:$4 sm:$0xff]  }
 0x139   :  { %5047 = vmatpush2.bf16.msra.mxu0 %v7333_v55  ;;  %v7369_v55 = vld [vmem:[#allocation6 + $0x1060] ss:$16 sps:$4 sm:$0xff]  }
 0x13a   :  { %5088 = vmatpush2.bf16.msra.mxu1 %v7336_v56  ;;  %5048 = vmatprep.subr.bf16.mxu0 %v7341_v58  ;;  %v7372_v56 = vld [vmem:[#allocation6 + $0x1260] ss:$16 sps:$4 sm:$0xff]   ;;  %v7377_v58 = vld [vmem:[#allocation6 + $0x1044] ss:$16 sps:$4 sm:$0xff]  }
 0x13b   :  { %5089 = vmatprep.subr.bf16.mxu1 %v7344_v59  ;;  %v7380_v59 = vld [vmem:[#allocation6 + $0x1244] ss:$16 sps:$4 sm:$0xff]  }
 0x13d   :  { %5049 = vmatpush2.bf16.msra.mxu0 %v7339_v60  ;;  %v7375_v60 = vld [vmem:[#allocation6 + $0x1040] ss:$16 sps:$4 sm:$0xff]  }
 0x13e   :  { %5090 = vmatpush2.bf16.msra.mxu1 %v7342_v61  ;;  %5100 = vmatprep.subr.bf16.mxu0 %v7347_v2  ;;  %v7378_v61 = vld [vmem:[#allocation6 + $0x1240] ss:$16 sps:$4 sm:$0xff]   ;;  %v7389_v2 = vld [vmem:[#allocation6 + $0x1004] ss:$16 sps:$4 sm:$0xff]  }
 0x13f   :  { %5141 = vmatprep.subr.bf16.mxu1 %v7350_v3  ;;  %v7392_v3 = vld [vmem:[#allocation6 + $0x1204] ss:$16 sps:$4 sm:$0xff]  }
 0x140   :  { %v4806_v19 = vpop.f32.mrf.mxu0  ;;  %5051 = vmatmul.mubr.bf16.vlgmr.msra.gmra.mxu0 %v8397_v7 }
 0x141   :  { %v4847_v22 = vpop.f32.mrf.mxu1  ;;  %5092 = vmatmul.mubr.bf16.vlgmr.msra.gmra.mxu1 %v8399_v10  ;;  %v4807_v24 = vadd.f32 %v4806_v19, %v915_v12  ;;  %5101 = vmatpush1.bf16.msra.mxu0 %v7345_v4  ;;  %v7387_v4 = vld [vmem:[#allocation6 + $0x1000] ss:$16 sps:$4 sm:$0xff]  }
 0x142   :  { %5142 = vmatpush1.bf16.msra.mxu1 %v7348_v13  ;;  %v4808_v26 = vpop.f32.mrf.mxu0  ;;  %5102 = vmatprep.subr.bf16.mxu0 %v7353_v14  ;;  %v7393_v12 = vld [vmem:[#allocation6 + $0x11e0] ss:$16 sps:$4 sm:$0xff]   ;;  %v7401_v14 = vld [vmem:[#allocation6 + $0x11c4] ss:$16 sps:$4 sm:$0xff]  }
 0x143   :  { %v4849_v27 = vpop.f32.mrf.mxu1  ;;  %5143 = vmatprep.subr.bf16.mxu1 %v7356_v15  ;;  %v8407_v31 = vadd.f32 %v4847_v22, %v4807_v24  ;;  %v4809_v33 = vadd.f32 %v4808_v26, %v919_v16  ;;  %5132 = vmatprep.mubr.bf16.mxu0 %v8401_v17  ;;  %v7396_v13 = vld [vmem:[#allocation6 + $0x13e0] ss:$16 sps:$4 sm:$0xff]   ;;  %v7404_v15 = vld [vmem:[#allocation6 + $0x13c4] ss:$16 sps:$4 sm:$0xff]  }
 0x144   :  { %5173 = vmatprep.mubr.bf16.mxu1 %v8403_v18  ;;  %v4810_v34 = vpop.f32.mrf.mxu0  ;;  %v7399_v16 = vld [vmem:[#allocation6 + $0x11c0] ss:$16 sps:$4 sm:$0xff]   ;;  %v7407_v22 = vld [vmem:[#allocation6 + $0x11a4] ss:$16 sps:$4 sm:$0xff]  }
 0x145   :  { %v4851_v35 = vpop.f32.mrf.mxu1  ;;  %v8411_v38 = vadd.f32 %v4849_v27, %v4809_v33  ;;  %5103 = vmatpush1.bf16.msra.mxu0 %v7351_v23  ;;  %v7402_v19 = vld [vmem:[#allocation6 + $0x13c0] ss:$16 sps:$4 sm:$0xff]   ;;  %v7410_v23 = vld [vmem:[#allocation6 + $0x13a4] ss:$16 sps:$4 sm:$0xff]  }
 0x146   :  { %5144 = vmatpush1.bf16.msra.mxu1 %v7354_v25  ;;  %v4811_v41 = vpop.f32.mrf.mxu0  ;;  %5104 = vmatprep.subr.bf16.mxu0 %v7359_v28  ;;  %v7405_v24 = vld [vmem:[#allocation6 + $0x11a0] ss:$16 sps:$4 sm:$0xff]   ;;  %v7413_v26 = vld [vmem:[#allocation6 + $0x1184] ss:$16 sps:$4 sm:$0xff]  }
 0x147   :  { %v4852_v44 = vpop.f32.mrf.mxu1  ;;  %5145 = vmatprep.subr.bf16.mxu1 %v7362_v30  ;;  %v7408_v25 = vld [vmem:[#allocation6 + $0x13a0] ss:$16 sps:$4 sm:$0xff]   ;;  %v7416_v27 = vld [vmem:[#allocation6 + $0x1384] ss:$16 sps:$4 sm:$0xff]  }
 0x148   :  { %v7411_v28 = vld [vmem:[#allocation6 + $0x1180] ss:$16 sps:$4 sm:$0xff]   ;;  %v7419_v33 = vld [vmem:[#allocation6 + $0x1164] ss:$16 sps:$4 sm:$0xff]  }
 0x149   :  { %5105 = vmatpush1.bf16.msra.mxu0 %v7357_v36  ;;  %v7414_v30 = vld [vmem:[#allocation6 + $0x1380] ss:$16 sps:$4 sm:$0xff]   ;;  %v7422_v34 = vld [vmem:[#allocation6 + $0x1364] ss:$16 sps:$4 sm:$0xff]  }
 0x14a   :  { %5146 = vmatpush1.bf16.msra.mxu1 %v7360_v39  ;;  %5106 = vmatprep.subr.bf16.mxu0 %v7365_v45  ;;  %v7417_v35 = vld [vmem:[#allocation6 + $0x1160] ss:$16 sps:$4 sm:$0xff]   ;;  %v7425_v39 = vld [vmem:[#allocation6 + $0x1144] ss:$16 sps:$4 sm:$0xff]  }
 0x14b   :  { %5147 = vmatprep.subr.bf16.mxu1 %v7368_v46  ;;  %v7420_v36 = vld [vmem:[#allocation6 + $0x1360] ss:$16 sps:$4 sm:$0xff]   ;;  %v7428_v41 = vld [vmem:[#allocation6 + $0x1344] ss:$16 sps:$4 sm:$0xff]  }
 0x14c   :  { %v7423_v44 = vld [vmem:[#allocation6 + $0x1140] ss:$16 sps:$4 sm:$0xff]   ;;  %v7431_v46 = vld [vmem:[#allocation6 + $0x1124] ss:$16 sps:$4 sm:$0xff]  }
 0x14d   :  { %5107 = vmatpush1.bf16.msra.mxu0 %v7363_v47  ;;  %v7426_v45 = vld [vmem:[#allocation6 + $0x1340] ss:$16 sps:$4 sm:$0xff]   ;;  %v7434_v47 = vld [vmem:[#allocation6 + $0x1324] ss:$16 sps:$4 sm:$0xff]  }
 0x14e   :  { %5148 = vmatpush1.bf16.msra.mxu1 %v7366_v51  ;;  %5108 = vmatprep.subr.bf16.mxu0 %v7371_v53  ;;  %v7429_v51 = vld [vmem:[#allocation6 + $0x1120] ss:$16 sps:$4 sm:$0xff]  }
 0x14f   :  { %5149 = vmatprep.subr.bf16.mxu1 %v7374_v54  ;;  %v7432_v53 = vld [vmem:[#allocation6 + $0x1320] ss:$16 sps:$4 sm:$0xff]   ;;  %v7437_v54 = vld [vmem:[#allocation6 + $0x1104] ss:$16 sps:$4 sm:$0xff]  }
 0x151   :  { %5109 = vmatpush1.bf16.msra.mxu0 %v7369_v55  ;;  %v7440_v55 = vld [vmem:[#allocation6 + $0x1304] ss:$16 sps:$4 sm:$0xff]  }
 0x152   :  { %5150 = vmatpush1.bf16.msra.mxu1 %v7372_v56  ;;  %5110 = vmatprep.subr.bf16.mxu0 %v7377_v58  ;;  %v7435_v56 = vld [vmem:[#allocation6 + $0x1100] ss:$16 sps:$4 sm:$0xff]  }
 0x153   :  { %5151 = vmatprep.subr.bf16.mxu1 %v7380_v59  ;;  %v7438_v58 = vld [vmem:[#allocation6 + $0x1300] ss:$16 sps:$4 sm:$0xff]  }
 0x154   :  { %v110_v59 = vld [vmem:[#allocation3 + $0x80] sm:$0xff] }
 0x155   :  { %5111 = vmatpush1.bf16.msra.mxu0 %v7375_v60  ;;  %v112_v60 = vld [vmem:[#allocation3 + $0x90] sm:$0xff] }
 0x156   :  { %5152 = vmatpush1.bf16.msra.mxu1 %v7378_v61  ;;  %5112 = vmatprep.subr.bf16.mxu0 %v7383_v62  ;;  %v7443_v61 = vld [vmem:[#allocation6 + $0x14e4] ss:$16 sps:$4 sm:$0xff]  }
 0x157   :  { %5153 = vmatprep.subr.bf16.mxu1 %v7386_v63  ;;  %v7446_v62 = vld [vmem:[#allocation6 + $0x16e4] ss:$16 sps:$4 sm:$0xff]   ;;  %v115_v63 = vld [vmem:[#allocation3 + $0xa8] sm:$0xff] }
 0x159   :  { %5113 = vmatpush1.bf16.msra.mxu0 %v7381_v0  ;;  %v117_v0 = vld [vmem:[#allocation3 + $0xb8] sm:$0xff] }
 0x15a   :  { %5154 = vmatpush1.bf16.msra.mxu1 %v7384_v1  ;;  %5114 = vmatprep.subr.bf16.mxu0 %v7389_v2  ;;  %v7441_v1 = vld [vmem:[#allocation6 + $0x14e0] ss:$16 sps:$4 sm:$0xff]  }
 0x15b   :  { %5155 = vmatprep.subr.bf16.mxu1 %v7392_v3  ;;  %v7444_v2 = vld [vmem:[#allocation6 + $0x16e0] ss:$16 sps:$4 sm:$0xff]   ;;  %v8413_v3 = vpack.c.bf16 %v110_v59, %v110_v59  ;;  %v7482_v59 = vld [vmem:[#allocation6 + $0x1624] ss:$16 sps:$4 sm:$0xff]  }
 0x15d   :  { %5115 = vmatpush1.bf16.msra.mxu0 %v7387_v4  ;;  %v8415_v4 = vpack.c.bf16 %v112_v60, %v112_v60  ;;  %v7477_v60 = vld [vmem:[#allocation6 + $0x1420] ss:$16 sps:$4 sm:$0xff]  }
 0x15e   :  { %5156 = vmatpush1.bf16.msra.mxu1 %v7390_v5  ;;  %5116 = vmatprep.subr.bf16.mxu0 %v7395_v6  ;;  %v7449_v5 = vld [vmem:[#allocation6 + $0x14c4] ss:$16 sps:$4 sm:$0xff]  }
 0x15f   :  { %5157 = vmatprep.subr.bf16.mxu1 %v7398_v11  ;;  %v7452_v6 = vld [vmem:[#allocation6 + $0x16c4] ss:$16 sps:$4 sm:$0xff]   ;;  %v7447_v11 = vld [vmem:[#allocation6 + $0x14c0] ss:$16 sps:$4 sm:$0xff]  }
 0x161   :  { %5117 = vmatpush2.bf16.msra.mxu0 %v7393_v12  ;;  %v7450_v12 = vld [vmem:[#allocation6 + $0x16c0] ss:$16 sps:$4 sm:$0xff]  }
 0x162   :  { %5158 = vmatpush2.bf16.msra.mxu1 %v7396_v13  ;;  %5118 = vmatprep.subr.bf16.mxu0 %v7401_v14  ;;  %v8417_v13 = vpack.c.bf16 %v115_v63, %v115_v63  ;;  %v8419_v14 = vpack.c.bf16 %v117_v0, %v117_v0  ;;  %v7488_v63 = vld [vmem:[#allocation6 + $0x1604] ss:$16 sps:$4 sm:$0xff]   ;;  %v7483_v0 = vld [vmem:[#allocation6 + $0x1400] ss:$16 sps:$4 sm:$0xff]  }
 0x163   :  { %5159 = vmatprep.subr.bf16.mxu1 %v7404_v15 }
 0x165   :  { %5119 = vmatpush2.bf16.msra.mxu0 %v7399_v16 }
 0x166   :  { %5160 = vmatpush2.bf16.msra.mxu1 %v7402_v19  ;;  %5120 = vmatprep.subr.bf16.mxu0 %v7407_v22 }
 0x167   :  { %5161 = vmatprep.subr.bf16.mxu1 %v7410_v23 }
 0x169   :  { %5121 = vmatpush2.bf16.msra.mxu0 %v7405_v24  ;;  %v7455_v24 = vld [vmem:[#allocation6 + $0x14a4] ss:$16 sps:$4 sm:$0xff]  }
 0x16a   :  { %5162 = vmatpush2.bf16.msra.mxu1 %v7408_v25  ;;  %5122 = vmatprep.subr.bf16.mxu0 %v7413_v26  ;;  %v7458_v25 = vld [vmem:[#allocation6 + $0x16a4] ss:$16 sps:$4 sm:$0xff]  }
 0x16b   :  { %5163 = vmatprep.subr.bf16.mxu1 %v7416_v27 }
 0x16d   :  { %5123 = vmatpush2.bf16.msra.mxu0 %v7411_v28  ;;  %v7453_v28 = vld [vmem:[#allocation6 + $0x14a0] ss:$16 sps:$4 sm:$0xff]  }
 0x16e   :  { %5164 = vmatpush2.bf16.msra.mxu1 %v7414_v30  ;;  %5124 = vmatprep.subr.bf16.mxu0 %v7419_v33  ;;  %v7456_v30 = vld [vmem:[#allocation6 + $0x16a0] ss:$16 sps:$4 sm:$0xff]  }
 0x16f   :  { %5165 = vmatprep.subr.bf16.mxu1 %v7422_v34 }
 0x171   :  { %5125 = vmatpush2.bf16.msra.mxu0 %v7417_v35 }
 0x172   :  { %5166 = vmatpush2.bf16.msra.mxu1 %v7420_v36  ;;  %5126 = vmatprep.subr.bf16.mxu0 %v7425_v39  ;;  %v7461_v39 = vld [vmem:[#allocation6 + $0x1484] ss:$16 sps:$4 sm:$0xff]  }
 0x173   :  { %5167 = vmatprep.subr.bf16.mxu1 %v7428_v41  ;;  %v7464_v41 = vld [vmem:[#allocation6 + $0x1684] ss:$16 sps:$4 sm:$0xff]  }
 0x175   :  { %5127 = vmatpush2.bf16.msra.mxu0 %v7423_v44  ;;  %v7462_v44 = vld [vmem:[#allocation6 + $0x1680] ss:$16 sps:$4 sm:$0xff]  }
 0x176   :  { %5168 = vmatpush2.bf16.msra.mxu1 %v7426_v45  ;;  %5128 = vmatprep.subr.bf16.mxu0 %v7431_v46  ;;  %v7467_v45 = vld [vmem:[#allocation6 + $0x1464] ss:$16 sps:$4 sm:$0xff]  }
 0x177   :  { %5169 = vmatprep.subr.bf16.mxu1 %v7434_v47  ;;  %v7470_v46 = vld [vmem:[#allocation6 + $0x1664] ss:$16 sps:$4 sm:$0xff]   ;;  %v7465_v47 = vld [vmem:[#allocation6 + $0x1460] ss:$16 sps:$4 sm:$0xff]  }
 0x179   :  { %5129 = vmatpush2.bf16.msra.mxu0 %v7429_v51  ;;  %v7468_v51 = vld [vmem:[#allocation6 + $0x1660] ss:$16 sps:$4 sm:$0xff]  }
 0x17a   :  { %5170 = vmatpush2.bf16.msra.mxu1 %v7432_v53  ;;  %5130 = vmatprep.subr.bf16.mxu0 %v7437_v54  ;;  %v7473_v53 = vld [vmem:[#allocation6 + $0x1444] ss:$16 sps:$4 sm:$0xff]  }
 0x17b   :  { %5171 = vmatprep.subr.bf16.mxu1 %v7440_v55  ;;  %v7476_v54 = vld [vmem:[#allocation6 + $0x1644] ss:$16 sps:$4 sm:$0xff]   ;;  %v7471_v55 = vld [vmem:[#allocation6 + $0x1440] ss:$16 sps:$4 sm:$0xff]  }
 0x17d   :  { %5131 = vmatpush2.bf16.msra.mxu0 %v7435_v56  ;;  %v7474_v56 = vld [vmem:[#allocation6 + $0x1640] ss:$16 sps:$4 sm:$0xff]  }
 0x17e   :  { %5172 = vmatpush2.bf16.msra.mxu1 %v7438_v58  ;;  %5182 = vmatprep.subr.bf16.mxu0 %v7443_v61  ;;  %v7479_v58 = vld [vmem:[#allocation6 + $0x1424] ss:$16 sps:$4 sm:$0xff]   ;;  %v7480_v61 = vld [vmem:[#allocation6 + $0x1620] ss:$16 sps:$4 sm:$0xff]  }
 0x17f   :  { %5223 = vmatprep.subr.bf16.mxu1 %v7446_v62  ;;  %v7485_v62 = vld [vmem:[#allocation6 + $0x1404] ss:$16 sps:$4 sm:$0xff]  }
 0x180   :  { %v4888_v15 = vpop.f32.mrf.mxu0  ;;  %5133 = vmatmul.mubr.bf16.vlgmr.msra.gmra.mxu0 %v8413_v3 }
 0x181   :  { %v4929_v16 = vpop.f32.mrf.mxu1  ;;  %5174 = vmatmul.mubr.bf16.vlgmr.msra.gmra.mxu1 %v8415_v4  ;;  %v4889_v19 = vadd.f32 %v4888_v15, %v8407_v31  ;;  %5183 = vmatpush1.bf16.msra.mxu0 %v7441_v1  ;;  %v7486_v1 = vld [vmem:[#allocation6 + $0x1600] ss:$16 sps:$4 sm:$0xff]   ;;  %v7500_v15 = vld [vmem:[#allocation6 + $0x17c4] ss:$16 sps:$4 sm:$0xff]  }
 0x182   :  { %5224 = vmatpush1.bf16.msra.mxu1 %v7444_v2  ;;  %v4890_v22 = vpop.f32.mrf.mxu0  ;;  %5184 = vmatprep.subr.bf16.mxu0 %v7449_v5  ;;  %v7491_v2 = vld [vmem:[#allocation6 + $0x15e4] ss:$16 sps:$4 sm:$0xff]  }
 0x183   :  { %v4931_v23 = vpop.f32.mrf.mxu1  ;;  %5225 = vmatprep.subr.bf16.mxu1 %v7452_v6  ;;  %v8424_v26 = vadd.f32 %v4929_v16, %v4889_v19  ;;  %v4891_v27 = vadd.f32 %v4890_v22, %v8411_v38  ;;  %5214 = vmatprep.mubr.bf16.mxu0 %v8417_v13  ;;  %v7459_v38 = vld [vmem:[#allocation6 + $0x1480] ss:$16 sps:$4 sm:$0xff]   ;;  %v7494_v5 = vld [vmem:[#allocation6 + $0x17e4] ss:$16 sps:$4 sm:$0xff]  }
 0x184   :  { %5255 = vmatprep.mubr.bf16.mxu1 %v8419_v14  ;;  %v4892_v33 = vpop.f32.mrf.mxu0  ;;  %v7489_v6 = vld [vmem:[#allocation6 + $0x15e0] ss:$16 sps:$4 sm:$0xff]   ;;  %v7503_v22 = vld [vmem:[#allocation6 + $0x15a4] ss:$16 sps:$4 sm:$0xff]  }
 0x185   :  { %v4933_v31 = vpop.f32.mrf.mxu1  ;;  %v8429_v34 = vadd.f32 %v4931_v23, %v4891_v27  ;;  %5185 = vmatpush1.bf16.msra.mxu0 %v7447_v11  ;;  %v7492_v11 = vld [vmem:[#allocation6 + $0x17e0] ss:$16 sps:$4 sm:$0xff]   ;;  %v7506_v23 = vld [vmem:[#allocation6 + $0x17a4] ss:$16 sps:$4 sm:$0xff]  }
 0x186   :  { %5226 = vmatpush1.bf16.msra.mxu1 %v7450_v12  ;;  %v4893_v35 = vpop.f32.mrf.mxu0  ;;  %5186 = vmatprep.subr.bf16.mxu0 %v7455_v24  ;;  %v7497_v12 = vld [vmem:[#allocation6 + $0x15c4] ss:$16 sps:$4 sm:$0xff]   ;;  %v7495_v16 = vld [vmem:[#allocation6 + $0x15c0] ss:$16 sps:$4 sm:$0xff]  }
 0x187   :  { %v4934_v36 = vpop.f32.mrf.mxu1  ;;  %5227 = vmatprep.subr.bf16.mxu1 %v7458_v25  ;;  %v7498_v19 = vld [vmem:[#allocation6 + $0x17c0] ss:$16 sps:$4 sm:$0xff]   ;;  %v7509_v27 = vld [vmem:[#allocation6 + $0x1584] ss:$16 sps:$4 sm:$0xff]  }
 0x188   :  { %v7501_v24 = vld [vmem:[#allocation6 + $0x15a0] ss:$16 sps:$4 sm:$0xff]   ;;  %v7515_v31 = vld [vmem:[#allocation6 + $0x1564] ss:$16 sps:$4 sm:$0xff]  }
 0x189   :  { %5187 = vmatpush1.bf16.msra.mxu0 %v7453_v28  ;;  %v7504_v25 = vld [vmem:[#allocation6 + $0x17a0] ss:$16 sps:$4 sm:$0xff]   ;;  %v7512_v28 = vld [vmem:[#allocation6 + $0x1784] ss:$16 sps:$4 sm:$0xff]  }
 0x18a   :  { %5228 = vmatpush1.bf16.msra.mxu1 %v7456_v30  ;;  %5188 = vmatprep.subr.bf16.mxu0 %v7461_v39  ;;  %v7507_v30 = vld [vmem:[#allocation6 + $0x1580] ss:$16 sps:$4 sm:$0xff]   ;;  %v7518_v35 = vld [vmem:[#allocation6 + $0x1764] ss:$16 sps:$4 sm:$0xff]  }
 0x18b   :  { %5229 = vmatprep.subr.bf16.mxu1 %v7464_v41  ;;  %v7510_v33 = vld [vmem:[#allocation6 + $0x1780] ss:$16 sps:$4 sm:$0xff]   ;;  %v7521_v41 = vld [vmem:[#allocation6 + $0x1544] ss:$16 sps:$4 sm:$0xff]  }
 0x18c   :  { %v7513_v36 = vld [vmem:[#allocation6 + $0x1560] ss:$16 sps:$4 sm:$0xff]  }
 0x18d   :  { %5189 = vmatpush1.bf16.msra.mxu0 %v7459_v38  ;;  %v7516_v39 = vld [vmem:[#allocation6 + $0x1760] ss:$16 sps:$4 sm:$0xff]   ;;  %v7524_v38 = vld [vmem:[#allocation6 + $0x1744] ss:$16 sps:$4 sm:$0xff]  }
 0x18e   :  { %5230 = vmatpush1.bf16.msra.mxu1 %v7462_v44  ;;  %5190 = vmatprep.subr.bf16.mxu0 %v7467_v45  ;;  %v7519_v44 = vld [vmem:[#allocation6 + $0x1540] ss:$16 sps:$4 sm:$0xff]  }
 0x18f   :  { %5231 = vmatprep.subr.bf16.mxu1 %v7470_v46  ;;  %v7522_v45 = vld [vmem:[#allocation6 + $0x1740] ss:$16 sps:$4 sm:$0xff]   ;;  %v7527_v46 = vld [vmem:[#allocation6 + $0x1524] ss:$16 sps:$4 sm:$0xff]  }
 0x191   :  { %5191 = vmatpush1.bf16.msra.mxu0 %v7465_v47  ;;  %v7530_v47 = vld [vmem:[#allocation6 + $0x1724] ss:$16 sps:$4 sm:$0xff]  }
 0x192   :  { %5232 = vmatpush1.bf16.msra.mxu1 %v7468_v51  ;;  %5192 = vmatprep.subr.bf16.mxu0 %v7473_v53  ;;  %v7525_v51 = vld [vmem:[#allocation6 + $0x1520] ss:$16 sps:$4 sm:$0xff]  }
 0x193   :  { %5233 = vmatprep.subr.bf16.mxu1 %v7476_v54  ;;  %v7528_v53 = vld [vmem:[#allocation6 + $0x1720] ss:$16 sps:$4 sm:$0xff]   ;;  %v7533_v54 = vld [vmem:[#allocation6 + $0x1504] ss:$16 sps:$4 sm:$0xff]  }
 0x195   :  { %5193 = vmatpush1.bf16.msra.mxu0 %v7471_v55  ;;  %v7536_v55 = vld [vmem:[#allocation6 + $0x1704] ss:$16 sps:$4 sm:$0xff]  }
 0x196   :  { %5234 = vmatpush1.bf16.msra.mxu1 %v7474_v56  ;;  %5194 = vmatprep.subr.bf16.mxu0 %v7479_v58  ;;  %v7531_v56 = vld [vmem:[#allocation6 + $0x1500] ss:$16 sps:$4 sm:$0xff]  }
 0x197   :  { %5235 = vmatprep.subr.bf16.mxu1 %v7482_v59  ;;  %v7534_v58 = vld [vmem:[#allocation6 + $0x1700] ss:$16 sps:$4 sm:$0xff]  }
 0x198   :  { %v114_v59 = vld [vmem:[#allocation3 + $0xa0] sm:$0xff] }
 0x199   :  { %5195 = vmatpush1.bf16.msra.mxu0 %v7477_v60  ;;  %v116_v60 = vld [vmem:[#allocation3 + $0xb0] sm:$0xff] }
 0x19a   :  { %5236 = vmatpush1.bf16.msra.mxu1 %v7480_v61  ;;  %5196 = vmatprep.subr.bf16.mxu0 %v7485_v62  ;;  %v7539_v61 = vld [vmem:[#allocation6 + $0xec] ss:$16 sps:$4 sm:$0xff]  }
 0x19b   :  { %5237 = vmatprep.subr.bf16.mxu1 %v7488_v63  ;;  %v7542_v62 = vld [vmem:[#allocation6 + $0x2ec] ss:$16 sps:$4 sm:$0xff]   ;;  %v7537_v63 = vld [vmem:[#allocation6 + $0xe8] ss:$16 sps:$4 sm:$0xff]  }
 0x19d   :  { %5197 = vmatpush1.bf16.msra.mxu0 %v7483_v0  ;;  %v7540_v0 = vld [vmem:[#allocation6 + $0x2e8] ss:$16 sps:$4 sm:$0xff]  }
 0x19e   :  { %5238 = vmatpush1.bf16.msra.mxu1 %v7486_v1  ;;  %5198 = vmatprep.subr.bf16.mxu0 %v7491_v2  ;;  %v8431_v1 = vpack.c.bf16 %v114_v59, %v114_v59  ;;  %v8433_v2 = vpack.c.bf16 %v116_v60, %v116_v60  ;;  %v7576_v59 = vld [vmem:[#allocation6 + $0x228] ss:$16 sps:$4 sm:$0xff]   ;;  %v7581_v60 = vld [vmem:[#allocation6 + $0xc] ss:$16 sps:$4 sm:$0xff]  }
 0x19f   :  { %5239 = vmatprep.subr.bf16.mxu1 %v7494_v5  ;;  %v7545_v5 = vld [vmem:[#allocation6 + $0xcc] ss:$16 sps:$4 sm:$0xff]  }
 0x1a1   :  { %5199 = vmatpush2.bf16.msra.mxu0 %v7489_v6  ;;  %v7548_v6 = vld [vmem:[#allocation6 + $0x2cc] ss:$16 sps:$4 sm:$0xff]  }
 0x1a2   :  { %5240 = vmatpush2.bf16.msra.mxu1 %v7492_v11  ;;  %5200 = vmatprep.subr.bf16.mxu0 %v7497_v12  ;;  %v7543_v11 = vld [vmem:[#allocation6 + $0xc8] ss:$16 sps:$4 sm:$0xff]  }
 0x1a3   :  { %5241 = vmatprep.subr.bf16.mxu1 %v7500_v15  ;;  %v7546_v12 = vld [vmem:[#allocation6 + $0x2c8] ss:$16 sps:$4 sm:$0xff]  }
 0x1a5   :  { %5201 = vmatpush2.bf16.msra.mxu0 %v7495_v16 }
 0x1a6   :  { %5242 = vmatpush2.bf16.msra.mxu1 %v7498_v19  ;;  %5202 = vmatprep.subr.bf16.mxu0 %v7503_v22 }
 0x1a7   :  { %5243 = vmatprep.subr.bf16.mxu1 %v7506_v23 }
 0x1a9   :  { %5203 = vmatpush2.bf16.msra.mxu0 %v7501_v24  ;;  %v7551_v24 = vld [vmem:[#allocation6 + $0xac] ss:$16 sps:$4 sm:$0xff]  }
 0x1aa   :  { %5244 = vmatpush2.bf16.msra.mxu1 %v7504_v25  ;;  %5204 = vmatprep.subr.bf16.mxu0 %v7509_v27  ;;  %v7554_v25 = vld [vmem:[#allocation6 + $0x2ac] ss:$16 sps:$4 sm:$0xff]  }
 0x1ab   :  { %5245 = vmatprep.subr.bf16.mxu1 %v7512_v28 }
 0x1ad   :  { %5205 = vmatpush2.bf16.msra.mxu0 %v7507_v30  ;;  %v7549_v30 = vld [vmem:[#allocation6 + $0xa8] ss:$16 sps:$4 sm:$0xff]  }
 0x1ae   :  { %5246 = vmatpush2.bf16.msra.mxu1 %v7510_v33  ;;  %5206 = vmatprep.subr.bf16.mxu0 %v7515_v31  ;;  %v7552_v33 = vld [vmem:[#allocation6 + $0x2a8] ss:$16 sps:$4 sm:$0xff]  }
 0x1af   :  { %5247 = vmatprep.subr.bf16.mxu1 %v7518_v35 }
 0x1b1   :  { %5207 = vmatpush2.bf16.msra.mxu0 %v7513_v36 }
 0x1b2   :  { %5248 = vmatpush2.bf16.msra.mxu1 %v7516_v39  ;;  %5208 = vmatprep.subr.bf16.mxu0 %v7521_v41  ;;  %v7557_v41 = vld [vmem:[#allocation6 + $0x8c] ss:$16 sps:$4 sm:$0xff]  }
 0x1b3   :  { %5249 = vmatprep.subr.bf16.mxu1 %v7524_v38  ;;  %v7560_v38 = vld [vmem:[#allocation6 + $0x28c] ss:$16 sps:$4 sm:$0xff]  }
 0x1b5   :  { %5209 = vmatpush2.bf16.msra.mxu0 %v7519_v44  ;;  %v7558_v44 = vld [vmem:[#allocation6 + $0x288] ss:$16 sps:$4 sm:$0xff]  }
 0x1b6   :  { %5250 = vmatpush2.bf16.msra.mxu1 %v7522_v45  ;;  %5210 = vmatprep.subr.bf16.mxu0 %v7527_v46  ;;  %v7561_v45 = vld [vmem:[#allocation6 + $0x68] ss:$16 sps:$4 sm:$0xff]  }
 0x1b7   :  { %5251 = vmatprep.subr.bf16.mxu1 %v7530_v47  ;;  %v7564_v46 = vld [vmem:[#allocation6 + $0x268] ss:$16 sps:$4 sm:$0xff]   ;;  %v7569_v47 = vld [vmem:[#allocation6 + $0x4c] ss:$16 sps:$4 sm:$0xff]  }
 0x1b9   :  { %5211 = vmatpush2.bf16.msra.mxu0 %v7525_v51  ;;  %v7572_v51 = vld [vmem:[#allocation6 + $0x24c] ss:$16 sps:$4 sm:$0xff]  }
 0x1ba   :  { %5252 = vmatpush2.bf16.msra.mxu1 %v7528_v53  ;;  %5212 = vmatprep.subr.bf16.mxu0 %v7533_v54  ;;  %v7567_v53 = vld [vmem:[#allocation6 + $0x48] ss:$16 sps:$4 sm:$0xff]  }
 0x1bb   :  { %5253 = vmatprep.subr.bf16.mxu1 %v7536_v55  ;;  %v7570_v54 = vld [vmem:[#allocation6 + $0x248] ss:$16 sps:$4 sm:$0xff]   ;;  %v7575_v55 = vld [vmem:[#allocation6 + $0x2c] ss:$16 sps:$4 sm:$0xff]  }
 0x1bd   :  { %5213 = vmatpush2.bf16.msra.mxu0 %v7531_v56  ;;  %v7578_v56 = vld [vmem:[#allocation6 + $0x22c] ss:$16 sps:$4 sm:$0xff]  }
 0x1be   :  { %5254 = vmatpush2.bf16.msra.mxu1 %v7534_v58  ;;  %5264 = vmatprep.subr.bf16.mxu0 %v7539_v61  ;;  %v7573_v58 = vld [vmem:[#allocation6 + $0x28] ss:$16 sps:$4 sm:$0xff]   ;;  %v7584_v61 = vld [vmem:[#allocation6 + $0x20c] ss:$16 sps:$4 sm:$0xff]  }
 0x1bf   :  { %5305 = vmatprep.subr.bf16.mxu1 %v7542_v62  ;;  %v7579_v62 = vld [vmem:[#allocation6 + $0x8] ss:$16 sps:$4 sm:$0xff]  }
 0x1c0   :  { %v4970_v15 = vpop.f32.mrf.mxu0  ;;  %5215 = vmatmul.mubr.bf16.vlgmr.msra.gmra.mxu0 %v8431_v1 }
 0x1c1   :  { %v5011_v16 = vpop.f32.mrf.mxu1  ;;  %5256 = vmatmul.mubr.bf16.vlgmr.msra.gmra.mxu1 %v8433_v2  ;;  %v4971_v19 = vadd.f32 %v4970_v15, %v8424_v26  ;;  %5265 = vmatpush1.bf16.msra.mxu0 %v7537_v63  ;;  %v7582_v63 = vld [vmem:[#allocation6 + $0x208] ss:$16 sps:$4 sm:$0xff]   ;;  %v7596_v15 = vld [vmem:[#allocation6 + $0x3cc] ss:$16 sps:$4 sm:$0xff]  }
 0x1c2   :  { %5306 = vmatpush1.bf16.msra.mxu1 %v7540_v0  ;;  %v4972_v22 = vpop.f32.mrf.mxu0  ;;  %5266 = vmatprep.subr.bf16.mxu0 %v7545_v5  ;;  %v7587_v0 = vld [vmem:[#allocation6 + $0x1ec] ss:$16 sps:$4 sm:$0xff]  }
 0x1c3   :  { %v5013_v23 = vpop.f32.mrf.mxu1  ;;  %5307 = vmatprep.subr.bf16.mxu1 %v7548_v6  ;;  %v8438_v27 = vadd.f32 %v5011_v16, %v4971_v19  ;;  %v4973_v28 = vadd.f32 %v4972_v22, %v8429_v34  ;;  %5296 = vmatprep.mubr.bf16.mxu0 %v8351_v49  ;;  %v7555_v34 = vld [vmem:[#allocation6 + $0x88] ss:$16 sps:$4 sm:$0xff]   ;;  %v7563_v49 = vld [vmem:[#allocation6 + $0x6c] ss:$16 sps:$4 sm:$0xff]  }
 0x1c4   :  { %5337 = vmatprep.mubr.bf16.mxu1 %v8353_v52  ;;  %v4974_v31 = vpop.f32.mrf.mxu0  ;;  %v7566_v52 = vld [vmem:[#allocation6 + $0x26c] ss:$16 sps:$4 sm:$0xff]   ;;  %v7585_v6 = vld [vmem:[#allocation6 + $0x1e8] ss:$16 sps:$4 sm:$0xff]  }
 0x1c5   :  { %v5015_v26 = vpop.f32.mrf.mxu1  ;;  %v8443_v35 = vadd.f32 %v5013_v23, %v4973_v28  ;;  %5267 = vmatpush1.bf16.msra.mxu0 %v7543_v11  ;;  %v7590_v5 = vld [vmem:[#allocation6 + $0x3ec] ss:$16 sps:$4 sm:$0xff]   ;;  %v7588_v11 = vld [vmem:[#allocation6 + $0x3e8] ss:$16 sps:$4 sm:$0xff]  }
 0x1c6   :  { %5308 = vmatpush1.bf16.msra.mxu1 %v7546_v12  ;;  %v4975_v36 = vpop.f32.mrf.mxu0  ;;  %5268 = vmatprep.subr.bf16.mxu0 %v7551_v24  ;;  %v7593_v12 = vld [vmem:[#allocation6 + $0x1cc] ss:$16 sps:$4 sm:$0xff]   ;;  %v7591_v16 = vld [vmem:[#allocation6 + $0x1c8] ss:$16 sps:$4 sm:$0xff]  }
 0x1c7   :  { %v5016_v39 = vpop.f32.mrf.mxu1  ;;  %5309 = vmatprep.subr.bf16.mxu1 %v7554_v25  ;;  %v7594_v19 = vld [vmem:[#allocation6 + $0x3c8] ss:$16 sps:$4 sm:$0xff]   ;;  %v7599_v22 = vld [vmem:[#allocation6 + $0x1ac] ss:$16 sps:$4 sm:$0xff]  }
 0x1c8   :  { %v7602_v23 = vld [vmem:[#allocation6 + $0x3ac] ss:$16 sps:$4 sm:$0xff]   ;;  %v7597_v24 = vld [vmem:[#allocation6 + $0x1a8] ss:$16 sps:$4 sm:$0xff]  }
 0x1c9   :  { %5269 = vmatpush1.bf16.msra.mxu0 %v7549_v30  ;;  %v7600_v25 = vld [vmem:[#allocation6 + $0x3a8] ss:$16 sps:$4 sm:$0xff]   ;;  %v7605_v28 = vld [vmem:[#allocation6 + $0x18c] ss:$16 sps:$4 sm:$0xff]  }
 0x1ca   :  { %5310 = vmatpush1.bf16.msra.mxu1 %v7552_v33  ;;  %5270 = vmatprep.subr.bf16.mxu0 %v7557_v41  ;;  %v7608_v30 = vld [vmem:[#allocation6 + $0x38c] ss:$16 sps:$4 sm:$0xff]   ;;  %v7603_v33 = vld [vmem:[#allocation6 + $0x188] ss:$16 sps:$4 sm:$0xff]  }
 0x1cb   :  { %5311 = vmatprep.subr.bf16.mxu1 %v7560_v38  ;;  %v7606_v31 = vld [vmem:[#allocation6 + $0x388] ss:$16 sps:$4 sm:$0xff]   ;;  %v7611_v26 = vld [vmem:[#allocation6 + $0x16c] ss:$16 sps:$4 sm:$0xff]  }
 0x1cc   :  { %v7614_v36 = vld [vmem:[#allocation6 + $0x36c] ss:$16 sps:$4 sm:$0xff]   ;;  %v7609_v39 = vld [vmem:[#allocation6 + $0x168] ss:$16 sps:$4 sm:$0xff]  }
 0x1cd   :  { %5271 = vmatpush1.bf16.msra.mxu0 %v7555_v34  ;;  %v7612_v41 = vld [vmem:[#allocation6 + $0x368] ss:$16 sps:$4 sm:$0xff]   ;;  %v7617_v38 = vld [vmem:[#allocation6 + $0x14c] ss:$16 sps:$4 sm:$0xff]  }
 0x1ce   :  { %5312 = vmatpush1.bf16.msra.mxu1 %v7558_v44  ;;  %5272 = vmatprep.subr.bf16.mxu0 %v7563_v49  ;;  %v7620_v34 = vld [vmem:[#allocation6 + $0x34c] ss:$16 sps:$4 sm:$0xff]   ;;  %v7615_v44 = vld [vmem:[#allocation6 + $0x148] ss:$16 sps:$4 sm:$0xff]  }
 0x1cf   :  { %5313 = vmatprep.subr.bf16.mxu1 %v7566_v52  ;;  %v7618_v49 = vld [vmem:[#allocation6 + $0x348] ss:$16 sps:$4 sm:$0xff]   ;;  %v7623_v52 = vld [vmem:[#allocation6 + $0x12c] ss:$16 sps:$4 sm:$0xff]  }
 0x1d1   :  { %5273 = vmatpush1.bf16.msra.mxu0 %v7561_v45  ;;  %v7626_v45 = vld [vmem:[#allocation6 + $0x32c] ss:$16 sps:$4 sm:$0xff]  }
 0x1d2   :  { %5314 = vmatpush1.bf16.msra.mxu1 %v7564_v46  ;;  %5274 = vmatprep.subr.bf16.mxu0 %v7569_v47  ;;  %v7621_v46 = vld [vmem:[#allocation6 + $0x128] ss:$16 sps:$4 sm:$0xff]  }
 0x1d3   :  { %5315 = vmatprep.subr.bf16.mxu1 %v7572_v51  ;;  %v7624_v47 = vld [vmem:[#allocation6 + $0x328] ss:$16 sps:$4 sm:$0xff]   ;;  %v7629_v51 = vld [vmem:[#allocation6 + $0x10c] ss:$16 sps:$4 sm:$0xff]  }
 0x1d5   :  { %5275 = vmatpush1.bf16.msra.mxu0 %v7567_v53  ;;  %v7632_v53 = vld [vmem:[#allocation6 + $0x30c] ss:$16 sps:$4 sm:$0xff]  }
 0x1d6   :  { %5316 = vmatpush1.bf16.msra.mxu1 %v7570_v54  ;;  %5276 = vmatprep.subr.bf16.mxu0 %v7575_v55  ;;  %v7627_v54 = vld [vmem:[#allocation6 + $0x108] ss:$16 sps:$4 sm:$0xff]  }
 0x1d7   :  { %5317 = vmatprep.subr.bf16.mxu1 %v7578_v56  ;;  %v7630_v55 = vld [vmem:[#allocation6 + $0x308] ss:$16 sps:$4 sm:$0xff]   ;;  %v7635_v56 = vld [vmem:[#allocation6 + $0x4ec] ss:$16 sps:$4 sm:$0xff]  }
 0x1d9   :  { %5277 = vmatpush1.bf16.msra.mxu0 %v7573_v58  ;;  %v7638_v58 = vld [vmem:[#allocation6 + $0x6ec] ss:$16 sps:$4 sm:$0xff]  }
 0x1da   :  { %5318 = vmatpush1.bf16.msra.mxu1 %v7576_v59  ;;  %5278 = vmatprep.subr.bf16.mxu0 %v7581_v60  ;;  %v7633_v59 = vld [vmem:[#allocation6 + $0x4e8] ss:$16 sps:$4 sm:$0xff]  }
 0x1db   :  { %5319 = vmatprep.subr.bf16.mxu1 %v7584_v61  ;;  %v7636_v60 = vld [vmem:[#allocation6 + $0x6e8] ss:$16 sps:$4 sm:$0xff]   ;;  %v7641_v61 = vld [vmem:[#allocation6 + $0x4cc] ss:$16 sps:$4 sm:$0xff]  }
 0x1dd   :  { %5279 = vmatpush1.bf16.msra.mxu0 %v7579_v62  ;;  %v7644_v62 = vld [vmem:[#allocation6 + $0x6cc] ss:$16 sps:$4 sm:$0xff]  }
 0x1de   :  { %5320 = vmatpush1.bf16.msra.mxu1 %v7582_v63  ;;  %5280 = vmatprep.subr.bf16.mxu0 %v7587_v0  ;;  %v7639_v63 = vld [vmem:[#allocation6 + $0x4c8] ss:$16 sps:$4 sm:$0xff]  }
 0x1df   :  { %5321 = vmatprep.subr.bf16.mxu1 %v7590_v5  ;;  %v7642_v0 = vld [vmem:[#allocation6 + $0x6c8] ss:$16 sps:$4 sm:$0xff]  }
 0x1e1   :  { %5281 = vmatpush2.bf16.msra.mxu0 %v7585_v6 }
 0x1e2   :  { %5322 = vmatpush2.bf16.msra.mxu1 %v7588_v11  ;;  %5282 = vmatprep.subr.bf16.mxu0 %v7593_v12 }
 0x1e3   :  { %5323 = vmatprep.subr.bf16.mxu1 %v7596_v15 }
 0x1e5   :  { %5283 = vmatpush2.bf16.msra.mxu0 %v7591_v16  ;;  %v7647_v16 = vld [vmem:[#allocation6 + $0x4ac] ss:$16 sps:$4 sm:$0xff]  }
 0x1e6   :  { %5324 = vmatpush2.bf16.msra.mxu1 %v7594_v19  ;;  %5284 = vmatprep.subr.bf16.mxu0 %v7599_v22  ;;  %v7650_v19 = vld [vmem:[#allocation6 + $0x6ac] ss:$16 sps:$4 sm:$0xff]  }
 0x1e7   :  { %5325 = vmatprep.subr.bf16.mxu1 %v7602_v23 }
 0x1e9   :  { %5285 = vmatpush2.bf16.msra.mxu0 %v7597_v24  ;;  %v7645_v24 = vld [vmem:[#allocation6 + $0x4a8] ss:$16 sps:$4 sm:$0xff]  }
 0x1ea   :  { %5326 = vmatpush2.bf16.msra.mxu1 %v7600_v25  ;;  %5286 = vmatprep.subr.bf16.mxu0 %v7605_v28  ;;  %v7648_v25 = vld [vmem:[#allocation6 + $0x6a8] ss:$16 sps:$4 sm:$0xff]  }
 0x1eb   :  { %5327 = vmatprep.subr.bf16.mxu1 %v7608_v30 }
 0x1ed   :  { %5287 = vmatpush2.bf16.msra.mxu0 %v7603_v33  ;;  %v7653_v33 = vld [vmem:[#allocation6 + $0x48c] ss:$16 sps:$4 sm:$0xff]  }
 0x1ee   :  { %5328 = vmatpush2.bf16.msra.mxu1 %v7606_v31  ;;  %5288 = vmatprep.subr.bf16.mxu0 %v7611_v26  ;;  %v7656_v31 = vld [vmem:[#allocation6 + $0x68c] ss:$16 sps:$4 sm:$0xff]   ;;  %v7654_v26 = vld [vmem:[#allocation6 + $0x688] ss:$16 sps:$4 sm:$0xff]  }
 0x1ef   :  { %5329 = vmatprep.subr.bf16.mxu1 %v7614_v36  ;;  %v7657_v36 = vld [vmem:[#allocation6 + $0x468] ss:$16 sps:$4 sm:$0xff]  }
 0x1f1   :  { %5289 = vmatpush2.bf16.msra.mxu0 %v7609_v39  ;;  %v7660_v39 = vld [vmem:[#allocation6 + $0x668] ss:$16 sps:$4 sm:$0xff]  }
 0x1f2   :  { %5330 = vmatpush2.bf16.msra.mxu1 %v7612_v41  ;;  %5290 = vmatprep.subr.bf16.mxu0 %v7617_v38  ;;  %v7665_v41 = vld [vmem:[#allocation6 + $0x44c] ss:$16 sps:$4 sm:$0xff]  }
 0x1f3   :  { %5331 = vmatprep.subr.bf16.mxu1 %v7620_v34  ;;  %v7668_v38 = vld [vmem:[#allocation6 + $0x64c] ss:$16 sps:$4 sm:$0xff]   ;;  %v7663_v34 = vld [vmem:[#allocation6 + $0x448] ss:$16 sps:$4 sm:$0xff]  }
 0x1f5   :  { %5291 = vmatpush2.bf16.msra.mxu0 %v7615_v44  ;;  %v7666_v44 = vld [vmem:[#allocation6 + $0x648] ss:$16 sps:$4 sm:$0xff]  }
 0x1f6   :  { %5332 = vmatpush2.bf16.msra.mxu1 %v7618_v49  ;;  %5292 = vmatprep.subr.bf16.mxu0 %v7623_v52  ;;  %v7671_v49 = vld [vmem:[#allocation6 + $0x42c] ss:$16 sps:$4 sm:$0xff]  }
 0x1f7   :  { %5333 = vmatprep.subr.bf16.mxu1 %v7626_v45  ;;  %v7674_v52 = vld [vmem:[#allocation6 + $0x62c] ss:$16 sps:$4 sm:$0xff]   ;;  %v7669_v45 = vld [vmem:[#allocation6 + $0x428] ss:$16 sps:$4 sm:$0xff]  }
 0x1f9   :  { %5293 = vmatpush2.bf16.msra.mxu0 %v7621_v46  ;;  %v7672_v46 = vld [vmem:[#allocation6 + $0x628] ss:$16 sps:$4 sm:$0xff]  }
 0x1fa   :  { %5334 = vmatpush2.bf16.msra.mxu1 %v7624_v47  ;;  %5294 = vmatprep.subr.bf16.mxu0 %v7629_v51  ;;  %v7677_v47 = vld [vmem:[#allocation6 + $0x40c] ss:$16 sps:$4 sm:$0xff]  }
 0x1fb   :  { %5335 = vmatprep.subr.bf16.mxu1 %v7632_v53  ;;  %v7680_v51 = vld [vmem:[#allocation6 + $0x60c] ss:$16 sps:$4 sm:$0xff]   ;;  %v7675_v53 = vld [vmem:[#allocation6 + $0x408] ss:$16 sps:$4 sm:$0xff]  }
 0x1fd   :  { %5295 = vmatpush2.bf16.msra.mxu0 %v7627_v54  ;;  %v7678_v54 = vld [vmem:[#allocation6 + $0x608] ss:$16 sps:$4 sm:$0xff]  }
 0x1fe   :  { %5336 = vmatpush2.bf16.msra.mxu1 %v7630_v55  ;;  %5346 = vmatprep.subr.bf16.mxu0 %v7635_v56  ;;  %v7683_v55 = vld [vmem:[#allocation6 + $0x5ec] ss:$16 sps:$4 sm:$0xff]  }
 0x1ff   :  { %5387 = vmatprep.subr.bf16.mxu1 %v7638_v58  ;;  %v7686_v56 = vld [vmem:[#allocation6 + $0x7ec] ss:$16 sps:$4 sm:$0xff]   ;;  %v7681_v58 = vld [vmem:[#allocation6 + $0x5e8] ss:$16 sps:$4 sm:$0xff]  }
 0x200   :  { %v5052_v5 = vpop.f32.mrf.mxu0  ;;  %5297 = vmatmul.mubr.bf16.vlgmr.msra.gmra.mxu0 %v8357_v8 }
 0x201   :  { %v5093_v6 = vpop.f32.mrf.mxu1  ;;  %5338 = vmatmul.mubr.bf16.vlgmr.msra.gmra.mxu1 %v8359_v9  ;;  %v5053_v11 = vadd.f32 %v5052_v5, %v8438_v27  ;;  %5347 = vmatpush1.bf16.msra.mxu0 %v7633_v59  ;;  %v7684_v59 = vld [vmem:[#allocation6 + $0x7e8] ss:$16 sps:$4 sm:$0xff]   ;;  %v7698_v5 = vld [vmem:[#allocation6 + $0x7ac] ss:$16 sps:$4 sm:$0xff]  }
 0x202   :  { %5388 = vmatpush1.bf16.msra.mxu1 %v7636_v60  ;;  %v5054_v12 = vpop.f32.mrf.mxu0  ;;  %5348 = vmatprep.subr.bf16.mxu0 %v7641_v61  ;;  %v7689_v60 = vld [vmem:[#allocation6 + $0x5cc] ss:$16 sps:$4 sm:$0xff]  }
 0x203   :  { %v5095_v15 = vpop.f32.mrf.mxu1  ;;  %5389 = vmatprep.subr.bf16.mxu1 %v7644_v62  ;;  %v8448_v22 = vadd.f32 %v5093_v6, %v5053_v11  ;;  %v5055_v23 = vadd.f32 %v5054_v12, %v8443_v35  ;;  %5378 = vmatprep.mubr.bf16.mxu0 %v8363_v37  ;;  %v7651_v35 = vld [vmem:[#allocation6 + $0x488] ss:$16 sps:$4 sm:$0xff]   ;;  %v7659_v37 = vld [vmem:[#allocation6 + $0x46c] ss:$16 sps:$4 sm:$0xff]  }
 0x204   :  { %5419 = vmatprep.mubr.bf16.mxu1 %v8365_v40  ;;  %v5056_v8 = vpop.f32.mrf.mxu0  ;;  %v7662_v40 = vld [vmem:[#allocation6 + $0x66c] ss:$16 sps:$4 sm:$0xff]   ;;  %v7687_v62 = vld [vmem:[#allocation6 + $0x5c8] ss:$16 sps:$4 sm:$0xff]  }
 0x205   :  { %v5097_v9 = vpop.f32.mrf.mxu1  ;;  %v8453_v27 = vadd.f32 %v5095_v15, %v5055_v23  ;;  %5349 = vmatpush1.bf16.msra.mxu0 %v7639_v63  ;;  %v7692_v61 = vld [vmem:[#allocation6 + $0x7cc] ss:$16 sps:$4 sm:$0xff]   ;;  %v7690_v63 = vld [vmem:[#allocation6 + $0x7c8] ss:$16 sps:$4 sm:$0xff]  }
 0x206   :  { %5390 = vmatpush1.bf16.msra.mxu1 %v7642_v0  ;;  %v5057_v28 = vpop.f32.mrf.mxu0  ;;  %5350 = vmatprep.subr.bf16.mxu0 %v7647_v16  ;;  %v7695_v0 = vld [vmem:[#allocation6 + $0x5ac] ss:$16 sps:$4 sm:$0xff]   ;;  %v7693_v6 = vld [vmem:[#allocation6 + $0x5a8] ss:$16 sps:$4 sm:$0xff]  }
 0x207   :  { %v5098_v30 = vpop.f32.mrf.mxu1  ;;  %5391 = vmatprep.subr.bf16.mxu1 %v7650_v19  ;;  %v7696_v11 = vld [vmem:[#allocation6 + $0x7a8] ss:$16 sps:$4 sm:$0xff]   ;;  %v7701_v12 = vld [vmem:[#allocation6 + $0x58c] ss:$16 sps:$4 sm:$0xff]  }
 0x208   :  { %v7704_v15 = vld [vmem:[#allocation6 + $0x78c] ss:$16 sps:$4 sm:$0xff]   ;;  %v7699_v16 = vld [vmem:[#allocation6 + $0x588] ss:$16 sps:$4 sm:$0xff]  }
 0x209   :  { %5351 = vmatpush1.bf16.msra.mxu0 %v7645_v24  ;;  %v7702_v19 = vld [vmem:[#allocation6 + $0x788] ss:$16 sps:$4 sm:$0xff]   ;;  %v7707_v23 = vld [vmem:[#allocation6 + $0x56c] ss:$16 sps:$4 sm:$0xff]  }
 0x20a   :  { %5392 = vmatpush1.bf16.msra.mxu1 %v7648_v25  ;;  %5352 = vmatprep.subr.bf16.mxu0 %v7653_v33  ;;  %v7710_v24 = vld [vmem:[#allocation6 + $0x76c] ss:$16 sps:$4 sm:$0xff]   ;;  %v7705_v25 = vld [vmem:[#allocation6 + $0x568] ss:$16 sps:$4 sm:$0xff]  }
 0x20b   :  { %5393 = vmatprep.subr.bf16.mxu1 %v7656_v31  ;;  %v7708_v8 = vld [vmem:[#allocation6 + $0x768] ss:$16 sps:$4 sm:$0xff]   ;;  %v7713_v9 = vld [vmem:[#allocation6 + $0x54c] ss:$16 sps:$4 sm:$0xff]  }
 0x20c   :  { %v7716_v28 = vld [vmem:[#allocation6 + $0x74c] ss:$16 sps:$4 sm:$0xff]   ;;  %v7711_v30 = vld [vmem:[#allocation6 + $0x548] ss:$16 sps:$4 sm:$0xff]  }
 0x20d   :  { %5353 = vmatpush1.bf16.msra.mxu0 %v7651_v35  ;;  %v7714_v33 = vld [vmem:[#allocation6 + $0x748] ss:$16 sps:$4 sm:$0xff]   ;;  %v7719_v31 = vld [vmem:[#allocation6 + $0x52c] ss:$16 sps:$4 sm:$0xff]  }
 0x20e   :  { %5394 = vmatpush1.bf16.msra.mxu1 %v7654_v26  ;;  %5354 = vmatprep.subr.bf16.mxu0 %v7659_v37  ;;  %v7722_v35 = vld [vmem:[#allocation6 + $0x72c] ss:$16 sps:$4 sm:$0xff]   ;;  %v7717_v26 = vld [vmem:[#allocation6 + $0x528] ss:$16 sps:$4 sm:$0xff]  }
 0x20f   :  { %5395 = vmatprep.subr.bf16.mxu1 %v7662_v40  ;;  %v7720_v37 = vld [vmem:[#allocation6 + $0x728] ss:$16 sps:$4 sm:$0xff]   ;;  %v7725_v40 = vld [vmem:[#allocation6 + $0x50c] ss:$16 sps:$4 sm:$0xff]  }
 0x211   :  { %5355 = vmatpush1.bf16.msra.mxu0 %v7657_v36  ;;  %v7728_v36 = vld [vmem:[#allocation6 + $0x70c] ss:$16 sps:$4 sm:$0xff]  }
 0x212   :  { %5396 = vmatpush1.bf16.msra.mxu1 %v7660_v39  ;;  %5356 = vmatprep.subr.bf16.mxu0 %v7665_v41  ;;  %v7723_v39 = vld [vmem:[#allocation6 + $0x508] ss:$16 sps:$4 sm:$0xff]  }
 0x213   :  { %5397 = vmatprep.subr.bf16.mxu1 %v7668_v38  ;;  %v7726_v41 = vld [vmem:[#allocation6 + $0x708] ss:$16 sps:$4 sm:$0xff]   ;;  %v7731_v38 = vld [vmem:[#allocation6 + $0x8ec] ss:$16 sps:$4 sm:$0xff]  }
 0x215   :  { %5357 = vmatpush1.bf16.msra.mxu0 %v7663_v34  ;;  %v7734_v34 = vld [vmem:[#allocation6 + $0xaec] ss:$16 sps:$4 sm:$0xff]  }
 0x216   :  { %5398 = vmatpush1.bf16.msra.mxu1 %v7666_v44  ;;  %5358 = vmatprep.subr.bf16.mxu0 %v7671_v49  ;;  %v7729_v44 = vld [vmem:[#allocation6 + $0x8e8] ss:$16 sps:$4 sm:$0xff]  }
 0x217   :  { %5399 = vmatprep.subr.bf16.mxu1 %v7674_v52  ;;  %v7732_v49 = vld [vmem:[#allocation6 + $0xae8] ss:$16 sps:$4 sm:$0xff]   ;;  %v7737_v52 = vld [vmem:[#allocation6 + $0x8cc] ss:$16 sps:$4 sm:$0xff]  }
 0x219   :  { %5359 = vmatpush1.bf16.msra.mxu0 %v7669_v45  ;;  %v7740_v45 = vld [vmem:[#allocation6 + $0xacc] ss:$16 sps:$4 sm:$0xff]  }
 0x21a   :  { %5400 = vmatpush1.bf16.msra.mxu1 %v7672_v46  ;;  %5360 = vmatprep.subr.bf16.mxu0 %v7677_v47 }
 0x21b   :  { %5401 = vmatprep.subr.bf16.mxu1 %v7680_v51 }
 0x21d   :  { %5361 = vmatpush1.bf16.msra.mxu0 %v7675_v53  ;;  %v7735_v53 = vld [vmem:[#allocation6 + $0x8c8] ss:$16 sps:$4 sm:$0xff]  }
 0x21e   :  { %5402 = vmatpush1.bf16.msra.mxu1 %v7678_v54  ;;  %5362 = vmatprep.subr.bf16.mxu0 %v7683_v55  ;;  %v7738_v54 = vld [vmem:[#allocation6 + $0xac8] ss:$16 sps:$4 sm:$0xff]  }
 0x21f   :  { %5403 = vmatprep.subr.bf16.mxu1 %v7686_v56 }
 0x221   :  { %5363 = vmatpush2.bf16.msra.mxu0 %v7681_v58  ;;  %v7743_v58 = vld [vmem:[#allocation6 + $0x8ac] ss:$16 sps:$4 sm:$0xff]  }
 0x222   :  { %5404 = vmatpush2.bf16.msra.mxu1 %v7684_v59  ;;  %5364 = vmatprep.subr.bf16.mxu0 %v7689_v60  ;;  %v7746_v59 = vld [vmem:[#allocation6 + $0xaac] ss:$16 sps:$4 sm:$0xff]  }
 0x223   :  { %5405 = vmatprep.subr.bf16.mxu1 %v7692_v61 }
 0x225   :  { %5365 = vmatpush2.bf16.msra.mxu0 %v7687_v62  ;;  %v7741_v62 = vld [vmem:[#allocation6 + $0x8a8] ss:$16 sps:$4 sm:$0xff]  }
 0x226   :  { %5406 = vmatpush2.bf16.msra.mxu1 %v7690_v63  ;;  %5366 = vmatprep.subr.bf16.mxu0 %v7695_v0  ;;  %v7744_v63 = vld [vmem:[#allocation6 + $0xaa8] ss:$16 sps:$4 sm:$0xff]  }
 0x227   :  { %5407 = vmatprep.subr.bf16.mxu1 %v7698_v5 }
 0x229   :  { %5367 = vmatpush2.bf16.msra.mxu0 %v7693_v6  ;;  %v7749_v6 = vld [vmem:[#allocation6 + $0x88c] ss:$16 sps:$4 sm:$0xff]  }
 0x22a   :  { %5408 = vmatpush2.bf16.msra.mxu1 %v7696_v11  ;;  %5368 = vmatprep.subr.bf16.mxu0 %v7701_v12  ;;  %v7752_v11 = vld [vmem:[#allocation6 + $0xa8c] ss:$16 sps:$4 sm:$0xff]  }
 0x22b   :  { %5409 = vmatprep.subr.bf16.mxu1 %v7704_v15  ;;  %v7758_v12 = vld [vmem:[#allocation6 + $0xa6c] ss:$16 sps:$4 sm:$0xff]   ;;  %v7753_v15 = vld [vmem:[#allocation6 + $0x868] ss:$16 sps:$4 sm:$0xff]  }
 0x22d   :  { %5369 = vmatpush2.bf16.msra.mxu0 %v7699_v16  ;;  %v7756_v16 = vld [vmem:[#allocation6 + $0xa68] ss:$16 sps:$4 sm:$0xff]  }
 0x22e   :  { %5410 = vmatpush2.bf16.msra.mxu1 %v7702_v19  ;;  %5370 = vmatprep.subr.bf16.mxu0 %v7707_v23  ;;  %v7761_v19 = vld [vmem:[#allocation6 + $0x84c] ss:$16 sps:$4 sm:$0xff]  }
 0x22f   :  { %5411 = vmatprep.subr.bf16.mxu1 %v7710_v24  ;;  %v7764_v23 = vld [vmem:[#allocation6 + $0xa4c] ss:$16 sps:$4 sm:$0xff]   ;;  %v7759_v24 = vld [vmem:[#allocation6 + $0x848] ss:$16 sps:$4 sm:$0xff]  }
 0x231   :  { %5371 = vmatpush2.bf16.msra.mxu0 %v7705_v25  ;;  %v7762_v25 = vld [vmem:[#allocation6 + $0xa48] ss:$16 sps:$4 sm:$0xff]  }
 0x232   :  { %5412 = vmatpush2.bf16.msra.mxu1 %v7708_v8  ;;  %5372 = vmatprep.subr.bf16.mxu0 %v7713_v9  ;;  %v7767_v8 = vld [vmem:[#allocation6 + $0x82c] ss:$16 sps:$4 sm:$0xff]  }
 0x233   :  { %5413 = vmatprep.subr.bf16.mxu1 %v7716_v28  ;;  %v7770_v9 = vld [vmem:[#allocation6 + $0xa2c] ss:$16 sps:$4 sm:$0xff]   ;;  %v7765_v28 = vld [vmem:[#allocation6 + $0x828] ss:$16 sps:$4 sm:$0xff]  }
 0x235   :  { %5373 = vmatpush2.bf16.msra.mxu0 %v7711_v30  ;;  %v7768_v30 = vld [vmem:[#allocation6 + $0xa28] ss:$16 sps:$4 sm:$0xff]  }
 0x236   :  { %5414 = vmatpush2.bf16.msra.mxu1 %v7714_v33  ;;  %5374 = vmatprep.subr.bf16.mxu0 %v7719_v31  ;;  %v7773_v33 = vld [vmem:[#allocation6 + $0x80c] ss:$16 sps:$4 sm:$0xff]  }
 0x237   :  { %5415 = vmatprep.subr.bf16.mxu1 %v7722_v35  ;;  %v7776_v31 = vld [vmem:[#allocation6 + $0xa0c] ss:$16 sps:$4 sm:$0xff]   ;;  %v7771_v35 = vld [vmem:[#allocation6 + $0x808] ss:$16 sps:$4 sm:$0xff]  }
 0x239   :  { %5375 = vmatpush2.bf16.msra.mxu0 %v7717_v26  ;;  %v7774_v26 = vld [vmem:[#allocation6 + $0xa08] ss:$16 sps:$4 sm:$0xff]  }
 0x23a   :  { %5416 = vmatpush2.bf16.msra.mxu1 %v7720_v37  ;;  %5376 = vmatprep.subr.bf16.mxu0 %v7725_v40  ;;  %v7779_v37 = vld [vmem:[#allocation6 + $0x9ec] ss:$16 sps:$4 sm:$0xff]  }
 0x23b   :  { %5417 = vmatprep.subr.bf16.mxu1 %v7728_v36  ;;  %v7782_v40 = vld [vmem:[#allocation6 + $0xbec] ss:$16 sps:$4 sm:$0xff]   ;;  %v7777_v36 = vld [vmem:[#allocation6 + $0x9e8] ss:$16 sps:$4 sm:$0xff]  }
 0x23d   :  { %5377 = vmatpush2.bf16.msra.mxu0 %v7723_v39  ;;  %v7780_v39 = vld [vmem:[#allocation6 + $0xbe8] ss:$16 sps:$4 sm:$0xff]  }
 0x23e   :  { %5418 = vmatpush2.bf16.msra.mxu1 %v7726_v41  ;;  %5428 = vmatprep.subr.bf16.mxu0 %v7731_v38  ;;  %v7785_v41 = vld [vmem:[#allocation6 + $0x9cc] ss:$16 sps:$4 sm:$0xff]  }
 0x23f   :  { %5469 = vmatprep.subr.bf16.mxu1 %v7734_v34  ;;  %v7788_v38 = vld [vmem:[#allocation6 + $0xbcc] ss:$16 sps:$4 sm:$0xff]   ;;  %v7783_v34 = vld [vmem:[#allocation6 + $0x9c8] ss:$16 sps:$4 sm:$0xff]  }
 0x240   :  { %v5134_v46 = vpop.f32.mrf.mxu0  ;;  %5379 = vmatmul.mubr.bf16.vlgmr.msra.gmra.mxu0 %v8369_v20 }
 0x241   :  { %v5175_v47 = vpop.f32.mrf.mxu1  ;;  %5420 = vmatmul.mubr.bf16.vlgmr.msra.gmra.mxu1 %v8371_v21  ;;  %v5135_v51 = vadd.f32 %v5134_v46, %v8448_v22  ;;  %5429 = vmatpush1.bf16.msra.mxu0 %v7729_v44  ;;  %v7786_v44 = vld [vmem:[#allocation6 + $0xbc8] ss:$16 sps:$4 sm:$0xff]  }
 0x242   :  { %5470 = vmatpush1.bf16.msra.mxu1 %v7732_v49  ;;  %v5136_v55 = vpop.f32.mrf.mxu0  ;;  %5430 = vmatprep.subr.bf16.mxu0 %v7737_v52  ;;  %v7791_v49 = vld [vmem:[#allocation6 + $0x9ac] ss:$16 sps:$4 sm:$0xff]   ;;  %v7792_v46 = vld [vmem:[#allocation6 + $0xba8] ss:$16 sps:$4 sm:$0xff]  }
 0x243   :  { %v5177_v56 = vpop.f32.mrf.mxu1  ;;  %5471 = vmatprep.subr.bf16.mxu1 %v7740_v45  ;;  %v8458_v60 = vadd.f32 %v5175_v47, %v5135_v51  ;;  %v5137_v61 = vadd.f32 %v5136_v55, %v8453_v27  ;;  %5460 = vmatprep.mubr.bf16.mxu0 %v8375_v29  ;;  %v7747_v27 = vld [vmem:[#allocation6 + $0x888] ss:$16 sps:$4 sm:$0xff]   ;;  %v7794_v52 = vld [vmem:[#allocation6 + $0xbac] ss:$16 sps:$4 sm:$0xff]  }
 0x244   :  { %5501 = vmatprep.mubr.bf16.mxu1 %v8377_v32  ;;  %v5138_v20 = vpop.f32.mrf.mxu0  ;;  %v7750_v29 = vld [vmem:[#allocation6 + $0xa88] ss:$16 sps:$4 sm:$0xff]   ;;  %v7755_v32 = vld [vmem:[#allocation6 + $0x86c] ss:$16 sps:$4 sm:$0xff]  }
 0x245   :  { %v5179_v21 = vpop.f32.mrf.mxu1  ;;  %v8463_v22 = vadd.f32 %v5177_v56, %v5137_v61  ;;  %5431 = vmatpush1.bf16.msra.mxu0 %v7735_v53  ;;  %v7789_v45 = vld [vmem:[#allocation6 + $0x9a8] ss:$16 sps:$4 sm:$0xff]   ;;  %v7797_v47 = vld [vmem:[#allocation6 + $0x98c] ss:$16 sps:$4 sm:$0xff]  }
 0x246   :  { %5472 = vmatpush1.bf16.msra.mxu1 %v7738_v54  ;;  %v5139_v0 = vpop.f32.mrf.mxu0  ;;  %5432 = vmatprep.subr.bf16.mxu0 %v7743_v58  ;;  %v7800_v51 = vld [vmem:[#allocation6 + $0xb8c] ss:$16 sps:$4 sm:$0xff]   ;;  %v7795_v53 = vld [vmem:[#allocation6 + $0x988] ss:$16 sps:$4 sm:$0xff]  }
 0x247   :  { %v5180_v5 = vpop.f32.mrf.mxu1  ;;  %5473 = vmatprep.subr.bf16.mxu1 %v7746_v59  ;;  %v7798_v54 = vld [vmem:[#allocation6 + $0xb88] ss:$16 sps:$4 sm:$0xff]   ;;  %v7803_v55 = vld [vmem:[#allocation6 + $0x96c] ss:$16 sps:$4 sm:$0xff]  }
 0x248   :  { %v7806_v56 = vld [vmem:[#allocation6 + $0xb6c] ss:$16 sps:$4 sm:$0xff]   ;;  %v7801_v58 = vld [vmem:[#allocation6 + $0x968] ss:$16 sps:$4 sm:$0xff]  }
 0x249   :  { %5433 = vmatpush1.bf16.msra.mxu0 %v7741_v62  ;;  %v7804_v59 = vld [vmem:[#allocation6 + $0xb68] ss:$16 sps:$4 sm:$0xff]   ;;  %v7809_v61 = vld [vmem:[#allocation6 + $0x94c] ss:$16 sps:$4 sm:$0xff]  }
 0x24a   :  { %5474 = vmatpush1.bf16.msra.mxu1 %v7744_v63  ;;  %5434 = vmatprep.subr.bf16.mxu0 %v7749_v6  ;;  %v7812_v20 = vld [vmem:[#allocation6 + $0xb4c] ss:$16 sps:$4 sm:$0xff]   ;;  %v7807_v21 = vld [vmem:[#allocation6 + $0x948] ss:$16 sps:$4 sm:$0xff]  }
 0x24b   :  { %5475 = vmatprep.subr.bf16.mxu1 %v7752_v11  ;;  %v7810_v62 = vld [vmem:[#allocation6 + $0xb48] ss:$16 sps:$4 sm:$0xff]   ;;  %v7815_v63 = vld [vmem:[#allocation6 + $0x92c] ss:$16 sps:$4 sm:$0xff]  }
 0x24c   :  { %v7818_v0 = vld [vmem:[#allocation6 + $0xb2c] ss:$16 sps:$4 sm:$0xff]   ;;  %v7813_v5 = vld [vmem:[#allocation6 + $0x928] ss:$16 sps:$4 sm:$0xff]  }
 0x24d   :  { %5435 = vmatpush1.bf16.msra.mxu0 %v7747_v27  ;;  %v7816_v6 = vld [vmem:[#allocation6 + $0xb28] ss:$16 sps:$4 sm:$0xff]   ;;  %v7821_v11 = vld [vmem:[#allocation6 + $0x90c] ss:$16 sps:$4 sm:$0xff]  }
 0x24e   :  { %5476 = vmatpush1.bf16.msra.mxu1 %v7750_v29  ;;  %5436 = vmatprep.subr.bf16.mxu0 %v7755_v32  ;;  %v7824_v27 = vld [vmem:[#allocation6 + $0xb0c] ss:$16 sps:$4 sm:$0xff]   ;;  %v7819_v29 = vld [vmem:[#allocation6 + $0x908] ss:$16 sps:$4 sm:$0xff]  }
 0x24f   :  { %5477 = vmatprep.subr.bf16.mxu1 %v7758_v12  ;;  %v7822_v32 = vld [vmem:[#allocation6 + $0xb08] ss:$16 sps:$4 sm:$0xff]   ;;  %v7827_v12 = vld [vmem:[#allocation6 + $0xcec] ss:$16 sps:$4 sm:$0xff]  }
 0x251   :  { %5437 = vmatpush1.bf16.msra.mxu0 %v7753_v15  ;;  %v7830_v15 = vld [vmem:[#allocation6 + $0xeec] ss:$16 sps:$4 sm:$0xff]  }
 0x252   :  { %5478 = vmatpush1.bf16.msra.mxu1 %v7756_v16  ;;  %5438 = vmatprep.subr.bf16.mxu0 %v7761_v19  ;;  %v7825_v16 = vld [vmem:[#allocation6 + $0xce8] ss:$16 sps:$4 sm:$0xff]  }
 0x253   :  { %5479 = vmatprep.subr.bf16.mxu1 %v7764_v23  ;;  %v7828_v19 = vld [vmem:[#allocation6 + $0xee8] ss:$16 sps:$4 sm:$0xff]   ;;  %v7833_v23 = vld [vmem:[#allocation6 + $0xccc] ss:$16 sps:$4 sm:$0xff]  }
 0x255   :  { %5439 = vmatpush1.bf16.msra.mxu0 %v7759_v24  ;;  %v7836_v24 = vld [vmem:[#allocation6 + $0xecc] ss:$16 sps:$4 sm:$0xff]  }
 0x256   :  { %5480 = vmatpush1.bf16.msra.mxu1 %v7762_v25  ;;  %5440 = vmatprep.subr.bf16.mxu0 %v7767_v8 }
 0x257   :  { %5481 = vmatprep.subr.bf16.mxu1 %v7770_v9 }
 0x259   :  { %5441 = vmatpush1.bf16.msra.mxu0 %v7765_v28  ;;  %v7831_v28 = vld [vmem:[#allocation6 + $0xcc8] ss:$16 sps:$4 sm:$0xff]  }
 0x25a   :  { %5482 = vmatpush1.bf16.msra.mxu1 %v7768_v30  ;;  %5442 = vmatprep.subr.bf16.mxu0 %v7773_v33  ;;  %v7834_v30 = vld [vmem:[#allocation6 + $0xec8] ss:$16 sps:$4 sm:$0xff]  }
 0x25b   :  { %5483 = vmatprep.subr.bf16.mxu1 %v7776_v31 }
 0x25d   :  { %5443 = vmatpush1.bf16.msra.mxu0 %v7771_v35  ;;  %v7839_v35 = vld [vmem:[#allocation6 + $0xcac] ss:$16 sps:$4 sm:$0xff]  }
 0x25e   :  { %5484 = vmatpush1.bf16.msra.mxu1 %v7774_v26  ;;  %5444 = vmatprep.subr.bf16.mxu0 %v7779_v37  ;;  %v7842_v26 = vld [vmem:[#allocation6 + $0xeac] ss:$16 sps:$4 sm:$0xff]  }
 0x25f   :  { %5485 = vmatprep.subr.bf16.mxu1 %v7782_v40 }
 0x261   :  { %5445 = vmatpush2.bf16.msra.mxu0 %v7777_v36  ;;  %v7837_v36 = vld [vmem:[#allocation6 + $0xca8] ss:$16 sps:$4 sm:$0xff]  }
 0x262   :  { %5486 = vmatpush2.bf16.msra.mxu1 %v7780_v39  ;;  %5446 = vmatprep.subr.bf16.mxu0 %v7785_v41  ;;  %v7840_v39 = vld [vmem:[#allocation6 + $0xea8] ss:$16 sps:$4 sm:$0xff]  }
 0x263   :  { %5487 = vmatprep.subr.bf16.mxu1 %v7788_v38 }
 0x265   :  { %5447 = vmatpush2.bf16.msra.mxu0 %v7783_v34  ;;  %v7845_v34 = vld [vmem:[#allocation6 + $0xc8c] ss:$16 sps:$4 sm:$0xff]  }
 0x266   :  { %5488 = vmatpush2.bf16.msra.mxu1 %v7786_v44  ;;  %5448 = vmatprep.subr.bf16.mxu0 %v7791_v49  ;;  %v7848_v44 = vld [vmem:[#allocation6 + $0xe8c] ss:$16 sps:$4 sm:$0xff]  }
 0x267   :  { %5489 = vmatprep.subr.bf16.mxu1 %v7794_v52  ;;  %v7854_v49 = vld [vmem:[#allocation6 + $0xe6c] ss:$16 sps:$4 sm:$0xff]   ;;  %v7849_v52 = vld [vmem:[#allocation6 + $0xc68] ss:$16 sps:$4 sm:$0xff]  }
 0x269   :  { %5449 = vmatpush2.bf16.msra.mxu0 %v7789_v45  ;;  %v7852_v45 = vld [vmem:[#allocation6 + $0xe68] ss:$16 sps:$4 sm:$0xff]  }
 0x26a   :  { %5490 = vmatpush2.bf16.msra.mxu1 %v7792_v46  ;;  %5450 = vmatprep.subr.bf16.mxu0 %v7797_v47  ;;  %v7857_v46 = vld [vmem:[#allocation6 + $0xc4c] ss:$16 sps:$4 sm:$0xff]  }
 0x26b   :  { %5491 = vmatprep.subr.bf16.mxu1 %v7800_v51  ;;  %v7860_v47 = vld [vmem:[#allocation6 + $0xe4c] ss:$16 sps:$4 sm:$0xff]   ;;  %v7855_v51 = vld [vmem:[#allocation6 + $0xc48] ss:$16 sps:$4 sm:$0xff]  }
 0x26d   :  { %5451 = vmatpush2.bf16.msra.mxu0 %v7795_v53  ;;  %v7858_v53 = vld [vmem:[#allocation6 + $0xe48] ss:$16 sps:$4 sm:$0xff]  }
 0x26e   :  { %5492 = vmatpush2.bf16.msra.mxu1 %v7798_v54  ;;  %5452 = vmatprep.subr.bf16.mxu0 %v7803_v55  ;;  %v7863_v54 = vld [vmem:[#allocation6 + $0xc2c] ss:$16 sps:$4 sm:$0xff]  }
 0x26f   :  { %5493 = vmatprep.subr.bf16.mxu1 %v7806_v56  ;;  %v7866_v55 = vld [vmem:[#allocation6 + $0xe2c] ss:$16 sps:$4 sm:$0xff]   ;;  %v7861_v56 = vld [vmem:[#allocation6 + $0xc28] ss:$16 sps:$4 sm:$0xff]  }
 0x271   :  { %5453 = vmatpush2.bf16.msra.mxu0 %v7801_v58  ;;  %v7864_v58 = vld [vmem:[#allocation6 + $0xe28] ss:$16 sps:$4 sm:$0xff]  }
 0x272   :  { %5494 = vmatpush2.bf16.msra.mxu1 %v7804_v59  ;;  %5454 = vmatprep.subr.bf16.mxu0 %v7809_v61  ;;  %v7869_v59 = vld [vmem:[#allocation6 + $0xc0c] ss:$16 sps:$4 sm:$0xff]  }
 0x273   :  { %5495 = vmatprep.subr.bf16.mxu1 %v7812_v20  ;;  %v7872_v61 = vld [vmem:[#allocation6 + $0xe0c] ss:$16 sps:$4 sm:$0xff]   ;;  %v7867_v20 = vld [vmem:[#allocation6 + $0xc08] ss:$16 sps:$4 sm:$0xff]  }
 0x275   :  { %5455 = vmatpush2.bf16.msra.mxu0 %v7807_v21  ;;  %v7870_v21 = vld [vmem:[#allocation6 + $0xe08] ss:$16 sps:$4 sm:$0xff]  }
 0x276   :  { %5496 = vmatpush2.bf16.msra.mxu1 %v7810_v62  ;;  %5456 = vmatprep.subr.bf16.mxu0 %v7815_v63  ;;  %v7875_v62 = vld [vmem:[#allocation6 + $0xdec] ss:$16 sps:$4 sm:$0xff]  }
 0x277   :  { %5497 = vmatprep.subr.bf16.mxu1 %v7818_v0  ;;  %v7878_v63 = vld [vmem:[#allocation6 + $0xfec] ss:$16 sps:$4 sm:$0xff]   ;;  %v7873_v0 = vld [vmem:[#allocation6 + $0xde8] ss:$16 sps:$4 sm:$0xff]  }
 0x279   :  { %5457 = vmatpush2.bf16.msra.mxu0 %v7813_v5  ;;  %v7876_v5 = vld [vmem:[#allocation6 + $0xfe8] ss:$16 sps:$4 sm:$0xff]  }
 0x27a   :  { %5498 = vmatpush2.bf16.msra.mxu1 %v7816_v6  ;;  %5458 = vmatprep.subr.bf16.mxu0 %v7821_v11  ;;  %v7881_v6 = vld [vmem:[#allocation6 + $0xdcc] ss:$16 sps:$4 sm:$0xff]  }
 0x27b   :  { %5499 = vmatprep.subr.bf16.mxu1 %v7824_v27  ;;  %v7884_v11 = vld [vmem:[#allocation6 + $0xfcc] ss:$16 sps:$4 sm:$0xff]   ;;  %v7879_v27 = vld [vmem:[#allocation6 + $0xdc8] ss:$16 sps:$4 sm:$0xff]  }
 0x27d   :  { %5459 = vmatpush2.bf16.msra.mxu0 %v7819_v29  ;;  %v7882_v29 = vld [vmem:[#allocation6 + $0xfc8] ss:$16 sps:$4 sm:$0xff]  }
 0x27e   :  { %5500 = vmatpush2.bf16.msra.mxu1 %v7822_v32  ;;  %5510 = vmatprep.subr.bf16.mxu0 %v7827_v12  ;;  %v7887_v32 = vld [vmem:[#allocation6 + $0xdac] ss:$16 sps:$4 sm:$0xff]  }
 0x27f   :  { %5551 = vmatprep.subr.bf16.mxu1 %v7830_v15  ;;  %v7890_v12 = vld [vmem:[#allocation6 + $0xfac] ss:$16 sps:$4 sm:$0xff]   ;;  %v7885_v15 = vld [vmem:[#allocation6 + $0xda8] ss:$16 sps:$4 sm:$0xff]  }
 0x280   :  { %v5216_v25 = vpop.f32.mrf.mxu0  ;;  %5461 = vmatmul.mubr.bf16.vlgmr.msra.gmra.mxu0 %v8381_v42 }
 0x281   :  { %v5257_v8 = vpop.f32.mrf.mxu1  ;;  %5502 = vmatmul.mubr.bf16.vlgmr.msra.gmra.mxu1 %v8383_v43  ;;  %v5217_v9 = vadd.f32 %v5216_v25, %v8458_v60  ;;  %5511 = vmatpush1.bf16.msra.mxu0 %v7825_v16  ;;  %v7888_v16 = vld [vmem:[#allocation6 + $0xfa8] ss:$16 sps:$4 sm:$0xff]  }
 0x282   :  { %5552 = vmatpush1.bf16.msra.mxu1 %v7828_v19  ;;  %v5218_v33 = vpop.f32.mrf.mxu0  ;;  %5512 = vmatprep.subr.bf16.mxu0 %v7833_v23  ;;  %v7893_v19 = vld [vmem:[#allocation6 + $0xd8c] ss:$16 sps:$4 sm:$0xff]   ;;  %v7894_v25 = vld [vmem:[#allocation6 + $0xf88] ss:$16 sps:$4 sm:$0xff]  }
 0x283   :  { %v5259_v31 = vpop.f32.mrf.mxu1  ;;  %5553 = vmatprep.subr.bf16.mxu1 %v7836_v24  ;;  %v8468_v37 = vadd.f32 %v5257_v8, %v5217_v9  ;;  %v5219_v40 = vadd.f32 %v5218_v33, %v8463_v22  ;;  %5542 = vmatprep.mubr.bf16.mxu0 %v8385_v48  ;;  %v7843_v22 = vld [vmem:[#allocation6 + $0xc88] ss:$16 sps:$4 sm:$0xff]   ;;  %v7896_v23 = vld [vmem:[#allocation6 + $0xf8c] ss:$16 sps:$4 sm:$0xff]  }
 0x284   :  { %5583 = vmatprep.mubr.bf16.mxu1 %v8387_v50  ;;  %v5220_v42 = vpop.f32.mrf.mxu0  ;;  %v7846_v48 = vld [vmem:[#allocation6 + $0xe88] ss:$16 sps:$4 sm:$0xff]   ;;  %v7851_v50 = vld [vmem:[#allocation6 + $0xc6c] ss:$16 sps:$4 sm:$0xff]  }
 0x285   :  { %v5261_v43 = vpop.f32.mrf.mxu1  ;;  %v8473_v60 = vadd.f32 %v5259_v31, %v5219_v40  ;;  %5513 = vmatpush1.bf16.msra.mxu0 %v7831_v28  ;;  %v7891_v24 = vld [vmem:[#allocation6 + $0xd88] ss:$16 sps:$4 sm:$0xff]   ;;  %v7899_v8 = vld [vmem:[#allocation6 + $0xd6c] ss:$16 sps:$4 sm:$0xff]  }
 0x286   :  { %5554 = vmatpush1.bf16.msra.mxu1 %v7834_v30  ;;  %v5221_v41 = vpop.f32.mrf.mxu0  ;;  %5514 = vmatprep.subr.bf16.mxu0 %v7839_v35  ;;  %v7902_v9 = vld [vmem:[#allocation6 + $0xf6c] ss:$16 sps:$4 sm:$0xff]   ;;  %v7897_v28 = vld [vmem:[#allocation6 + $0xd68] ss:$16 sps:$4 sm:$0xff]  }
 0x287   :  { %v5262_v38 = vpop.f32.mrf.mxu1  ;;  %5555 = vmatprep.subr.bf16.mxu1 %v7842_v26  ;;  %v7900_v30 = vld [vmem:[#allocation6 + $0xf68] ss:$16 sps:$4 sm:$0xff]   ;;  %v7905_v33 = vld [vmem:[#allocation6 + $0xd4c] ss:$16 sps:$4 sm:$0xff]  }
 0x288   :  { %v7908_v31 = vld [vmem:[#allocation6 + $0xf4c] ss:$16 sps:$4 sm:$0xff]   ;;  %v7903_v35 = vld [vmem:[#allocation6 + $0xd48] ss:$16 sps:$4 sm:$0xff]  }
 0x289   :  { %5515 = vmatpush1.bf16.msra.mxu0 %v7837_v36  ;;  %v7906_v26 = vld [vmem:[#allocation6 + $0xf48] ss:$16 sps:$4 sm:$0xff]   ;;  %v7911_v40 = vld [vmem:[#allocation6 + $0xd2c] ss:$16 sps:$4 sm:$0xff]  }
 0x28a   :  { %5556 = vmatpush1.bf16.msra.mxu1 %v7840_v39  ;;  %5516 = vmatprep.subr.bf16.mxu0 %v7845_v34  ;;  %v7914_v42 = vld [vmem:[#allocation6 + $0xf2c] ss:$16 sps:$4 sm:$0xff]   ;;  %v7909_v43 = vld [vmem:[#allocation6 + $0xd28] ss:$16 sps:$4 sm:$0xff]  }
 0x28b   :  { %5557 = vmatprep.subr.bf16.mxu1 %v7848_v44  ;;  %v7912_v36 = vld [vmem:[#allocation6 + $0xf28] ss:$16 sps:$4 sm:$0xff]   ;;  %v7917_v39 = vld [vmem:[#allocation6 + $0xd0c] ss:$16 sps:$4 sm:$0xff]   ;;  %v922_v44 = vsub.s32 2, %v8393_v57 }
 0x28c   :  { %v7920_v41 = vld [vmem:[#allocation6 + $0xf0c] ss:$16 sps:$4 sm:$0xff]   ;;  %v7915_v38 = vld [vmem:[#allocation6 + $0xd08] ss:$16 sps:$4 sm:$0xff]  }
 0x28d   :  { %5517 = vmatpush1.bf16.msra.mxu0 %v7843_v22  ;;  %v7918_v34 = vld [vmem:[#allocation6 + $0xf08] ss:$16 sps:$4 sm:$0xff]   ;;  %v7923_v22 = vld [vmem:[#allocation6 + $0x10ec] ss:$16 sps:$4 sm:$0xff]  }
 0x28e   :  { %5558 = vmatpush1.bf16.msra.mxu1 %v7846_v48  ;;  %5518 = vmatprep.subr.bf16.mxu0 %v7851_v50  ;;  %v7926_v48 = vld [vmem:[#allocation6 + $0x12ec] ss:$16 sps:$4 sm:$0xff]   ;;  %v926_v50 = vsub.s32 3, %v8393_v57  ;;  %v7927_v57 = vld [vmem:[#allocation6 + $0x10c8] ss:$16 sps:$4 sm:$0xff]  }
 0x28f   :  { %5559 = vmatprep.subr.bf16.mxu1 %v7854_v49  ;;  %v8125_v49 = vld [vmem:[#allocation8] sm:$0xf] }
 0x291   :  { %5519 = vmatpush1.bf16.msra.mxu0 %v7849_v52  ;;  %v923_v52 = vrot.slane %v8125_v49, %v922_v44  ;;  %v7978_v44 = vld [vmem:[#allocation6 + $0x13c8] ss:$16 sps:$4 sm:$0xff]  }
 0x292   :  { %5560 = vmatpush1.bf16.msra.mxu1 %v7852_v45  ;;  %5520 = vmatprep.subr.bf16.mxu0 %v7857_v46  ;;  %v7921_v45 = vld [vmem:[#allocation6 + $0x10e8] ss:$16 sps:$4 sm:$0xff]  }
 0x293   :  { %5561 = vmatprep.subr.bf16.mxu1 %v7860_v47  ;;  %v7924_v46 = vld [vmem:[#allocation6 + $0x12e8] ss:$16 sps:$4 sm:$0xff]   ;;  %v7929_v47 = vld [vmem:[#allocation6 + $0x10cc] ss:$16 sps:$4 sm:$0xff]  }
 0x295   :  { %5521 = vmatpush1.bf16.msra.mxu0 %v7855_v51  ;;  %v7932_v51 = vld [vmem:[#allocation6 + $0x12cc] ss:$16 sps:$4 sm:$0xff]  }
 0x296   :  { %5562 = vmatpush1.bf16.msra.mxu1 %v7858_v53  ;;  %5522 = vmatprep.subr.bf16.mxu0 %v7863_v54  ;;  %v927_v53 = vrot.slane %v8125_v49, %v926_v50  ;;  %v7981_v50 = vld [vmem:[#allocation6 + $0x11a8] ss:$16 sps:$4 sm:$0xff]  }
 0x297   :  { %5563 = vmatprep.subr.bf16.mxu1 %v7866_v55  ;;  %v7984_v49 = vld [vmem:[#allocation6 + $0x13a8] ss:$16 sps:$4 sm:$0xff]  }
 0x299   :  { %5523 = vmatpush1.bf16.msra.mxu0 %v7861_v56 }
 0x29a   :  { %5564 = vmatpush1.bf16.msra.mxu1 %v7864_v58  ;;  %5524 = vmatprep.subr.bf16.mxu0 %v7869_v59  ;;  %v7930_v58 = vld [vmem:[#allocation6 + $0x12c8] ss:$16 sps:$4 sm:$0xff]  }
 0x29b   :  { %5565 = vmatprep.subr.bf16.mxu1 %v7872_v61 }
 0x29d   :  { %5525 = vmatpush1.bf16.msra.mxu0 %v7867_v20  ;;  %v7935_v20 = vld [vmem:[#allocation6 + $0x10ac] ss:$16 sps:$4 sm:$0xff]  }
 0x29e   :  { %5566 = vmatpush1.bf16.msra.mxu1 %v7870_v21  ;;  %5526 = vmatprep.subr.bf16.mxu0 %v7875_v62  ;;  %v7938_v21 = vld [vmem:[#allocation6 + $0x12ac] ss:$16 sps:$4 sm:$0xff]  }
 0x29f   :  { %5567 = vmatprep.subr.bf16.mxu1 %v7878_v63 }
 0x2a1   :  { %5527 = vmatpush2.bf16.msra.mxu0 %v7873_v0 }
 0x2a2   :  { %5568 = vmatpush2.bf16.msra.mxu1 %v7876_v5  ;;  %5528 = vmatprep.subr.bf16.mxu0 %v7881_v6  ;;  %v7933_v5 = vld [vmem:[#allocation6 + $0x10a8] ss:$16 sps:$4 sm:$0xff]  }
 0x2a3   :  { %5569 = vmatprep.subr.bf16.mxu1 %v7884_v11  ;;  %v7936_v6 = vld [vmem:[#allocation6 + $0x12a8] ss:$16 sps:$4 sm:$0xff]  }
 0x2a5   :  { %5529 = vmatpush2.bf16.msra.mxu0 %v7879_v27 }
 0x2a6   :  { %5570 = vmatpush2.bf16.msra.mxu1 %v7882_v29  ;;  %5530 = vmatprep.subr.bf16.mxu0 %v7887_v32  ;;  %v7941_v29 = vld [vmem:[#allocation6 + $0x108c] ss:$16 sps:$4 sm:$0xff]  }
 0x2a7   :  { %5571 = vmatprep.subr.bf16.mxu1 %v7890_v12  ;;  %v7944_v32 = vld [vmem:[#allocation6 + $0x128c] ss:$16 sps:$4 sm:$0xff]   ;;  %v7939_v12 = vld [vmem:[#allocation6 + $0x1088] ss:$16 sps:$4 sm:$0xff]  }
 0x2a9   :  { %5531 = vmatpush2.bf16.msra.mxu0 %v7885_v15  ;;  %v7950_v15 = vld [vmem:[#allocation6 + $0x126c] ss:$16 sps:$4 sm:$0xff]  }
 0x2aa   :  { %5572 = vmatpush2.bf16.msra.mxu1 %v7888_v16  ;;  %5532 = vmatprep.subr.bf16.mxu0 %v7893_v19  ;;  %v7945_v16 = vld [vmem:[#allocation6 + $0x1068] ss:$16 sps:$4 sm:$0xff]  }
 0x2ab   :  { %5573 = vmatprep.subr.bf16.mxu1 %v7896_v23  ;;  %v7948_v19 = vld [vmem:[#allocation6 + $0x1268] ss:$16 sps:$4 sm:$0xff]   ;;  %v7953_v23 = vld [vmem:[#allocation6 + $0x104c] ss:$16 sps:$4 sm:$0xff]  }
 0x2ad   :  { %5533 = vmatpush2.bf16.msra.mxu0 %v7891_v24  ;;  %v7956_v24 = vld [vmem:[#allocation6 + $0x124c] ss:$16 sps:$4 sm:$0xff]  }
 0x2ae   :  { %5574 = vmatpush2.bf16.msra.mxu1 %v7894_v25  ;;  %5534 = vmatprep.subr.bf16.mxu0 %v7899_v8  ;;  %v7951_v25 = vld [vmem:[#allocation6 + $0x1048] ss:$16 sps:$4 sm:$0xff]  }
 0x2af   :  { %5575 = vmatprep.subr.bf16.mxu1 %v7902_v9  ;;  %v7954_v8 = vld [vmem:[#allocation6 + $0x1248] ss:$16 sps:$4 sm:$0xff]   ;;  %v7959_v9 = vld [vmem:[#allocation6 + $0x102c] ss:$16 sps:$4 sm:$0xff]  }
 0x2b1   :  { %5535 = vmatpush2.bf16.msra.mxu0 %v7897_v28  ;;  %v7962_v28 = vld [vmem:[#allocation6 + $0x122c] ss:$16 sps:$4 sm:$0xff]  }
 0x2b2   :  { %5576 = vmatpush2.bf16.msra.mxu1 %v7900_v30  ;;  %5536 = vmatprep.subr.bf16.mxu0 %v7905_v33  ;;  %v7957_v30 = vld [vmem:[#allocation6 + $0x1028] ss:$16 sps:$4 sm:$0xff]  }
 0x2b3   :  { %5577 = vmatprep.subr.bf16.mxu1 %v7908_v31  ;;  %v7960_v33 = vld [vmem:[#allocation6 + $0x1228] ss:$16 sps:$4 sm:$0xff]   ;;  %v7965_v31 = vld [vmem:[#allocation6 + $0x100c] ss:$16 sps:$4 sm:$0xff]  }
 0x2b5   :  { %5537 = vmatpush2.bf16.msra.mxu0 %v7903_v35  ;;  %v7968_v35 = vld [vmem:[#allocation6 + $0x120c] ss:$16 sps:$4 sm:$0xff]  }
 0x2b6   :  { %5578 = vmatpush2.bf16.msra.mxu1 %v7906_v26  ;;  %5538 = vmatprep.subr.bf16.mxu0 %v7911_v40  ;;  %v7963_v26 = vld [vmem:[#allocation6 + $0x1008] ss:$16 sps:$4 sm:$0xff]  }
 0x2b7   :  { %5579 = vmatprep.subr.bf16.mxu1 %v7914_v42  ;;  %v7966_v40 = vld [vmem:[#allocation6 + $0x1208] ss:$16 sps:$4 sm:$0xff]   ;;  %v7971_v42 = vld [vmem:[#allocation6 + $0x11ec] ss:$16 sps:$4 sm:$0xff]  }
 0x2b9   :  { %5539 = vmatpush2.bf16.msra.mxu0 %v7909_v43  ;;  %v7974_v43 = vld [vmem:[#allocation6 + $0x13ec] ss:$16 sps:$4 sm:$0xff]  }
 0x2ba   :  { %5580 = vmatpush2.bf16.msra.mxu1 %v7912_v36  ;;  %5540 = vmatprep.subr.bf16.mxu0 %v7917_v39  ;;  %v7969_v36 = vld [vmem:[#allocation6 + $0x11e8] ss:$16 sps:$4 sm:$0xff]  }
 0x2bb   :  { %5581 = vmatprep.subr.bf16.mxu1 %v7920_v41  ;;  %v7972_v39 = vld [vmem:[#allocation6 + $0x13e8] ss:$16 sps:$4 sm:$0xff]   ;;  %v7977_v41 = vld [vmem:[#allocation6 + $0x11cc] ss:$16 sps:$4 sm:$0xff]  }
 0x2bd   :  { %5541 = vmatpush2.bf16.msra.mxu0 %v7915_v38  ;;  %v7980_v38 = vld [vmem:[#allocation6 + $0x13cc] ss:$16 sps:$4 sm:$0xff]  }
 0x2be   :  { %5582 = vmatpush2.bf16.msra.mxu1 %v7918_v34  ;;  %5592 = vmatprep.subr.bf16.mxu0 %v7923_v22  ;;  %v7975_v34 = vld [vmem:[#allocation6 + $0x11c8] ss:$16 sps:$4 sm:$0xff]   ;;  %v7983_v22 = vld [vmem:[#allocation6 + $0x11ac] ss:$16 sps:$4 sm:$0xff]  }
 0x2bf   :  { %5633 = vmatprep.subr.bf16.mxu1 %v7926_v48  ;;  %v7986_v48 = vld [vmem:[#allocation6 + $0x13ac] ss:$16 sps:$4 sm:$0xff]  }
 0x2c0   :  { %v5298_v54 = vpop.f32.mrf.mxu0  ;;  %5543 = vmatmul.mubr.bf16.vlgmr.msra.gmra.mxu0 %v8397_v7 }
 0x2c1   :  { %v5339_v55 = vpop.f32.mrf.mxu1  ;;  %5584 = vmatmul.mubr.bf16.vlgmr.msra.gmra.mxu1 %v8399_v10  ;;  %v5299_v56 = vadd.f32 %v5298_v54, %v923_v52  ;;  %5593 = vmatpush1.bf16.msra.mxu0 %v7921_v45  ;;  %v7989_v52 = vld [vmem:[#allocation6 + $0x118c] ss:$16 sps:$4 sm:$0xff]   ;;  %v7993_v54 = vld [vmem:[#allocation6 + $0x1168] ss:$16 sps:$4 sm:$0xff]  }
 0x2c2   :  { %5634 = vmatpush1.bf16.msra.mxu1 %v7924_v46  ;;  %v5300_v59 = vpop.f32.mrf.mxu0  ;;  %5594 = vmatprep.subr.bf16.mxu0 %v7929_v47  ;;  %v7992_v45 = vld [vmem:[#allocation6 + $0x138c] ss:$16 sps:$4 sm:$0xff]   ;;  %v7987_v46 = vld [vmem:[#allocation6 + $0x1188] ss:$16 sps:$4 sm:$0xff]  }
 0x2c3   :  { %v5341_v61 = vpop.f32.mrf.mxu1  ;;  %5635 = vmatprep.subr.bf16.mxu1 %v7932_v51  ;;  %v8479_v62 = vadd.f32 %v5339_v55, %v5299_v56  ;;  %v5301_v63 = vadd.f32 %v5300_v59, %v927_v53  ;;  %5624 = vmatprep.mubr.bf16.mxu0 %v8401_v17  ;;  %v7942_v17 = vld [vmem:[#allocation6 + $0x1288] ss:$16 sps:$4 sm:$0xff]   ;;  %v7995_v51 = vld [vmem:[#allocation6 + $0x116c] ss:$16 sps:$4 sm:$0xff]  }
 0x2c4   :  { %5665 = vmatprep.mubr.bf16.mxu1 %v8403_v18  ;;  %v5302_v7 = vpop.f32.mrf.mxu0  ;;  %v7947_v18 = vld [vmem:[#allocation6 + $0x106c] ss:$16 sps:$4 sm:$0xff]   ;;  %v7990_v47 = vld [vmem:[#allocation6 + $0x1388] ss:$16 sps:$4 sm:$0xff]  }
 0x2c5   :  { %v5343_v10 = vpop.f32.mrf.mxu1  ;;  %v8483_v0 = vadd.f32 %v5341_v61, %v5301_v63  ;;  %5595 = vmatpush1.bf16.msra.mxu0 %v7927_v57  ;;  %v7998_v53 = vld [vmem:[#allocation6 + $0x136c] ss:$16 sps:$4 sm:$0xff]   ;;  %v7996_v55 = vld [vmem:[#allocation6 + $0x1368] ss:$16 sps:$4 sm:$0xff]  }
 0x2c6   :  { %5636 = vmatpush1.bf16.msra.mxu1 %v7930_v58  ;;  %v5303_v11 = vpop.f32.mrf.mxu0  ;;  %5596 = vmatprep.subr.bf16.mxu0 %v7935_v20  ;;  %v8001_v56 = vld [vmem:[#allocation6 + $0x114c] ss:$16 sps:$4 sm:$0xff]   ;;  %v7999_v58 = vld [vmem:[#allocation6 + $0x1148] ss:$16 sps:$4 sm:$0xff]  }
 0x2c7   :  { %v5344_v27 = vpop.f32.mrf.mxu1  ;;  %5637 = vmatprep.subr.bf16.mxu1 %v7938_v21  ;;  %v8004_v57 = vld [vmem:[#allocation6 + $0x134c] ss:$16 sps:$4 sm:$0xff]   ;;  %v8002_v59 = vld [vmem:[#allocation6 + $0x1348] ss:$16 sps:$4 sm:$0xff]  }
 0x2c8   :  { %v8007_v61 = vld [vmem:[#allocation6 + $0x112c] ss:$16 sps:$4 sm:$0xff]   ;;  %v8005_v21 = vld [vmem:[#allocation6 + $0x1128] ss:$16 sps:$4 sm:$0xff]  }
 0x2c9   :  { %5597 = vmatpush1.bf16.msra.mxu0 %v7933_v5  ;;  %v8010_v20 = vld [vmem:[#allocation6 + $0x132c] ss:$16 sps:$4 sm:$0xff]   ;;  %v8008_v63 = vld [vmem:[#allocation6 + $0x1328] ss:$16 sps:$4 sm:$0xff]  }
 0x2ca   :  { %5638 = vmatpush1.bf16.msra.mxu1 %v7936_v6  ;;  %5598 = vmatprep.subr.bf16.mxu0 %v7941_v29  ;;  %v8013_v7 = vld [vmem:[#allocation6 + $0x110c] ss:$16 sps:$4 sm:$0xff]   ;;  %v8011_v5 = vld [vmem:[#allocation6 + $0x1108] ss:$16 sps:$4 sm:$0xff]  }
 0x2cb   :  { %5639 = vmatprep.subr.bf16.mxu1 %v7944_v32  ;;  %v8016_v10 = vld [vmem:[#allocation6 + $0x130c] ss:$16 sps:$4 sm:$0xff]   ;;  %v8014_v6 = vld [vmem:[#allocation6 + $0x1308] ss:$16 sps:$4 sm:$0xff]  }
 0x2cc   :  { %v8019_v11 = vld [vmem:[#allocation6 + $0x14ec] ss:$16 sps:$4 sm:$0xff]   ;;  %v8017_v29 = vld [vmem:[#allocation6 + $0x14e8] ss:$16 sps:$4 sm:$0xff]  }
 0x2cd   :  { %5599 = vmatpush1.bf16.msra.mxu0 %v7939_v12  ;;  %v8022_v27 = vld [vmem:[#allocation6 + $0x16ec] ss:$16 sps:$4 sm:$0xff]   ;;  %v8020_v32 = vld [vmem:[#allocation6 + $0x16e8] ss:$16 sps:$4 sm:$0xff]  }
 0x2ce   :  { %5640 = vmatpush1.bf16.msra.mxu1 %v7942_v17  ;;  %5600 = vmatprep.subr.bf16.mxu0 %v7947_v18  ;;  %v8025_v12 = vld [vmem:[#allocation6 + $0x14cc] ss:$16 sps:$4 sm:$0xff]  }
 0x2cf   :  { %5641 = vmatprep.subr.bf16.mxu1 %v7950_v15  ;;  %v8028_v17 = vld [vmem:[#allocation6 + $0x16cc] ss:$16 sps:$4 sm:$0xff]  }
 0x2d1   :  { %5601 = vmatpush1.bf16.msra.mxu0 %v7945_v16 }
 0x2d2   :  { %5642 = vmatpush1.bf16.msra.mxu1 %v7948_v19  ;;  %5602 = vmatprep.subr.bf16.mxu0 %v7953_v23  ;;  %v8023_v19 = vld [vmem:[#allocation6 + $0x14c8] ss:$16 sps:$4 sm:$0xff]  }
 0x2d3   :  { %5643 = vmatprep.subr.bf16.mxu1 %v7956_v24  ;;  %v8026_v23 = vld [vmem:[#allocation6 + $0x16c8] ss:$16 sps:$4 sm:$0xff]  }
 0x2d5   :  { %5603 = vmatpush1.bf16.msra.mxu0 %v7951_v25 }
 0x2d6   :  { %5644 = vmatpush1.bf16.msra.mxu1 %v7954_v8  ;;  %5604 = vmatprep.subr.bf16.mxu0 %v7959_v9  ;;  %v8031_v8 = vld [vmem:[#allocation6 + $0x14ac] ss:$16 sps:$4 sm:$0xff]  }
 0x2d7   :  { %5645 = vmatprep.subr.bf16.mxu1 %v7962_v28  ;;  %v8034_v9 = vld [vmem:[#allocation6 + $0x16ac] ss:$16 sps:$4 sm:$0xff]  }
 0x2d9   :  { %5605 = vmatpush1.bf16.msra.mxu0 %v7957_v30 }
 0x2da   :  { %5646 = vmatpush1.bf16.msra.mxu1 %v7960_v33  ;;  %5606 = vmatprep.subr.bf16.mxu0 %v7965_v31  ;;  %v8029_v33 = vld [vmem:[#allocation6 + $0x14a8] ss:$16 sps:$4 sm:$0xff]  }
 0x2db   :  { %5647 = vmatprep.subr.bf16.mxu1 %v7968_v35  ;;  %v8032_v31 = vld [vmem:[#allocation6 + $0x16a8] ss:$16 sps:$4 sm:$0xff]  }
 0x2dd   :  { %5607 = vmatpush1.bf16.msra.mxu0 %v7963_v26 }
 0x2de   :  { %5648 = vmatpush1.bf16.msra.mxu1 %v7966_v40  ;;  %5608 = vmatprep.subr.bf16.mxu0 %v7971_v42  ;;  %v8037_v40 = vld [vmem:[#allocation6 + $0x148c] ss:$16 sps:$4 sm:$0xff]  }
 0x2df   :  { %5649 = vmatprep.subr.bf16.mxu1 %v7974_v43  ;;  %v8040_v42 = vld [vmem:[#allocation6 + $0x168c] ss:$16 sps:$4 sm:$0xff]  }
 0x2e0   :  { %v8046_v43 = vld [vmem:[#allocation6 + $0x166c] ss:$16 sps:$4 sm:$0xff]  }
 0x2e1   :  { %5609 = vmatpush2.bf16.msra.mxu0 %v7969_v36  ;;  %v8041_v36 = vld [vmem:[#allocation6 + $0x1468] ss:$16 sps:$4 sm:$0xff]  }
 0x2e2   :  { %5650 = vmatpush2.bf16.msra.mxu1 %v7972_v39  ;;  %5610 = vmatprep.subr.bf16.mxu0 %v7977_v41  ;;  %v8044_v39 = vld [vmem:[#allocation6 + $0x1668] ss:$16 sps:$4 sm:$0xff]   ;;  %v8049_v41 = vld [vmem:[#allocation6 + $0x144c] ss:$16 sps:$4 sm:$0xff]  }
 0x2e3   :  { %5651 = vmatprep.subr.bf16.mxu1 %v7980_v38  ;;  %v8052_v38 = vld [vmem:[#allocation6 + $0x164c] ss:$16 sps:$4 sm:$0xff]  }
 0x2e5   :  { %5611 = vmatpush2.bf16.msra.mxu0 %v7975_v34  ;;  %v8047_v34 = vld [vmem:[#allocation6 + $0x1448] ss:$16 sps:$4 sm:$0xff]  }
 0x2e6   :  { %5652 = vmatpush2.bf16.msra.mxu1 %v7978_v44  ;;  %5612 = vmatprep.subr.bf16.mxu0 %v7983_v22  ;;  %v8050_v44 = vld [vmem:[#allocation6 + $0x1648] ss:$16 sps:$4 sm:$0xff]   ;;  %v8055_v22 = vld [vmem:[#allocation6 + $0x142c] ss:$16 sps:$4 sm:$0xff]  }
 0x2e7   :  { %5653 = vmatprep.subr.bf16.mxu1 %v7986_v48  ;;  %v8058_v48 = vld [vmem:[#allocation6 + $0x162c] ss:$16 sps:$4 sm:$0xff]  }
 0x2e9   :  { %5613 = vmatpush2.bf16.msra.mxu0 %v7981_v50  ;;  %v8053_v50 = vld [vmem:[#allocation6 + $0x1428] ss:$16 sps:$4 sm:$0xff]  }
 0x2ea   :  { %5654 = vmatpush2.bf16.msra.mxu1 %v7984_v49  ;;  %5614 = vmatprep.subr.bf16.mxu0 %v7989_v52  ;;  %v8056_v49 = vld [vmem:[#allocation6 + $0x1628] ss:$16 sps:$4 sm:$0xff]   ;;  %v8061_v52 = vld [vmem:[#allocation6 + $0x140c] ss:$16 sps:$4 sm:$0xff]  }
 0x2eb   :  { %5655 = vmatprep.subr.bf16.mxu1 %v7992_v45  ;;  %v8064_v45 = vld [vmem:[#allocation6 + $0x160c] ss:$16 sps:$4 sm:$0xff]  }
 0x2ed   :  { %5615 = vmatpush2.bf16.msra.mxu0 %v7987_v46  ;;  %v8059_v46 = vld [vmem:[#allocation6 + $0x1408] ss:$16 sps:$4 sm:$0xff]  }
 0x2ee   :  { %5656 = vmatpush2.bf16.msra.mxu1 %v7990_v47  ;;  %5616 = vmatprep.subr.bf16.mxu0 %v7995_v51  ;;  %v8062_v47 = vld [vmem:[#allocation6 + $0x1608] ss:$16 sps:$4 sm:$0xff]   ;;  %v8067_v51 = vld [vmem:[#allocation6 + $0x15ec] ss:$16 sps:$4 sm:$0xff]  }
 0x2ef   :  { %5657 = vmatprep.subr.bf16.mxu1 %v7998_v53  ;;  %v8070_v53 = vld [vmem:[#allocation6 + $0x17ec] ss:$16 sps:$4 sm:$0xff]  }
 0x2f1   :  { %5617 = vmatpush2.bf16.msra.mxu0 %v7993_v54  ;;  %v8065_v54 = vld [vmem:[#allocation6 + $0x15e8] ss:$16 sps:$4 sm:$0xff]  }
 0x2f2   :  { %5658 = vmatpush2.bf16.msra.mxu1 %v7996_v55  ;;  %5618 = vmatprep.subr.bf16.mxu0 %v8001_v56  ;;  %v8068_v55 = vld [vmem:[#allocation6 + $0x17e8] ss:$16 sps:$4 sm:$0xff]   ;;  %v8073_v56 = vld [vmem:[#allocation6 + $0x15cc] ss:$16 sps:$4 sm:$0xff]  }
 0x2f3   :  { %5659 = vmatprep.subr.bf16.mxu1 %v8004_v57  ;;  %v8076_v57 = vld [vmem:[#allocation6 + $0x17cc] ss:$16 sps:$4 sm:$0xff]  }
 0x2f5   :  { %5619 = vmatpush2.bf16.msra.mxu0 %v7999_v58  ;;  %v8071_v58 = vld [vmem:[#allocation6 + $0x15c8] ss:$16 sps:$4 sm:$0xff]  }
 0x2f6   :  { %5660 = vmatpush2.bf16.msra.mxu1 %v8002_v59  ;;  %5620 = vmatprep.subr.bf16.mxu0 %v8007_v61  ;;  %v8074_v59 = vld [vmem:[#allocation6 + $0x17c8] ss:$16 sps:$4 sm:$0xff]   ;;  %v8079_v61 = vld [vmem:[#allocation6 + $0x15ac] ss:$16 sps:$4 sm:$0xff]  }
 0x2f7   :  { %5661 = vmatprep.subr.bf16.mxu1 %v8010_v20  ;;  %v8082_v20 = vld [vmem:[#allocation6 + $0x17ac] ss:$16 sps:$4 sm:$0xff]  }
 0x2f9   :  { %5621 = vmatpush2.bf16.msra.mxu0 %v8005_v21  ;;  %v8077_v21 = vld [vmem:[#allocation6 + $0x15a8] ss:$16 sps:$4 sm:$0xff]  }
 0x2fa   :  { %5662 = vmatpush2.bf16.msra.mxu1 %v8008_v63  ;;  %5622 = vmatprep.subr.bf16.mxu0 %v8013_v7  ;;  %v8080_v63 = vld [vmem:[#allocation6 + $0x17a8] ss:$16 sps:$4 sm:$0xff]   ;;  %v8085_v7 = vld [vmem:[#allocation6 + $0x158c] ss:$16 sps:$4 sm:$0xff]  }
 0x2fb   :  { %5663 = vmatprep.subr.bf16.mxu1 %v8016_v10  ;;  %v8088_v10 = vld [vmem:[#allocation6 + $0x178c] ss:$16 sps:$4 sm:$0xff]  }
 0x2fd   :  { %5623 = vmatpush2.bf16.msra.mxu0 %v8011_v5  ;;  %v8083_v5 = vld [vmem:[#allocation6 + $0x1588] ss:$16 sps:$4 sm:$0xff]  }
 0x2fe   :  { %5664 = vmatpush2.bf16.msra.mxu1 %v8014_v6  ;;  %5674 = vmatprep.subr.bf16.mxu0 %v8019_v11  ;;  %v8086_v6 = vld [vmem:[#allocation6 + $0x1788] ss:$16 sps:$4 sm:$0xff]   ;;  %v8091_v11 = vld [vmem:[#allocation6 + $0x156c] ss:$16 sps:$4 sm:$0xff]  }
 0x2ff   :  { %5715 = vmatprep.subr.bf16.mxu1 %v8022_v27  ;;  %v8094_v27 = vld [vmem:[#allocation6 + $0x176c] ss:$16 sps:$4 sm:$0xff]  }
 0x300   :  { %v5380_v18 = vpop.f32.mrf.mxu0  ;;  %5625 = vmatmul.mubr.bf16.vlgmr.msra.gmra.mxu0 %v8413_v3 }
 0x301   :  { %v5421_v15 = vpop.f32.mrf.mxu1  ;;  %5666 = vmatmul.mubr.bf16.vlgmr.msra.gmra.mxu1 %v8415_v4  ;;  %v5381_v16 = vadd.f32 %v5380_v18, %v8479_v62  ;;  %5675 = vmatpush1.bf16.msra.mxu0 %v8017_v29  ;;  %v8089_v29 = vld [vmem:[#allocation6 + $0x1568] ss:$16 sps:$4 sm:$0xff]  }
 0x302   :  { %5716 = vmatpush1.bf16.msra.mxu1 %v8020_v32  ;;  %v5382_v24 = vpop.f32.mrf.mxu0  ;;  %5676 = vmatprep.subr.bf16.mxu0 %v8025_v12  ;;  %v8092_v32 = vld [vmem:[#allocation6 + $0x1768] ss:$16 sps:$4 sm:$0xff]   ;;  %v8097_v12 = vld [vmem:[#allocation6 + $0x154c] ss:$16 sps:$4 sm:$0xff]  }
 0x303   :  { %v5423_v25 = vpop.f32.mrf.mxu1  ;;  %5717 = vmatprep.subr.bf16.mxu1 %v8028_v17  ;;  %v8488_v28 = vadd.f32 %v5421_v15, %v5381_v16  ;;  %v5383_v30 = vadd.f32 %v5382_v24, %v8483_v0  ;;  %5706 = vmatprep.mubr.bf16.mxu0 %v8417_v13  ;;  %v8035_v0 = vld [vmem:[#allocation6 + $0x1488] ss:$16 sps:$4 sm:$0xff]   ;;  %v8100_v17 = vld [vmem:[#allocation6 + $0x174c] ss:$16 sps:$4 sm:$0xff]  }
 0x304   :  { %5747 = vmatprep.mubr.bf16.mxu1 %v8419_v14  ;;  %v5384_v3 = vpop.f32.mrf.mxu0  ;;  %v8038_v13 = vld [vmem:[#allocation6 + $0x1688] ss:$16 sps:$4 sm:$0xff]   ;;  %v8043_v14 = vld [vmem:[#allocation6 + $0x146c] ss:$16 sps:$4 sm:$0xff]  }
 0x305   :  { %v5425_v4 = vpop.f32.mrf.mxu1  ;;  %v8493_v62 = vadd.f32 %v5423_v25, %v5383_v30  ;;  %5677 = vmatpush1.bf16.msra.mxu0 %v8023_v19  ;;  %v8095_v18 = vld [vmem:[#allocation6 + $0x1548] ss:$16 sps:$4 sm:$0xff]   ;;  %v8103_v16 = vld [vmem:[#allocation6 + $0x152c] ss:$16 sps:$4 sm:$0xff]  }
 0x306   :  { %5718 = vmatpush1.bf16.msra.mxu1 %v8026_v23  ;;  %v5385_v35 = vpop.f32.mrf.mxu0  ;;  %5678 = vmatprep.subr.bf16.mxu0 %v8031_v8  ;;  %v8098_v15 = vld [vmem:[#allocation6 + $0x1748] ss:$16 sps:$4 sm:$0xff]   ;;  %v8106_v19 = vld [vmem:[#allocation6 + $0x172c] ss:$16 sps:$4 sm:$0xff]  }
 0x307   :  { %v5426_v26 = vpop.f32.mrf.mxu1  ;;  %5719 = vmatprep.subr.bf16.mxu1 %v8034_v9  ;;  %v8101_v23 = vld [vmem:[#allocation6 + $0x1528] ss:$16 sps:$4 sm:$0xff]   ;;  %v8109_v25 = vld [vmem:[#allocation6 + $0x150c] ss:$16 sps:$4 sm:$0xff]  }
 0x308   :  { %v8104_v24 = vld [vmem:[#allocation6 + $0x1728] ss:$16 sps:$4 sm:$0xff]   ;;  %v8112_v8 = vld [vmem:[#allocation6 + $0x170c] ss:$16 sps:$4 sm:$0xff]  }
 0x309   :  { %5679 = vmatpush1.bf16.msra.mxu0 %v8029_v33  ;;  %v8107_v9 = vld [vmem:[#allocation6 + $0x1508] ss:$16 sps:$4 sm:$0xff]   ;;  %v5757_v33 = vmax.f32 %v8473_v60, 0.0 }
 0x30a   :  { %5720 = vmatpush1.bf16.msra.mxu1 %v8032_v31  ;;  %5680 = vmatprep.subr.bf16.mxu0 %v8037_v40  ;;  %v8110_v30 = vld [vmem:[#allocation6 + $0x1708] ss:$16 sps:$4 sm:$0xff]   ;;  %v5790_v31 = vld [vmem:[%s8725_s3 + $0xf0] sm:$0xff] }
 0x30b   :  { %5721 = vmatprep.subr.bf16.mxu1 %v8040_v42  ;;  %v5791_v3 = vld [vmem:[%s8725_s3 + $0xf8] sm:$0xff]  ;;  %v5774_v40 = vld [vmem:[%s8725_s3 + $0x70] sm:$0xff]  ;;  %v5789_v60 = vld [vmem:[%s8725_s3 + $0xe8] sm:$0xff] }
 0x30c   :  { %v5775_v4 = vld [vmem:[%s8725_s3 + $0x78] sm:$0xff] }
 0x30d   :  { %5681 = vmatpush1.bf16.msra.mxu0 %v8035_v0 }
 0x30e   :  { %5722 = vmatpush1.bf16.msra.mxu1 %v8038_v13  ;;  %5682 = vmatprep.subr.bf16.mxu0 %v8043_v14 }
 0x30f   :  { %5723 = vmatprep.subr.bf16.mxu1 %v8046_v43 }
 0x311   :  { %5683 = vmatpush1.bf16.msra.mxu0 %v8041_v36 }
 0x312   :  { %5724 = vmatpush1.bf16.msra.mxu1 %v8044_v39  ;;  %5684 = vmatprep.subr.bf16.mxu0 %v8049_v41  ;;  %v5772_v39 = vld [vmem:[%s8725_s3 + $0x60] sm:$0xff] }
 0x313   :  { %5725 = vmatprep.subr.bf16.mxu1 %v8052_v38  ;;  %v5787_v38 = vld [vmem:[%s8725_s3 + $0xd8] sm:$0xff] }
 0x315   :  { %5685 = vmatpush1.bf16.msra.mxu0 %v8047_v34 }
 0x316   :  { %5726 = vmatpush1.bf16.msra.mxu1 %v8050_v44  ;;  %5686 = vmatprep.subr.bf16.mxu0 %v8055_v22  ;;  %v5823_v22 = vld [vmem:[%s8725_s3 + $0x1f8] sm:$0xff] }
 0x317   :  { %5727 = vmatprep.subr.bf16.mxu1 %v8058_v48  ;;  %v5807_v48 = vld [vmem:[%s8725_s3 + $0x178] sm:$0xff] }
 0x319   :  { %5687 = vmatpush1.bf16.msra.mxu0 %v8053_v50  ;;  %v5822_v50 = vld [vmem:[%s8725_s3 + $0x1f0] sm:$0xff] }
 0x31a   :  { %5728 = vmatpush1.bf16.msra.mxu1 %v8056_v49  ;;  %5688 = vmatprep.subr.bf16.mxu0 %v8061_v52  ;;  %v5786_v49 = vld [vmem:[%s8725_s3 + $0xd0] sm:$0xff] }
 0x31b   :  { %5729 = vmatprep.subr.bf16.mxu1 %v8064_v45  ;;  %v5806_v52 = vld [vmem:[%s8725_s3 + $0x170] sm:$0xff] }
 0x31c   :  { %v5770_v45 = vld [vmem:[%s8725_s3 + $0x50] sm:$0xff] }
 0x31d   :  { %5689 = vmatpush1.bf16.msra.mxu0 %v8059_v46  ;;  %v5821_v46 = vld [vmem:[%s8725_s3 + $0x1e8] sm:$0xff] }
 0x31e   :  { %5730 = vmatpush1.bf16.msra.mxu1 %v8062_v47  ;;  %5690 = vmatprep.subr.bf16.mxu0 %v8067_v51  ;;  %v5785_v47 = vld [vmem:[%s8725_s3 + $0xc8] sm:$0xff] }
 0x31f   :  { %5731 = vmatprep.subr.bf16.mxu1 %v8070_v53  ;;  %v5805_v51 = vld [vmem:[%s8725_s3 + $0x168] sm:$0xff] }
 0x320   :  { %v5769_v53 = vld [vmem:[%s8725_s3 + $0x48] sm:$0xff] }
 0x321   :  { %5691 = vmatpush2.bf16.msra.mxu0 %v8065_v54  ;;  %v5820_v54 = vld [vmem:[%s8725_s3 + $0x1e0] sm:$0xff] }
 0x322   :  { %5732 = vmatpush2.bf16.msra.mxu1 %v8068_v55  ;;  %5692 = vmatprep.subr.bf16.mxu0 %v8073_v56  ;;  %v5784_v55 = vld [vmem:[%s8725_s3 + $0xc0] sm:$0xff] }
 0x323   :  { %5733 = vmatprep.subr.bf16.mxu1 %v8076_v57  ;;  %v5804_v56 = vld [vmem:[%s8725_s3 + $0x160] sm:$0xff] }
 0x324   :  { %v5768_v57 = vld [vmem:[%s8725_s3 + $0x40] sm:$0xff] }
 0x325   :  { %5693 = vmatpush2.bf16.msra.mxu0 %v8071_v58  ;;  %v5819_v58 = vld [vmem:[%s8725_s3 + $0x1d8] sm:$0xff] }
 0x326   :  { %5734 = vmatpush2.bf16.msra.mxu1 %v8074_v59  ;;  %5694 = vmatprep.subr.bf16.mxu0 %v8079_v61  ;;  %v5783_v59 = vld [vmem:[%s8725_s3 + $0xb8] sm:$0xff] }
 0x327   :  { %5735 = vmatprep.subr.bf16.mxu1 %v8082_v20  ;;  %v5803_v61 = vld [vmem:[%s8725_s3 + $0x158] sm:$0xff] }
 0x328   :  { %v5767_v20 = vld [vmem:[%s8725_s3 + $0x38] sm:$0xff] }
 0x329   :  { %5695 = vmatpush2.bf16.msra.mxu0 %v8077_v21  ;;  %v5818_v21 = vld [vmem:[%s8725_s3 + $0x1d0] sm:$0xff] }
 0x32a   :  { %5736 = vmatpush2.bf16.msra.mxu1 %v8080_v63  ;;  %5696 = vmatprep.subr.bf16.mxu0 %v8085_v7  ;;  %v5782_v63 = vld [vmem:[%s8725_s3 + $0xb0] sm:$0xff] }
 0x32b   :  { %5737 = vmatprep.subr.bf16.mxu1 %v8088_v10  ;;  %v5802_v7 = vld [vmem:[%s8725_s3 + $0x150] sm:$0xff] }
 0x32c   :  { %v5766_v10 = vld [vmem:[%s8725_s3 + $0x30] sm:$0xff] }
 0x32d   :  { %5697 = vmatpush2.bf16.msra.mxu0 %v8083_v5  ;;  %v5817_v5 = vld [vmem:[%s8725_s3 + $0x1c8] sm:$0xff] }
 0x32e   :  { %5738 = vmatpush2.bf16.msra.mxu1 %v8086_v6  ;;  %5698 = vmatprep.subr.bf16.mxu0 %v8091_v11  ;;  %v5781_v6 = vld [vmem:[%s8725_s3 + $0xa8] sm:$0xff] }
 0x32f   :  { %5739 = vmatprep.subr.bf16.mxu1 %v8094_v27  ;;  %v5801_v11 = vld [vmem:[%s8725_s3 + $0x148] sm:$0xff] }
 0x330   :  { %v5765_v27 = vld [vmem:[%s8725_s3 + $0x28] sm:$0xff] }
 0x331   :  { %5699 = vmatpush2.bf16.msra.mxu0 %v8089_v29  ;;  %v5816_v29 = vld [vmem:[%s8725_s3 + $0x1c0] sm:$0xff] }
 0x332   :  { %5740 = vmatpush2.bf16.msra.mxu1 %v8092_v32  ;;  %5700 = vmatprep.subr.bf16.mxu0 %v8097_v12  ;;  %v5780_v32 = vld [vmem:[%s8725_s3 + $0xa0] sm:$0xff] }
 0x333   :  { %5741 = vmatprep.subr.bf16.mxu1 %v8100_v17  ;;  %v5800_v12 = vld [vmem:[%s8725_s3 + $0x140] sm:$0xff] }
 0x334   :  { %v5764_v17 = vld [vmem:[%s8725_s3 + $0x20] sm:$0xff] }
 0x335   :  { %5701 = vmatpush2.bf16.msra.mxu0 %v8095_v18  ;;  %v5815_v18 = vld [vmem:[%s8725_s3 + $0x1b8] sm:$0xff] }
 0x336   :  { %5742 = vmatpush2.bf16.msra.mxu1 %v8098_v15  ;;  %5702 = vmatprep.subr.bf16.mxu0 %v8103_v16  ;;  %v5779_v15 = vld [vmem:[%s8725_s3 + $0x98] sm:$0xff] }
 0x337   :  { %5743 = vmatprep.subr.bf16.mxu1 %v8106_v19  ;;  %v5799_v16 = vld [vmem:[%s8725_s3 + $0x138] sm:$0xff] }
 0x338   :  { %v5763_v19 = vld [vmem:[%s8725_s3 + $0x18] sm:$0xff] }
 0x339   :  { %5703 = vmatpush2.bf16.msra.mxu0 %v8101_v23  ;;  %v5814_v23 = vld [vmem:[%s8725_s3 + $0x1b0] sm:$0xff] }
 0x33a   :  { %5744 = vmatpush2.bf16.msra.mxu1 %v8104_v24  ;;  %5704 = vmatprep.subr.bf16.mxu0 %v8109_v25  ;;  %v5778_v24 = vld [vmem:[%s8725_s3 + $0x90] sm:$0xff] }
 0x33b   :  { %5745 = vmatprep.subr.bf16.mxu1 %v8112_v8  ;;  %v5798_v25 = vld [vmem:[%s8725_s3 + $0x130] sm:$0xff] }
 0x33c   :  { %v5762_v8 = vld [vmem:[%s8725_s3 + $0x10] sm:$0xff] }
 0x33d   :  { %5705 = vmatpush2.bf16.msra.mxu0 %v8107_v9  ;;  %v5813_v9 = vld [vmem:[%s8725_s3 + $0x1a8] sm:$0xff] }
 0x33e   :  { %5746 = vmatpush2.bf16.msra.mxu1 %v8110_v30  ;;  %6878 = vmatprep.subr.mxu0 %v5791_v3  ;;  %v5777_v30 = vld [vmem:[%s8725_s3 + $0x88] sm:$0xff] }
 0x33f   :  { %6913 = vmatprep.subr.mxu1 %v5823_v22  ;;  %v5797_v3 = vld [vmem:[%s8725_s3 + $0x128] sm:$0xff] }
 0x340   :  { %v5462_v35 = vpop.f32.mrf.mxu0  ;;  %5707 = vmatmul.mubr.bf16.vlgmr.msra.gmra.mxu0 %v8431_v1  ;;  %v5773_v1 = vld [vmem:[%s8725_s3 + $0x68] sm:$0xff] }
 0x341   :  { %v5503_v26 = vpop.f32.mrf.mxu1  ;;  %5748 = vmatmul.mubr.bf16.vlgmr.msra.gmra.mxu1 %v8433_v2  ;;  %v5463_v42 = vadd.f32 %v5462_v35, %v8488_v28  ;;  %6879 = vmatpush3.msra.mxu0 %v5775_v4  ;;  %v5788_v28 = vld [vmem:[%s8725_s3 + $0xe0] sm:$0xff]  ;;  %v5761_v4 = vld [vmem:[%s8725_s3 + $0x8] sm:$0xff]  ;;  %v5756_v35 = vmax.f32 %v8468_v37, 0.0  ;;  %v5811_v37 = vld [vmem:[%s8725_s3 + $0x198] sm:$0xff] }
 0x342   :  { %5901 = vmatprep.mubr.f32.mxu0 %v5757_v33  ;;  %v5464_v0 = vpop.f32.mrf.mxu0  ;;  %6880 = vmatprep.subr.mxu0 %v5790_v31  ;;  %v5776_v33 = vld [vmem:[%s8725_s3 + $0x80] sm:$0xff]  ;;  %v5793_v22 = vld [vmem:[%s8725_s3 + $0x108] sm:$0xff] }
 0x343   :  { %v5505_v13 = vpop.f32.mrf.mxu1  ;;  %v8517_v2 = vadd.f32 %v5503_v26, %v5463_v42  ;;  %v5465_v14 = vadd.f32 %v5464_v0, %v8493_v62  ;;  %6881 = vmatpush3.msra.mxu0 %v5774_v40  ;;  %v5771_v62 = vld [vmem:[%s8725_s3 + $0x58] sm:$0xff]  ;;  %6914 = vmatpush3.msra.mxu1 %v5807_v48  ;;  %v5760_v31 = vld [vmem:[%s8725_s3] sm:$0xff] }
 0x344   :  { %v5466_v43 = vpop.f32.mrf.mxu0  ;;  %6882 = vmatprep.subr.mxu0 %v5789_v60  ;;  %6915 = vmatprep.subr.mxu1 %v5822_v50  ;;  %v5812_v26 = vld [vmem:[%s8725_s3 + $0x1a0] sm:$0xff] }
 0x345   :  { %v5507_v36 = vpop.f32.mrf.mxu1  ;;  %v8526_v41 = vadd.f32 %v5505_v13, %v5465_v14  ;;  %6883 = vmatpush3.msra.mxu0 %v5773_v1  ;;  %6916 = vmatpush3.msra.mxu1 %v5806_v52  ;;  %v5796_v60 = vld [vmem:[%s8725_s3 + $0x120] sm:$0xff]  ;;  %v5795_v14 = vld [vmem:[%s8725_s3 + $0x118] sm:$0xff] }
 0x346   :  { %v5467_v34 = vpop.f32.mrf.mxu0  ;;  %6884 = vmatprep.subr.mxu0 %v5788_v28  ;;  %6917 = vmatprep.subr.mxu1 %v5821_v46  ;;  %v5808_v48 = vld [vmem:[%s8725_s3 + $0x180] sm:$0xff] }
 0x347   :  { %v5508_v44 = vpop.f32.mrf.mxu1  ;;  %6885 = vmatpush3.msra.mxu0 %v5772_v39  ;;  %6918 = vmatpush3.msra.mxu1 %v5805_v51  ;;  %v5809_v34 = vld [vmem:[%s8725_s3 + $0x188] sm:$0xff]  ;;  %v5792_v50 = vld [vmem:[%s8725_s3 + $0x100] sm:$0xff] }
 0x348   :  { %6886 = vmatprep.subr.mxu0 %v5787_v38  ;;  %6919 = vmatprep.subr.mxu1 %v5820_v54  ;;  %v5794_v38 = vld [vmem:[%s8725_s3 + $0x110] sm:$0xff] }
 0x349   :  { %6887 = vmatpush3.msra.mxu0 %v5771_v62  ;;  %6920 = vmatpush3.msra.mxu1 %v5804_v56 }
 0x34a   :  { %6888 = vmatprep.subr.mxu0 %v5786_v49  ;;  %6921 = vmatprep.subr.mxu1 %v5819_v58  ;;  %v8283_v49 = vmov 0  }
 0x34b   :  { %6889 = vmatpush3.msra.mxu0 %v5770_v45  ;;  %6922 = vmatpush3.msra.mxu1 %v5803_v61 }
 0x34c   :  { %6890 = vmatprep.subr.mxu0 %v5785_v47  ;;  %6923 = vmatprep.subr.mxu1 %v5818_v21 }
 0x34d   :  { %6891 = vmatpush3.msra.mxu0 %v5769_v53  ;;  %6924 = vmatpush3.msra.mxu1 %v5802_v7 }
 0x34e   :  { %6892 = vmatprep.subr.mxu0 %v5784_v55  ;;  %6925 = vmatprep.subr.mxu1 %v5817_v5 }
 0x34f   :  { %6893 = vmatpush3.msra.mxu0 %v5768_v57  ;;  %6926 = vmatpush3.msra.mxu1 %v5801_v11 }
 0x350   :  { %6894 = vmatprep.subr.mxu0 %v5783_v59  ;;  %6927 = vmatprep.subr.mxu1 %v5816_v29 }
 0x351   :  { %6895 = vmatpush3.msra.mxu0 %v5767_v20  ;;  %6928 = vmatpush3.msra.mxu1 %v5800_v12 }
 0x352   :  { %6896 = vmatprep.subr.mxu0 %v5782_v63  ;;  %6929 = vmatprep.subr.mxu1 %v5815_v18  ;;  %v5825_v18 = vld [vmem:[%s8727_s5] sm:$0xff] }
 0x353   :  { %6897 = vmatpush3.msra.mxu0 %v5766_v10  ;;  %6930 = vmatpush3.msra.mxu1 %v5799_v16  ;;  %v5827_v16 = vld [vmem:[%s8727_s5 + $0x10] sm:$0xff] }
 0x354   :  { %6898 = vmatprep.subr.mxu0 %v5781_v6  ;;  %6931 = vmatprep.subr.mxu1 %v5814_v23 }
 0x355   :  { %6899 = vmatpush3.msra.mxu0 %v5765_v27  ;;  %6932 = vmatpush3.msra.mxu1 %v5798_v25 }
 0x356   :  { %6900 = vmatprep.subr.mxu0 %v5780_v32  ;;  %6933 = vmatprep.subr.mxu1 %v5813_v9 }
 0x357   :  { %6901 = vmatpush3.msra.mxu0 %v5764_v17  ;;  %6934 = vmatpush3.msra.mxu1 %v5797_v3 }
 0x358   :  { %6902 = vmatprep.subr.mxu0 %v5779_v15  ;;  %6935 = vmatprep.subr.mxu1 %v5812_v26  ;;  %v5826_v15 = vld [vmem:[%s8727_s5 + $0x8] sm:$0xff] }
 0x359   :  { %6903 = vmatpush3.msra.mxu0 %v5763_v19  ;;  %6936 = vmatpush3.msra.mxu1 %v5796_v60  ;;  %v5828_v19 = vld [vmem:[%s8727_s5 + $0x18] sm:$0xff] }
 0x35a   :  { %6904 = vmatprep.subr.mxu0 %v5778_v24  ;;  %6937 = vmatprep.subr.mxu1 %v5811_v37 }
 0x35b   :  { %6905 = vmatpush3.msra.mxu0 %v5762_v8  ;;  %6938 = vmatpush3.msra.mxu1 %v5795_v14  ;;  %v6875_v8 = vld [vmem:[#allocation9] ss:$0 sm:$0xff] }
 0x35c   :  { %6906 = vmatprep.subr.mxu0 %v5777_v30  ;;  %6959 = vset.pattern.permute.xlu0 %v8283_v49 }
 0x35d   :  { %6907 = vmatpush3.msra.mxu0 %v5761_v4  ;;  %6960 = vset.pattern.permute.xlu1 %v8283_v49 }
 0x35e   :  { %6908 = vmatprep.subr.mxu0 %v5776_v33  ;;  %6017 = vperm.xlu0 %6959, %v5825_v18  }
 0x35f   :  { %6909 = vmatpush3.msra.mxu0 %v5760_v31  ;;  %6027 = vperm.xlu1 %6960, %v5827_v16  }
 0x360   :  { %5902 = vmatmul.mubr.f32.vlgmr.msra.gmra.mxu0 %v5756_v35 }
 0x362   :  { %6022 = vperm.xlu0 %6959, %v5826_v15  }
 0x363   :  { %6032 = vperm.xlu1 %6960, %v5828_v19  }
 0x380   :  { %v5544_v40 = vpop.f32.mrf.mxu0 }
 0x381   :  { %v5585_v42 = vpop.f32.mrf.mxu1  ;;  %v5545_v0 = vadd.f32 %v5544_v40, %v8517_v2  ;;  %v5810_v2 = vld [vmem:[%s8725_s3 + $0x190] sm:$0xff] }
 0x382   :  { %v5546_v13 = vpop.f32.mrf.mxu0  ;;  %6939 = vmatprep.subr.mxu1 %v5810_v2 }
 0x383   :  { %v5587_v1 = vpop.f32.mrf.mxu1  ;;  %v5586_v28 = vadd.f32 %v5585_v42, %v5545_v0  ;;  %v5547_v43 = vadd.f32 %v5546_v13, %v8526_v41  ;;  %6940 = vmatpush3.msra.mxu1 %v5794_v38 }
 0x384   :  { %v5548_v36 = vpop.f32.mrf.mxu0  ;;  %6941 = vmatprep.subr.mxu1 %v5809_v34 }
 0x385   :  { %v5589_v39 = vpop.f32.mrf.mxu1  ;;  %v5588_v62 = vadd.f32 %v5587_v1, %v5547_v43  ;;  %6942 = vmatpush3.msra.mxu1 %v5793_v22 }
 0x386   :  { %v5549_v44 = vpop.f32.mrf.mxu0  ;;  %6943 = vmatprep.subr.mxu1 %v5808_v48 }
 0x387   :  { %v5590_v41 = vpop.f32.mrf.mxu1  ;;  %6944 = vmatpush3.msra.mxu1 %v5792_v50 }
 0x3c0   :  { %v5626_v52 = vpop.f32.mrf.mxu0 }
 0x3c1   :  { %v5667_v45 = vpop.f32.mrf.mxu1  ;;  %v5627_v46 = vadd.f32 %v5626_v52, %v5586_v28 }
 0x3c2   :  { %v5628_v47 = vpop.f32.mrf.mxu0 }
 0x3c3   :  { %v5669_v51 = vpop.f32.mrf.mxu1  ;;  %v5668_v53 = vadd.f32 %v5667_v45, %v5627_v46  ;;  %v5629_v58 = vadd.f32 %v5628_v47, %v5588_v62  ;;  %v6053_v47 = vstv %s8728_s6 }
 0x3c4   :  { %v5630_v54 = vpop.f32.mrf.mxu0 }
 0x3c5   :  { %v5671_v55 = vpop.f32.mrf.mxu1  ;;  %v5670_v20 = vadd.f32 %v5669_v51, %v5629_v58 }
 0x3c6   :  { %v5631_v56 = vpop.f32.mrf.mxu0 }
 0x3c7   :  { %v5672_v57 = vpop.f32.mrf.mxu1 }
 0x3d9   :  { %v6018_v42 = vpop.permute.xlu0 %6017 }
 0x3da   :  { %v6028_v1 = vpop.permute.xlu1 %6027 }
 0x3dd   :  { %v6023_v60 = vpop.permute.xlu0 %6022 }
 0x3de   :  { %v6033_v62 = vpop.permute.xlu1 %6032 }
 0x400   :  { %v5708_v59 = vpop.f32.mrf.mxu0 }
 0x401   :  { %v5749_v61 = vpop.f32.mrf.mxu1  ;;  %v5709_v21 = vadd.f32 %v5708_v59, %v5668_v53 }
 0x402   :  { %v5710_v63 = vpop.f32.mrf.mxu0 }
 0x403   :  { %v5751_v7 = vpop.f32.mrf.mxu1  ;;  %v5711_v10 = vadd.f32 %v5710_v63, %v5670_v20  ;;  %v5750_v5 = vadd.f32 %v5749_v61, %v5709_v21 }
 0x404   :  { %v5712_v6 = vpop.f32.mrf.mxu0 }
 0x405   :  { %v5753_v11 = vpop.f32.mrf.mxu1  ;;  %v5752_v27 = vadd.f32 %v5751_v7, %v5711_v10  ;;  %v5758_v17 = vmax.f32 %v5750_v5, 0.0 }
 0x406   :  { %v5713_v29 = vpop.f32.mrf.mxu0 }
 0x407   :  { %v5754_v32 = vpop.f32.mrf.mxu1  ;;  %v5759_v12 = vmax.f32 %v5752_v27, 0.0 }
 0x409   :  { %5971 = vmatprep.mubr.f32.mxu1 %v5759_v12 }
 0x40a   :  { %5972 = vmatmul.mubr.f32.vlgmr.msra.gmra.mxu1 %v5758_v17 }
 0x420   :  { %v6910_v23 = vpop.f32.mrf.mxu0 }
 0x422   :  { %v6911_v24 = vpop.f32.mrf.mxu0 }
 0x423   :  { %v6912_v25 = vadd.f32 %v6911_v24, %v6910_v23 }
 0x425   :  { %v5904_v3 = vadd.f32 %v6912_v25, %v6875_v8 }
 0x4ca   :  { %v6945_v9 = vpop.f32.mrf.mxu1 }
 0x4cc   :  { %v6946_v30 = vpop.f32.mrf.mxu1 }
 0x4cd   :  { %v6947_v4 = vadd.f32 %v6946_v30, %v6945_v9 }
 0x4cf   :  { %v5974_v33 = vadd.f32 %v6947_v4, %v5904_v3 }
 0x4d1   :  { %v6876_v31 = vmul.f32 -1.442695, %v5974_v33 }
 0x4d3   :  { %8113 = vpow2.f32 %v6876_v31 }
 0x4e0   :  { %v8114_v35 = vpop.eup %8113 }
 0x4e1   :  { %v5980_v26 = vadd.f32 1.0, %v8114_v35 }
 0x4e3   :  { %8115 = vrcp.f32 %v5980_v26 }
 0x4f0   :  { %v8116_v40 = vpop.eup %8115 }
 0x4f1   :  { %5983 = vxpose.xlu0.b32.start.end [1/1] (short) (narrow) %v8116_v40, 32 }
 0x56d   :  { %v5999_v0 = vpop.trf.xlu0 }
 0x56e   :  { %v6035_v14 = vmul.f32 %v6018_v42, %v5999_v0 }
 0x570   :  { %v6040_v36 = vsel %vm6039_vm0, %v6035_v14, 0.0 }
 0x571   :  { %v6000_v37 = vpop.trf.xlu0 }
 0x572   :  { %v6036_v13 = vmul.f32 %v6023_v60, %v6000_v37 }
 0x574   :  { %v6041_v43 = vsel %vm6039_vm0, %v6036_v13, 0.0 }
 0x575   :  { %v6001_v28 = vpop.trf.xlu0  ;;  %v6042_v38 = vadd.f32 %v6041_v43, %v6040_v36 }
 0x576   :  { %v6037_v2 = vmul.f32 %v6028_v1, %v6001_v28 }
 0x578   :  { %v6043_v39 = vsel %vm6039_vm0, %v6037_v2, 0.0 }
 0x579   :  { %v6002_v34 = vpop.trf.xlu0  ;;  %v6044_v41 = vadd.f32 %v6043_v39, %v6042_v38 }
 0x57a   :  { %v6038_v44 = vmul.f32 %v6033_v62, %v6002_v34 }
 0x57c   :  { %v6045_v22 = vsel %vm6039_vm0, %v6038_v44, 0.0 }
 0x57d   :  { %v6046_v48 = vadd.f32 %v6045_v22, %v6044_v41 }
 0x57f   :  { %v6047_v50 = vrot.slane %v6046_v48, 4 }
 0x581   :  { %v6048_v49 = vadd.f32 %v6047_v50, %v6046_v48 }
 0x583   :  { %v6049_v52 = vrot.slane %v6048_v49, 2 }
 0x585   :  { %v6050_v45 = vadd.f32 %v6049_v52, %v6048_v49 }
 0x587   :  { %v6051_v46 = vrot.slane %v6050_v45, 1 }
 0x589   :  { %v6052_v51 = vadd.f32 %v6051_v46, %v6050_v45 }
 0x58b   :  { %v6054_v53 = vadd.f32 %v6053_v47, %v6052_v51 }
 0x58d   :  { %v6877_v54 = vmul.f32 -1.442695, %v6054_v53 }
 0x58f   :  { %8117 = vpow2.f32 %v6877_v54 }
 0x59c   :  { %v8118_v55 = vpop.eup %8117 }
 0x59d   :  { %v6058_v56 = vadd.f32 1.0, %v8118_v55 }
 0x59f   :  { %8119 = vrcp.f32 %v6058_v56 }
 0x5ac   :  { %v8120_v57 = vpop.eup %8119 }
 0x5ad   :  { %6062 = vst.msk [vmem:[#allocation12] sm:$0x1] %vm6061_vm1, %v8120_v57  ;;  %8121 = vlog2.f32 %v8120_v57  ;;  %v6066_v58 = vsub.f32 1.0, %v8120_v57 }
 0x5ae   :  { %8237 = shalt.err (!%p8234_p1)
}
 0x5af   :  { %6085 = dma.vmem_to_hbm [thread:$0]  %s6083_s19, 16, %s8730_s8, [#allocation5]   ;;  %8123 = vlog2.f32 %v6066_v58  ;;  %v5830_v61 = vld [vmem:[#allocation11] sm:$0x1] }
 0x5b0   :  { %v6071_v10 = vsub.f32 1.0, %v5830_v61  ;;  %s8285_s23 = smov [#allocation13]  }
 0x5b1   :  { %s6092_s24 = sshll.u32 %s8285_s23, 4  ;;  %s6093_s24 = int_to_ptr.vmem [resolvable:$true] %s6092_s24 }
 0x5b2   :  { %s8246_s1 = scalar_lea.vmem %s6093_s24, 16  ;;  %s8250_s8 = scalar_lea.vmem %s6093_s24, 32 }
 0x5b3   :  { %p8247_p2 = scmp.ne.s32.totalorder %s6093_s24, %s8246_s1  ;;  %p8251_p3 = scmp.lt.s32.totalorder %s6093_s24, %s6093_s24 }
 0x5b4   :  { %p8252_p4 = scmp.lt.s32.totalorder %s8250_s8, %s8246_s1 }
 0x5b6   :  { %p8253_p5 = por %p8252_p4, %p8251_p3 }
 0x5b8   :  { %p8254_p6 = pnand %p8253_p5, %p8247_p2 }
 0x5ba   :  { %v8122_v59 = vpop.eup %8121 }
 0x5bb   :  { %v6064_v20 = vmul.f32 0.6931472, %v8122_v59 }
 0x5bc   :  { %v8124_v21 = vpop.eup %8123 }
 0x5bd   :  { %v6065_v63 = vmax.f32 %v6064_v20, -100.0  ;;  %v6068_v7 = vmul.f32 0.6931472, %v8124_v21 }
 0x5bf   :  { %v6069_v5 = vmax.f32 %v6068_v7, -100.0  ;;  %v6070_v6 = vmul.f32 %v6065_v63, %v5830_v61 }
 0x5c1   :  { %v6072_v11 = vmul.f32 %v6071_v10, %v6069_v5 }
 0x5c3   :  { %v6073_v27 = vadd.f32 %v6072_v11, %v6070_v6 }
 0x5c5   :  { %v6074_v29 = vsub.f32 0.0, %v6073_v27 }
 0x5c7   :  { %6075 = vst.msk [vmem:[#allocation13] sm:$0x1] %vm6061_vm1, %v6074_v29 }
 0x5c8   :  { %8257 = shalt.err (!%p8254_p6)
}
 0x5c9   :  { %6095 = dma.vmem_to_hbm [thread:$0]  %s6093_s24, 16, %s8731_s9, [#allocation14]  }
 0x5ca   :  { %8272 = dma.done.wait [#allocation5], 16  }
 0x5cb   :  { %8273 = vsyncadd [#allocation5], 4294967280 }
 0x5cc   :  { %8274 = dma.done.wait [#allocation14], 16  }
 0x5cd   :  { %8275 = vsyncadd [#allocation14], 4294967280 }
 0x5ce   :  { %6102 = vsyncpa [#allocation4], 1 }
 0x5cf   :  { %6103 = vsyncpa [#allocation7], 1 }
 0x5d0   :  { %6104 = vsyncpa [#allocation10], 1 }
 0x5d1   :  { %6105 = vsyncpa [#allocation5], 1 }
 0x5d2   :  { %6106 = vsyncpa [#allocation14], 1 }

</bundles_post_ra>
